<compile_context>
chip_gen: v6e
topology: v6e:2x2x1
jax: 0.10.0
libtpu: 0.0.40
codegen_flags: <defaults>
</compile_context>

<pallas_src>
import math
import numpy as np
import jax
import jax.numpy as jnp
from jax.experimental import pallas as pl
from jax.experimental.pallas import tpu as pltpu


def rbfkan_kernel(x_ref, ct_ref, nls2_ref, kan_ref, wt_ref, o_ref):
    # x_ref    : [TB, d_in]     (VMEM, f32)   input rows
    # ct_ref   : [d_in, N_c]    (VMEM, f32)   centers, pre-transposed
    # nls2_ref : [1, N_c]       (VMEM, f32)   -(log_shapes**2)
    # kan_ref  : [d_in]         (SMEM, f32)   KAN weights (scalar reads)
    # wt_ref   : [N_c, d_out]   (VMEM, bf16)  RBF weights, pre-transposed
    # o_ref    : [TB, d_out]    (VMEM, f32)
    tb = x_ref.shape[0]
    d_in, n_c = ct_ref.shape

    # Hoist the invariant sublane broadcast out of the feature loop.
    nls2 = jnp.broadcast_to(nls2_ref[...], (tb, n_c))        # [TB, N_c]

    # Per-feature 2-D formulation: everything stays in [TB, N_c] tiles with
    # the centers axis on lanes; no 3-D intermediate, no relayouts.
    psi = None
    for i in range(d_in):                                    # static unroll
        xi = x_ref[:, i:i + 1]                               # [TB, 1]
        ci = ct_ref[i:i + 1, :]                              # [1, N_c]
        d = xi - ci                                          # [TB, N_c]
        phi = jnp.exp(nls2 * (d * d))                        # gaussian RBF
        denom = 1e-9 + jnp.sum(phi, axis=-1, keepdims=True)  # [TB, 1]
        # Fold normalization + KAN weight into one scale (reciprocal -> EUP).
        scale = kan_ref[i] * pl.reciprocal(denom, approx=True)
        contrib = scale * phi
        psi = contrib if psi is None else psi + contrib      # [TB, N_c]

    # Contract over centers on the MXU with bf16 operands + f32 accumulation.
    out = jnp.dot(psi.astype(jnp.bfloat16), wt_ref[...],
                  preferred_element_type=jnp.float32)
    o_ref[...] = out.astype(o_ref.dtype)


def _pick_batch_tile(B):
    """Batch tile: always a multiple of 8 (sublane divisibility).

    Use a single grid step when the whole (padded) batch fits the tile cap:
    v5e/v6e have one TensorCore, so extra grid steps are pure per-step
    overhead (~600 cycles each).  For large batches cap the tile at 2048
    rows, which keeps the double-buffered in/out tiles plus the in-kernel
    [tb, N_c] temporaries to a few MiB -- inside v7x's smaller VMEM -- and
    splits work across v7x's two TensorCores via the 'parallel' grid axis.
    """
    cap = 2048
    b8 = max(8, ((B + 7) // 8) * 8)
    return min(b8, cap)


def rbfkan_forward(x, centers, log_shapes, kan_weights, weights, *, tb=None):
    B, d_in = x.shape
    n_c, d_in_c = centers.shape
    d_out, n_c_w = weights.shape
    assert d_in_c == d_in and n_c_w == n_c

    if tb is None:
        tb = _pick_batch_tile(B)
    assert tb % 8 == 0

    # Pad the batch up to a multiple of the tile (rows of zeros are cheap to
    # compute and sliced off afterwards).
    B_pad = ((B + tb - 1) // tb) * tb
    x = x.astype(jnp.float32)
    if B_pad != B:
        x = jnp.zeros((B_pad, d_in), jnp.float32).at[:B].set(x)

    # One-time wrapper-side layout glue (outside the grid loop):
    centers_t = centers.astype(jnp.float32).T                # [d_in, N_c]
    neg_ls2 = (-(log_shapes.astype(jnp.float32) ** 2)).reshape(1, n_c)
    wt = weights.astype(jnp.bfloat16).T                      # [N_c, d_out]
    kan = kan_weights.astype(jnp.float32)                    # [d_in] (SMEM)

    grid = (B_pad // tb,)
    out = pl.pallas_call(
        rbfkan_kernel,
        out_shape=jax.ShapeDtypeStruct((B_pad, d_out), jnp.float32),
        grid_spec=pltpu.PrefetchScalarGridSpec(
            num_scalar_prefetch=0,
            grid=grid,
            in_specs=[
                pl.BlockSpec((tb, d_in), lambda b: (b, 0)),
                # constants: same block every step -> stay resident in VMEM
                pl.BlockSpec((d_in, n_c), lambda b: (0, 0)),
                pl.BlockSpec((1, n_c), lambda b: (0, 0)),
                pl.BlockSpec(memory_space=pltpu.MemorySpace.SMEM),
                pl.BlockSpec((n_c, d_out), lambda b: (0, 0)),
            ],
            # d_out equals the full array dim, so this block is legal and the
            # output is written unpadded (no 8x HBM writeback, no slice pass).
            out_specs=pl.BlockSpec((tb, d_out), lambda b: (b, 0)),
        ),
        compiler_params=pltpu.CompilerParams(
            dimension_semantics=("parallel",)),
    )(x, centers_t, neg_ls2, kan, wt)

    return out[:B] if B_pad != B else out


def rbfkan_reference(x, centers, log_shapes, kan_weights, weights):
    # pure-JAX reference of the PyTorch forward
    r = jnp.abs(x[:, None, :] - centers[None, :, :])         # [B, N_c, d_in]
    r = jnp.moveaxis(r, -2, -1)                              # [B, d_in, N_c]
    k = log_shapes[None, None, :] * r
    phi = jnp.exp(-(k ** 2))
    phi = phi / (1e-9 + phi.sum(axis=-1, keepdims=True))
    out = phi @ weights.T                                    # [B, d_in, d_out]
    out = jnp.moveaxis(out, -2, -1)                          # [B, d_out, d_in]
    out = out @ kan_weights                                  # [B, d_out]
    return out


if __name__ == "__main__":
    # Module hyperparameters (deterministic, modest sizes)
    B, d_in, d_out, n_c = 256, 4, 16, 128
    centers_scale = 1.0

    key = jax.random.PRNGKey(0)
    kx, kc, ks, kw, kk = jax.random.split(key, 5)

    # Input
    x = jax.random.normal(kx, (B, d_in), dtype=jnp.float32)

    # Parameters (mirroring RBFKANLayer._make_parameters / reset)
    kernels_centers = jax.random.uniform(
        kc, (n_c, d_in), minval=-centers_scale, maxval=centers_scale,
        dtype=jnp.float32)
    log_shapes = 0.1 * jax.random.normal(ks, (n_c,), dtype=jnp.float32)
    # xavier_uniform on weights of shape (d_out, n_c): fan_in=n_c, fan_out=d_out
    bound = math.sqrt(6.0 / (n_c + d_out))
    weights = jax.random.uniform(
        kw, (d_out, n_c), minval=-bound, maxval=bound, dtype=jnp.float32)
    kan_weights = jax.random.uniform(kk, (d_in,), dtype=jnp.float32)

    out = rbfkan_forward(x, kernels_centers, log_shapes, kan_weights, weights)
    out = jax.block_until_ready(out)

    ref = rbfkan_reference(x, kernels_centers, log_shapes, kan_weights, weights)
    ref = jax.block_until_ready(ref)

    assert out.shape == (B, d_out)
    # Tolerance accounts for bf16 MXU operands (f32 accumulation) and the EUP
    # approximate reciprocal on the normalization denominator.
    np.testing.assert_allclose(np.asarray(out), np.asarray(ref),
                               rtol=3e-3, atol=3e-3)
    print("KERNEL_OK")
</pallas_src>

<mosaic_0001>
module attributes {stable_mosaic.version = 11 : i64} {
  func.func @rbfkan_kernel(%arg0: i32, %arg1: memref<256x4xf32, #tpu.memory_space<vmem>>, %arg2: memref<4x128xf32, #tpu.memory_space<vmem>>, %arg3: memref<1x128xf32, #tpu.memory_space<vmem>>, %arg4: memref<4xf32, #tpu.memory_space<smem>>, %arg5: memref<128x16xbf16, #tpu.memory_space<vmem>>, %arg6: memref<256x16xf32, #tpu.memory_space<vmem>>) attributes {dimension_semantics = [#tpu.dimension_semantics<parallel>], iteration_bounds = array<i64: 1>, scalar_prefetch = 0 : i64, scratch_operands = 0 : i64, tpu.core_type = #tpu.core_type<tc>, window_params = [{transform_indices = @transform_0, window_bounds = array<i64: 256, 4>}, {pipeline_mode = #tpu.pipeline_mode<synchronous>, transform_indices = @transform_1, window_bounds = array<i64: 4, 128>}, {pipeline_mode = #tpu.pipeline_mode<synchronous>, transform_indices = @transform_2, window_bounds = array<i64: 1, 128>}, {transform_indices = @transform_3, window_bounds = array<i64: 4>}, {pipeline_mode = #tpu.pipeline_mode<synchronous>, transform_indices = @transform_4, window_bounds = array<i64: 128, 16>}, {transform_indices = @transform_5, window_bounds = array<i64: 256, 16>}]} {
    %c0 = arith.constant 0 : index
    %c0_0 = arith.constant 0 : index
    %0 = vector.load %arg3[%c0, %c0_0] : memref<1x128xf32, #tpu.memory_space<vmem>>, vector<1x128xf32>
    %1 = vector.shape_cast %0 : vector<1x128xf32> to vector<1x128xf32>
    %2 = vector.broadcast %1 : vector<1x128xf32> to vector<256x128xf32>
    %c0_1 = arith.constant 0 : index
    %c0_2 = arith.constant 0 : index
    %3 = vector.load %arg1[%c0_1, %c0_2] : memref<256x4xf32, #tpu.memory_space<vmem>>, vector<256x1xf32>
    %c0_3 = arith.constant 0 : index
    %c0_4 = arith.constant 0 : index
    %4 = vector.load %arg2[%c0_3, %c0_4] : memref<4x128xf32, #tpu.memory_space<vmem>>, vector<1x128xf32>
    %5 = vector.broadcast %3 : vector<256x1xf32> to vector<256x128xf32>
    %6 = vector.broadcast %4 : vector<1x128xf32> to vector<256x128xf32>
    %7 = arith.subf %5, %6 : vector<256x128xf32>
    %8 = arith.mulf %7, %7 : vector<256x128xf32>
    %9 = arith.mulf %2, %8 : vector<256x128xf32>
    %10 = math.exp %9 : vector<256x128xf32>
    %cst = arith.constant dense<0.000000e+00> : vector<256xf32>
    %11 = vector.multi_reduction <add>, %10, %cst [1] : vector<256x128xf32> to vector<256xf32>
    %12 = vector.shape_cast %11 : vector<256xf32> to vector<256x1xf32>
    %cst_5 = arith.constant 9.99999971E-10 : f32
    %13 = vector.broadcast %cst_5 : f32 to vector<256x1xf32>
    %14 = arith.addf %13, %12 : vector<256x1xf32>
    %c0_6 = arith.constant 0 : index
    %15 = memref.load %arg4[%c0_6] : memref<4xf32, #tpu.memory_space<smem>>
    %16 = tpu.reciprocal %14 {approx = true} : vector<256x1xf32> -> vector<256x1xf32>
    %17 = vector.broadcast %15 : f32 to vector<256x1xf32>
    %18 = arith.mulf %17, %16 : vector<256x1xf32>
    %19 = vector.broadcast %18 : vector<256x1xf32> to vector<256x128xf32>
    %20 = arith.mulf %19, %10 : vector<256x128xf32>
    %c0_7 = arith.constant 0 : index
    %c1 = arith.constant 1 : index
    %21 = vector.load %arg1[%c0_7, %c1] : memref<256x4xf32, #tpu.memory_space<vmem>>, vector<256x1xf32>
    %c1_8 = arith.constant 1 : index
    %c0_9 = arith.constant 0 : index
    %22 = vector.load %arg2[%c1_8, %c0_9] : memref<4x128xf32, #tpu.memory_space<vmem>>, vector<1x128xf32>
    %23 = vector.broadcast %21 : vector<256x1xf32> to vector<256x128xf32>
    %24 = vector.broadcast %22 : vector<1x128xf32> to vector<256x128xf32>
    %25 = arith.subf %23, %24 : vector<256x128xf32>
    %26 = arith.mulf %25, %25 : vector<256x128xf32>
    %27 = arith.mulf %2, %26 : vector<256x128xf32>
    %28 = math.exp %27 : vector<256x128xf32>
    %cst_10 = arith.constant dense<0.000000e+00> : vector<256xf32>
    %29 = vector.multi_reduction <add>, %28, %cst_10 [1] : vector<256x128xf32> to vector<256xf32>
    %30 = vector.shape_cast %29 : vector<256xf32> to vector<256x1xf32>
    %cst_11 = arith.constant 9.99999971E-10 : f32
    %31 = vector.broadcast %cst_11 : f32 to vector<256x1xf32>
    %32 = arith.addf %31, %30 : vector<256x1xf32>
    %c1_12 = arith.constant 1 : index
    %33 = memref.load %arg4[%c1_12] : memref<4xf32, #tpu.memory_space<smem>>
    %34 = tpu.reciprocal %32 {approx = true} : vector<256x1xf32> -> vector<256x1xf32>
    %35 = vector.broadcast %33 : f32 to vector<256x1xf32>
    %36 = arith.mulf %35, %34 : vector<256x1xf32>
    %37 = vector.broadcast %36 : vector<256x1xf32> to vector<256x128xf32>
    %38 = arith.mulf %37, %28 : vector<256x128xf32>
    %39 = arith.addf %20, %38 : vector<256x128xf32>
    %c0_13 = arith.constant 0 : index
    %c2 = arith.constant 2 : index
    %40 = vector.load %arg1[%c0_13, %c2] : memref<256x4xf32, #tpu.memory_space<vmem>>, vector<256x1xf32>
    %c2_14 = arith.constant 2 : index
    %c0_15 = arith.constant 0 : index
    %41 = vector.load %arg2[%c2_14, %c0_15] : memref<4x128xf32, #tpu.memory_space<vmem>>, vector<1x128xf32>
    %42 = vector.broadcast %40 : vector<256x1xf32> to vector<256x128xf32>
    %43 = vector.broadcast %41 : vector<1x128xf32> to vector<256x128xf32>
    %44 = arith.subf %42, %43 : vector<256x128xf32>
    %45 = arith.mulf %44, %44 : vector<256x128xf32>
    %46 = arith.mulf %2, %45 : vector<256x128xf32>
    %47 = math.exp %46 : vector<256x128xf32>
    %cst_16 = arith.constant dense<0.000000e+00> : vector<256xf32>
    %48 = vector.multi_reduction <add>, %47, %cst_16 [1] : vector<256x128xf32> to vector<256xf32>
    %49 = vector.shape_cast %48 : vector<256xf32> to vector<256x1xf32>
    %cst_17 = arith.constant 9.99999971E-10 : f32
    %50 = vector.broadcast %cst_17 : f32 to vector<256x1xf32>
    %51 = arith.addf %50, %49 : vector<256x1xf32>
    %c2_18 = arith.constant 2 : index
    %52 = memref.load %arg4[%c2_18] : memref<4xf32, #tpu.memory_space<smem>>
    %53 = tpu.reciprocal %51 {approx = true} : vector<256x1xf32> -> vector<256x1xf32>
    %54 = vector.broadcast %52 : f32 to vector<256x1xf32>
    %55 = arith.mulf %54, %53 : vector<256x1xf32>
    %56 = vector.broadcast %55 : vector<256x1xf32> to vector<256x128xf32>
    %57 = arith.mulf %56, %47 : vector<256x128xf32>
    %58 = arith.addf %39, %57 : vector<256x128xf32>
    %c0_19 = arith.constant 0 : index
    %c3 = arith.constant 3 : index
    %59 = vector.load %arg1[%c0_19, %c3] : memref<256x4xf32, #tpu.memory_space<vmem>>, vector<256x1xf32>
    %c3_20 = arith.constant 3 : index
    %c0_21 = arith.constant 0 : index
    %60 = vector.load %arg2[%c3_20, %c0_21] : memref<4x128xf32, #tpu.memory_space<vmem>>, vector<1x128xf32>
    %61 = vector.broadcast %59 : vector<256x1xf32> to vector<256x128xf32>
    %62 = vector.broadcast %60 : vector<1x128xf32> to vector<256x128xf32>
    %63 = arith.subf %61, %62 : vector<256x128xf32>
    %64 = arith.mulf %63, %63 : vector<256x128xf32>
    %65 = arith.mulf %2, %64 : vector<256x128xf32>
    %66 = math.exp %65 : vector<256x128xf32>
    %cst_22 = arith.constant dense<0.000000e+00> : vector<256xf32>
    %67 = vector.multi_reduction <add>, %66, %cst_22 [1] : vector<256x128xf32> to vector<256xf32>
    %68 = vector.shape_cast %67 : vector<256xf32> to vector<256x1xf32>
    %cst_23 = arith.constant 9.99999971E-10 : f32
    %69 = vector.broadcast %cst_23 : f32 to vector<256x1xf32>
    %70 = arith.addf %69, %68 : vector<256x1xf32>
    %c3_24 = arith.constant 3 : index
    %71 = memref.load %arg4[%c3_24] : memref<4xf32, #tpu.memory_space<smem>>
    %72 = tpu.reciprocal %70 {approx = true} : vector<256x1xf32> -> vector<256x1xf32>
    %73 = vector.broadcast %71 : f32 to vector<256x1xf32>
    %74 = arith.mulf %73, %72 : vector<256x1xf32>
    %75 = vector.broadcast %74 : vector<256x1xf32> to vector<256x128xf32>
    %76 = arith.mulf %75, %66 : vector<256x128xf32>
    %77 = arith.addf %58, %76 : vector<256x128xf32>
    %78 = arith.truncf %77 : vector<256x128xf32> to vector<256x128xbf16>
    %c0_25 = arith.constant 0 : index
    %c0_26 = arith.constant 0 : index
    %79 = vector.load %arg5[%c0_25, %c0_26] : memref<128x16xbf16, #tpu.memory_space<vmem>>, vector<128x16xbf16>
    %cst_27 = arith.constant dense<0.000000e+00> : vector<256x16xf32>
    %80 = tpu.matmul %78, %79, %cst_27 {dimension_numbers = #tpu.dot_dimension_numbers<[1], [0], [0], [1], [0, 0, 1, 1], [], []>} : vector<256x128xbf16>, vector<128x16xbf16>, vector<256x16xf32> -> vector<256x16xf32>
    %c0_28 = arith.constant 0 : index
    %c0_29 = arith.constant 0 : index
    %81 = vector.load %arg6[%c0_28, %c0_29] : memref<256x16xf32, #tpu.memory_space<vmem>>, vector<256x16xf32>
    tpu.vector_store %arg6[%c0_28, %c0_29], %80 {strides = array<i32>} : memref<256x16xf32, #tpu.memory_space<vmem>>, vector<256x16xf32>,
    return
  }
  func.func @transform_0(%arg0: i32) -> (i32, i32) {
    %c0_i32 = arith.constant 0 : i32
    %c0_i32_0 = arith.constant 0 : i32
    return %arg0, %c0_i32 : i32, i32
  }
  func.func @transform_1(%arg0: i32) -> (i32, i32) {
    %c0_i32 = arith.constant 0 : i32
    %c0_i32_0 = arith.constant 0 : i32
    %c0_i32_1 = arith.constant 0 : i32
    return %c0_i32, %c0_i32_0 : i32, i32
  }
  func.func @transform_2(%arg0: i32) -> (i32, i32) {
    %c0_i32 = arith.constant 0 : i32
    %c0_i32_0 = arith.constant 0 : i32
    %c0_i32_1 = arith.constant 0 : i32
    return %c0_i32, %c0_i32_0 : i32, i32
  }
  func.func @transform_3(%arg0: i32) -> i32 {
    %c0_i32 = arith.constant 0 : i32
    %c0_i32_0 = arith.constant 0 : i32
    return %c0_i32 : i32
  }
  func.func @transform_4(%arg0: i32) -> (i32, i32) {
    %c0_i32 = arith.constant 0 : i32
    %c0_i32_0 = arith.constant 0 : i32
    %c0_i32_1 = arith.constant 0 : i32
    return %c0_i32, %c0_i32_0 : i32, i32
  }
  func.func @transform_5(%arg0: i32) -> (i32, i32) {
    %c0_i32 = arith.constant 0 : i32
    %c0_i32_0 = arith.constant 0 : i32
    return %arg0, %c0_i32 : i32, i32
  }
}

</mosaic_0001>

<bundles_post_ra>
// kernel: tpu_custom_call.1
= control target key start
LH: loop header
LB: loop body
LE: loop exit
PB: predicated region body
PF: predicated region fallthrough
CT: control target
= control target key end

     0   :  { %10 = vsyncpa [#allocation3], 0  ;;  %s5141_s0 = inlined_call_operand.vmem [shape: f32[256,4], index: 0, kind: input, shape index: {}]   ;;  %s5142_s1 = inlined_call_operand.vmem [shape: f32[4,128], index: 1, kind: input, shape index: {}]   ;;  %s5143_s2 = inlined_call_operand.vmem [shape: f32[1,128], index: 2, kind: input, shape index: {}]   ;;  %s5144_s3 = inlined_call_operand.vmem [shape: f32[4], index: 3, kind: input, shape index: {}]   ;;  %s5145_s4 = inlined_call_operand.vmem [shape: bf16[128,16], index: 4, kind: input, shape index: {}]   ;;  %s5146_s5 = inlined_call_operand.vmem [shape: f32[256,16], index: 5, kind: output, shape index: {}]  }
   0x1   :  { %s23_s20 = sshll.u32 %s5144_s3, 4  ;;  %s24_s20 = int_to_ptr.vmem [resolvable:$true] %s23_s20 }
   0x2   :  { %s3105_s21 = scalar_lea.vmem %s24_s20, 16  ;;  %p3110_p1 = scmp.lt.s32.totalorder %s24_s20, %s24_s20 }
   0x3   :  { %p3106_p0 = scmp.ne.s32.totalorder %s24_s20, %s3105_s21  ;;  %p3111_p2 = scmp.lt.s32.totalorder %s3105_s21, %s3105_s21 }
   0x5   :  { %p3112_p3 = por %p3111_p2, %p3110_p1 }
   0x7   :  { %p3113_p4 = pnand %p3112_p3, %p3106_p0 }
   0x9   :  { %3116 = shalt.err (!%p3113_p4)
}
   0xa   :  { %s3119_s22 = smov [#allocation2]  }
   0xb   :  { %26 = dma.vmem_to_smem %s24_s20, 16, %s3119_s22, [#allocation3]  }
   0xc   :  { %3117 = dma.done.wait [#allocation3], 16  }
   0xd   :  { %3118 = vsyncadd [#allocation3], 4294967280 }
   0xe   :  { %32 = sfence }
   0xf   :  { %v3160_v0 = vld [vmem:[%s5141_s0 + $0x10] sm:$0xff]  ;;  %v3165_v1 = vld [vmem:[%s5141_s0] sm:$0xff]  ;;  %v3120_v2 = vmov 0   ;;  %v3172_v3 = vld [vmem:[%s5141_s0 + $0x18] sm:$0xff]  ;;  %v3121_v33 = vmov 1   ;;  %s4583_s23 = sld [smem:[#allocation2 + $0x2]] }
  0x10   :  { %2538 = vset.pattern.permute.xlu1 %v3120_v2  ;;  %2537 = vset.pattern.permute.xlu0 %v3120_v2  ;;  %v3177_v4 = vld [vmem:[%s5141_s0 + $0x8] sm:$0xff]  ;;  %v3189_v6 = vld [vmem:[%s5141_s0 + $0x20] sm:$0xff]  ;;  %v3196_v7 = vld [vmem:[%s5141_s0 + $0x38] sm:$0xff]  ;;  %s4618_s24 = sld [smem:[#allocation2 + $0x3]]  ;;  %vm2390_vm0 = vcmask 130048  }
  0x11   :  { %86 = vperm.xlu1 %2538, %v3160_v0   ;;  %76 = vperm.xlu0 %2537, %v3165_v1   ;;  %v3184_v5 = vld [vmem:[%s5141_s0 + $0x28] sm:$0xff]  ;;  %v3201_v8 = vld [vmem:[%s5141_s0 + $0x30] sm:$0xff]  ;;  %v3211_v10 = vld [vmem:[%s5141_s0 + $0x40] sm:$0xff] }
  0x12   :  { %v3206_v9 = vld [vmem:[%s5141_s0 + $0x48] sm:$0xff]  ;;  %v3220_v11 = vld [vmem:[%s5141_s0 + $0x58] sm:$0xff]  ;;  %v3225_v12 = vld [vmem:[%s5141_s0 + $0x50] sm:$0xff] }
  0x13   :  { %v3232_v13 = vld [vmem:[%s5141_s0 + $0x68] sm:$0xff]  ;;  %v3237_v14 = vld [vmem:[%s5141_s0 + $0x60] sm:$0xff]  ;;  %v3244_v15 = vld [vmem:[%s5141_s0 + $0x78] sm:$0xff] }
  0x14   :  { %v3249_v16 = vld [vmem:[%s5141_s0 + $0x70] sm:$0xff]  ;;  %v3256_v17 = vld [vmem:[%s5141_s0 + $0x88] sm:$0xff]  ;;  %v3261_v18 = vld [vmem:[%s5141_s0 + $0x80] sm:$0xff] }
  0x15   :  { %91 = vperm.xlu1 %2538, %v3172_v3   ;;  %81 = vperm.xlu0 %2537, %v3177_v4   ;;  %v3268_v19 = vld [vmem:[%s5141_s0 + $0x98] sm:$0xff]  ;;  %v3273_v20 = vld [vmem:[%s5141_s0 + $0x90] sm:$0xff]  ;;  %v3280_v21 = vld [vmem:[%s5141_s0 + $0xa8] sm:$0xff] }
  0x16   :  { %v3285_v22 = vld [vmem:[%s5141_s0 + $0xa0] sm:$0xff]  ;;  %v3292_v23 = vld [vmem:[%s5141_s0 + $0xb8] sm:$0xff]  ;;  %v3297_v24 = vld [vmem:[%s5141_s0 + $0xb0] sm:$0xff] }
  0x17   :  { %v3304_v25 = vld [vmem:[%s5141_s0 + $0xc8] sm:$0xff]  ;;  %v3309_v26 = vld [vmem:[%s5141_s0 + $0xc0] sm:$0xff]  ;;  %v3316_v27 = vld [vmem:[%s5141_s0 + $0xd8] sm:$0xff] }
  0x18   :  { %v3321_v28 = vld [vmem:[%s5141_s0 + $0xd0] sm:$0xff]  ;;  %v3328_v29 = vld [vmem:[%s5141_s0 + $0xe8] sm:$0xff]  ;;  %v3333_v30 = vld [vmem:[%s5141_s0 + $0xe0] sm:$0xff] }
  0x19   :  { %101 = vperm.xlu1 %2538, %v3184_v5   ;;  %96 = vperm.xlu0 %2537, %v3189_v6   ;;  %v3340_v31 = vld [vmem:[%s5141_s0 + $0xf8] sm:$0xff]  ;;  %v3345_v32 = vld [vmem:[%s5141_s0 + $0xf0] sm:$0xff]  ;;  %v3352_v34 = vld [vmem:[%s5142_s1] ss:$0 sm:$0xff] }
  0x1a   :  { %v3359_v39 = vld [vmem:[%s5143_s2] ss:$0 sm:$0xff] }
  0x1d   :  { %111 = vperm.xlu1 %2538, %v3196_v7   ;;  %106 = vperm.xlu0 %2537, %v3201_v8  }
  0x21   :  { %121 = vperm.xlu1 %2538, %v3206_v9   ;;  %116 = vperm.xlu0 %2537, %v3211_v10  }
  0x25   :  { %131 = vperm.xlu1 %2538, %v3220_v11   ;;  %126 = vperm.xlu0 %2537, %v3225_v12  }
  0x29   :  { %141 = vperm.xlu1 %2538, %v3232_v13   ;;  %136 = vperm.xlu0 %2537, %v3237_v14  }
  0x2d   :  { %151 = vperm.xlu1 %2538, %v3244_v15   ;;  %146 = vperm.xlu0 %2537, %v3249_v16  }
  0x31   :  { %161 = vperm.xlu1 %2538, %v3256_v17   ;;  %156 = vperm.xlu0 %2537, %v3261_v18  }
  0x35   :  { %171 = vperm.xlu1 %2538, %v3268_v19   ;;  %166 = vperm.xlu0 %2537, %v3273_v20  }
  0x39   :  { %181 = vperm.xlu1 %2538, %v3280_v21   ;;  %176 = vperm.xlu0 %2537, %v3285_v22  }
  0x3d   :  { %191 = vperm.xlu1 %2538, %v3292_v23   ;;  %186 = vperm.xlu0 %2537, %v3297_v24  }
  0x41   :  { %201 = vperm.xlu1 %2538, %v3304_v25   ;;  %196 = vperm.xlu0 %2537, %v3309_v26  }
  0x45   :  { %211 = vperm.xlu1 %2538, %v3316_v27   ;;  %206 = vperm.xlu0 %2537, %v3321_v28  }
  0x49   :  { %221 = vperm.xlu1 %2538, %v3328_v29   ;;  %216 = vperm.xlu0 %2537, %v3333_v30  }
  0x4d   :  { %231 = vperm.xlu1 %2538, %v3340_v31   ;;  %226 = vperm.xlu0 %2537, %v3345_v32  }
  0x51   :  { %2539 = vset.pattern.permute.xlu1 %v3121_v33  ;;  %2540 = vset.pattern.permute.xlu0 %v3121_v33 }
  0x8c   :  { %v87_v35 = vpop.permute.xlu1 %86  ;;  %v77_v36 = vpop.permute.xlu0 %76 }
  0x8d   :  { %v240_v37 = vsub.f32 %v87_v35, %v3352_v34  ;;  %v238_v38 = vsub.f32 %v77_v36, %v3352_v34 }
  0x8f   :  { %v272_v40 = vmul.f32 %v240_v37, %v240_v37  ;;  %v270_v41 = vmul.f32 %v238_v38, %v238_v38 }
  0x90   :  { %v92_v42 = vpop.permute.xlu1 %91  ;;  %v82_v43 = vpop.permute.xlu0 %81 }
  0x91   :  { %v304_v44 = vmul.f32 %v3359_v39, %v272_v40  ;;  %v302_v45 = vmul.f32 %v3359_v39, %v270_v41  ;;  %v241_v46 = vsub.f32 %v92_v42, %v3352_v34  ;;  %v239_v47 = vsub.f32 %v82_v43, %v3352_v34 }
  0x93   :  { %v334_v48 = vmul.f32 1.442695, %v302_v45  ;;  %v273_v49 = vmul.f32 %v241_v46, %v241_v46  ;;  %v271_v50 = vmul.f32 %v239_v47, %v239_v47  ;;  %v338_v51 = vmul.f32 1.442695, %v304_v44 }
  0x94   :  { %v102_v52 = vpop.permute.xlu1 %101  ;;  %v97_v53 = vpop.permute.xlu0 %96 }
  0x95   :  { %v305_v54 = vmul.f32 %v3359_v39, %v273_v49  ;;  %v303_v55 = vmul.f32 %v3359_v39, %v271_v50  ;;  %v243_v56 = vsub.f32 %v102_v52, %v3352_v34  ;;  %2559 = vpow2.f32 %v334_v48 }
  0x96   :  { %v242_v57 = vsub.f32 %v97_v53, %v3352_v34  ;;  %2561 = vpow2.f32 %v338_v51 }
  0x97   :  { %v336_v58 = vmul.f32 1.442695, %v303_v55  ;;  %v275_v59 = vmul.f32 %v243_v56, %v243_v56  ;;  %v340_v60 = vmul.f32 1.442695, %v305_v54 }
  0x98   :  { %v274_v61 = vmul.f32 %v242_v57, %v242_v57  ;;  %v112_v62 = vpop.permute.xlu1 %111  ;;  %v107_v63 = vpop.permute.xlu0 %106 }
  0x99   :  { %v307_v2 = vmul.f32 %v3359_v39, %v275_v59  ;;  %v245_v33 = vsub.f32 %v112_v62, %v3352_v34  ;;  %v244_v35 = vsub.f32 %v107_v63, %v3352_v34  ;;  %2563 = vpow2.f32 %v336_v58 }
  0x9a   :  { %v306_v36 = vmul.f32 %v3359_v39, %v274_v61  ;;  %2565 = vpow2.f32 %v340_v60 }
  0x9b   :  { %v277_v37 = vmul.f32 %v245_v33, %v245_v33  ;;  %v276_v38 = vmul.f32 %v244_v35, %v244_v35  ;;  %v344_v40 = vmul.f32 1.442695, %v307_v2 }
  0x9c   :  { %v342_v41 = vmul.f32 1.442695, %v306_v36  ;;  %v122_v42 = vpop.permute.xlu1 %121  ;;  %v117_v43 = vpop.permute.xlu0 %116 }
  0x9d   :  { %v309_v44 = vmul.f32 %v3359_v39, %v277_v37  ;;  %v308_v45 = vmul.f32 %v3359_v39, %v276_v38  ;;  %v247_v46 = vsub.f32 %v122_v42, %v3352_v34  ;;  %v246_v47 = vsub.f32 %v117_v43, %v3352_v34 }
  0x9e   :  { %2567 = vpow2.f32 %v342_v41 }
  0x9f   :  { %v346_v48 = vmul.f32 1.442695, %v308_v45  ;;  %v279_v49 = vmul.f32 %v247_v46, %v247_v46  ;;  %2569 = vpow2.f32 %v344_v40  ;;  %v278_v50 = vmul.f32 %v246_v47, %v246_v47 }
  0xa0   :  { %v132_v51 = vpop.permute.xlu1 %131  ;;  %v127_v52 = vpop.permute.xlu0 %126  ;;  %v348_v53 = vmul.f32 1.442695, %v309_v44 }
  0xa1   :  { %v311_v54 = vmul.f32 %v3359_v39, %v279_v49  ;;  %v249_v55 = vsub.f32 %v132_v51, %v3352_v34  ;;  %v248_v56 = vsub.f32 %v127_v52, %v3352_v34  ;;  %2571 = vpow2.f32 %v346_v48 }
  0xa2   :  { %v310_v57 = vmul.f32 %v3359_v39, %v278_v50  ;;  %v3381_v58 = vpop.eup %2559  ;;  %2573 = vpow2.f32 %v348_v53 }
  0xa3   :  { %5272 = vst [vmem:[#allocation5_spill] sm:$0xff] %v3381_v58  ;;  %v281_v59 = vmul.f32 %v249_v55, %v249_v55  ;;  %v280_v60 = vmul.f32 %v248_v56, %v248_v56  ;;  %v352_v61 = vmul.f32 1.442695, %v311_v54  ;;  %398 = vadd.xlane.f32.xlu0 %v3381_v58  ;;  %v3384_v33 = vpop.eup %2561 }
  0xa4   :  { %v350_v62 = vmul.f32 1.442695, %v310_v57  ;;  %v142_v63 = vpop.permute.xlu1 %141  ;;  %v137_v2 = vpop.permute.xlu0 %136  ;;  %5273 = vst [vmem:[#allocation6_spill] sm:$0xff] %v3384_v33 }
  0xa5   :  { %v313_v35 = vmul.f32 %v3359_v39, %v281_v59  ;;  %v312_v36 = vmul.f32 %v3359_v39, %v280_v60  ;;  %v251_v37 = vsub.f32 %v142_v63, %v3352_v34  ;;  %v250_v38 = vsub.f32 %v137_v2, %v3352_v34 }
  0xa6   :  { %2575 = vpow2.f32 %v350_v62  ;;  %v3390_v40 = vpop.eup %2563 }
  0xa7   :  { %5274 = vst [vmem:[#allocation7_spill] sm:$0xff] %v3390_v40  ;;  %v354_v41 = vmul.f32 1.442695, %v312_v36  ;;  %v283_v42 = vmul.f32 %v251_v37, %v251_v37  ;;  %2577 = vpow2.f32 %v352_v61  ;;  %v282_v43 = vmul.f32 %v250_v38, %v250_v38  ;;  %400 = vadd.xlane.f32.xlu1 %v3390_v40  ;;  %402 = vadd.xlane.f32.xlu0 %v3384_v33  ;;  %v3394_v46 = vpop.eup %2565 }
  0xa8   :  { %v152_v44 = vpop.permute.xlu1 %151  ;;  %v147_v45 = vpop.permute.xlu0 %146  ;;  %5275 = vst [vmem:[#allocation8_spill] sm:$0xff] %v3394_v46  ;;  %v356_v47 = vmul.f32 1.442695, %v313_v35 }
  0xa9   :  { %v315_v48 = vmul.f32 %v3359_v39, %v283_v42  ;;  %v253_v49 = vsub.f32 %v152_v44, %v3352_v34  ;;  %v252_v50 = vsub.f32 %v147_v45, %v3352_v34  ;;  %2579 = vpow2.f32 %v354_v41 }
  0xaa   :  { %v314_v51 = vmul.f32 %v3359_v39, %v282_v43  ;;  %2581 = vpow2.f32 %v356_v47 }
  0xab   :  { %v3400_v52 = vpop.eup %2567  ;;  %v285_v53 = vmul.f32 %v253_v49, %v253_v49  ;;  %v284_v54 = vmul.f32 %v252_v50, %v252_v50  ;;  %v360_v55 = vmul.f32 1.442695, %v315_v48  ;;  %404 = vadd.xlane.f32.xlu0 %v3394_v46 }
  0xac   :  { %5276 = vst [vmem:[#allocation9_spill] sm:$0xff] %v3400_v52  ;;  %v358_v56 = vmul.f32 1.442695, %v314_v51  ;;  %406 = vadd.xlane.f32.xlu1 %v3400_v52  ;;  %v162_v57 = vpop.permute.xlu1 %161  ;;  %v157_v59 = vpop.permute.xlu0 %156 }
  0xad   :  { %v3404_v60 = vpop.eup %2569  ;;  %v317_v61 = vmul.f32 %v3359_v39, %v285_v53  ;;  %v316_v62 = vmul.f32 %v3359_v39, %v284_v54  ;;  %v255_v63 = vsub.f32 %v162_v57, %v3352_v34  ;;  %v254_v2 = vsub.f32 %v157_v59, %v3352_v34 }
  0xae   :  { %5277 = vst [vmem:[#allocation10_spill] sm:$0xff] %v3404_v60  ;;  %2583 = vpow2.f32 %v358_v56  ;;  %v3410_v35 = vpop.eup %2571 }
  0xaf   :  { %5278 = vst [vmem:[#allocation11_spill] sm:$0xff] %v3410_v35  ;;  %v362_v36 = vmul.f32 1.442695, %v316_v62  ;;  %v287_v37 = vmul.f32 %v255_v63, %v255_v63  ;;  %2585 = vpow2.f32 %v360_v55  ;;  %v286_v38 = vmul.f32 %v254_v2, %v254_v2  ;;  %408 = vadd.xlane.f32.xlu0 %v3404_v60  ;;  %v3417_v48 = vpop.eup %2573 }
  0xb0   :  { %410 = vadd.xlane.f32.xlu1 %v3410_v35  ;;  %v172_v41 = vpop.permute.xlu1 %171  ;;  %v167_v42 = vpop.permute.xlu0 %166  ;;  %v364_v43 = vmul.f32 1.442695, %v317_v61  ;;  %5279 = vst [vmem:[#allocation12_spill] sm:$0xff] %v3417_v48  ;;  %v3095_v35 = vld [vmem:[%s5141_s0 + $0xb0] sm:$0xff] }
  0xb1   :  { %v319_v44 = vmul.f32 %v3359_v39, %v287_v37  ;;  %v257_v45 = vsub.f32 %v172_v41, %v3352_v34  ;;  %v256_v47 = vsub.f32 %v167_v42, %v3352_v34  ;;  %2587 = vpow2.f32 %v362_v36 }
  0xb2   :  { %v318_v49 = vmul.f32 %v3359_v39, %v286_v38  ;;  %2589 = vpow2.f32 %v364_v43 }
  0xb3   :  { %v3420_v50 = vpop.eup %2575  ;;  %v289_v51 = vmul.f32 %v257_v45, %v257_v45  ;;  %v288_v53 = vmul.f32 %v256_v47, %v256_v47  ;;  %v368_v54 = vmul.f32 1.442695, %v319_v44  ;;  %412 = vadd.xlane.f32.xlu0 %v3417_v48 }
  0xb4   :  { %5280 = vst [vmem:[#allocation13_spill] sm:$0xff] %v3420_v50  ;;  %v366_v55 = vmul.f32 1.442695, %v318_v49  ;;  %414 = vadd.xlane.f32.xlu1 %v3420_v50  ;;  %v182_v56 = vpop.permute.xlu1 %181  ;;  %v177_v57 = vpop.permute.xlu0 %176 }
  0xb5   :  { %v3424_v59 = vpop.eup %2577  ;;  %v321_v61 = vmul.f32 %v3359_v39, %v289_v51  ;;  %v320_v62 = vmul.f32 %v3359_v39, %v288_v53  ;;  %v259_v63 = vsub.f32 %v182_v56, %v3352_v34  ;;  %v258_v2 = vsub.f32 %v177_v57, %v3352_v34 }
  0xb6   :  { %5281 = vst [vmem:[#allocation14_spill] sm:$0xff] %v3424_v59  ;;  %2591 = vpow2.f32 %v366_v55  ;;  %v3430_v36 = vpop.eup %2579 }
  0xb7   :  { %5282 = vst [vmem:[#allocation15_spill] sm:$0xff] %v3430_v36  ;;  %v370_v37 = vmul.f32 1.442695, %v320_v62  ;;  %v291_v38 = vmul.f32 %v259_v63, %v259_v63  ;;  %2593 = vpow2.f32 %v368_v54  ;;  %v290_v41 = vmul.f32 %v258_v2, %v258_v2  ;;  %416 = vadd.xlane.f32.xlu0 %v3424_v59  ;;  %v3437_v51 = vpop.eup %2581 }
  0xb8   :  { %418 = vadd.xlane.f32.xlu1 %v3430_v36  ;;  %v192_v42 = vpop.permute.xlu1 %191  ;;  %v187_v43 = vpop.permute.xlu0 %186  ;;  %v372_v44 = vmul.f32 1.442695, %v321_v61  ;;  %5283 = vst [vmem:[#allocation16_spill] sm:$0xff] %v3437_v51 }
  0xb9   :  { %v323_v45 = vmul.f32 %v3359_v39, %v291_v38  ;;  %v261_v47 = vsub.f32 %v192_v42, %v3352_v34  ;;  %v260_v49 = vsub.f32 %v187_v43, %v3352_v34  ;;  %2595 = vpow2.f32 %v370_v37 }
  0xba   :  { %v322_v53 = vmul.f32 %v3359_v39, %v290_v41  ;;  %2597 = vpow2.f32 %v372_v44 }
  0xbb   :  { %v3440_v54 = vpop.eup %2583  ;;  %v293_v55 = vmul.f32 %v261_v47, %v261_v47  ;;  %v292_v56 = vmul.f32 %v260_v49, %v260_v49  ;;  %v376_v57 = vmul.f32 1.442695, %v323_v45  ;;  %420 = vadd.xlane.f32.xlu0 %v3437_v51 }
  0xbc   :  { %5284 = vst [vmem:[#allocation17_spill] sm:$0xff] %v3440_v54  ;;  %v374_v62 = vmul.f32 1.442695, %v322_v53  ;;  %422 = vadd.xlane.f32.xlu1 %v3440_v54  ;;  %v202_v61 = vpop.permute.xlu1 %201  ;;  %v197_v63 = vpop.permute.xlu0 %196 }
  0xbd   :  { %v3444_v2 = vpop.eup %2585  ;;  %v325_v38 = vmul.f32 %v3359_v39, %v293_v55  ;;  %v324_v37 = vmul.f32 %v3359_v39, %v292_v56  ;;  %v263_v41 = vsub.f32 %v202_v61, %v3352_v34  ;;  %v262_v42 = vsub.f32 %v197_v63, %v3352_v34 }
  0xbe   :  { %5285 = vst [vmem:[#allocation18_spill] sm:$0xff] %v3444_v2  ;;  %2599 = vpow2.f32 %v374_v62  ;;  %v3450_v43 = vpop.eup %2587 }
  0xbf   :  { %5286 = vst [vmem:[#allocation19_spill] sm:$0xff] %v3450_v43  ;;  %v378_v45 = vmul.f32 1.442695, %v324_v37  ;;  %v295_v47 = vmul.f32 %v263_v41, %v263_v41  ;;  %2601 = vpow2.f32 %v376_v57  ;;  %v294_v49 = vmul.f32 %v262_v42, %v262_v42  ;;  %424 = vadd.xlane.f32.xlu0 %v3444_v2  ;;  %v3457_v63 = vpop.eup %2589 }
  0xc0   :  { %426 = vadd.xlane.f32.xlu1 %v3450_v43  ;;  %v212_v44 = vpop.permute.xlu1 %211  ;;  %v207_v53 = vpop.permute.xlu0 %206  ;;  %v380_v55 = vmul.f32 1.442695, %v325_v38  ;;  %5287 = vst [vmem:[#allocation20_spill] sm:$0xff] %v3457_v63 }
  0xc1   :  { %v327_v56 = vmul.f32 %v3359_v39, %v295_v47  ;;  %v265_v61 = vsub.f32 %v212_v44, %v3352_v34  ;;  %v264_v62 = vsub.f32 %v207_v53, %v3352_v34  ;;  %2603 = vpow2.f32 %v378_v45 }
  0xc2   :  { %v326_v37 = vmul.f32 %v3359_v39, %v294_v49  ;;  %2605 = vpow2.f32 %v380_v55 }
  0xc3   :  { %v3460_v57 = vpop.eup %2591  ;;  %v297_v41 = vmul.f32 %v265_v61, %v265_v61  ;;  %v296_v42 = vmul.f32 %v264_v62, %v264_v62  ;;  %v384_v43 = vmul.f32 1.442695, %v327_v56  ;;  %428 = vadd.xlane.f32.xlu0 %v3457_v63 }
  0xc4   :  { %5288 = vst [vmem:[#allocation21_spill] sm:$0xff] %v3460_v57  ;;  %v382_v2 = vmul.f32 1.442695, %v326_v37  ;;  %430 = vadd.xlane.f32.xlu1 %v3460_v57  ;;  %v222_v38 = vpop.permute.xlu1 %221  ;;  %v217_v47 = vpop.permute.xlu0 %216 }
  0xc5   :  { %v3464_v44 = vpop.eup %2593  ;;  %v329_v53 = vmul.f32 %v3359_v39, %v297_v41  ;;  %v328_v45 = vmul.f32 %v3359_v39, %v296_v42  ;;  %v267_v49 = vsub.f32 %v222_v38, %v3352_v34  ;;  %v266_v61 = vsub.f32 %v217_v47, %v3352_v34 }
  0xc6   :  { %5289 = vst [vmem:[#allocation22_spill] sm:$0xff] %v3464_v44  ;;  %2607 = vpow2.f32 %v382_v2  ;;  %v3470_v56 = vpop.eup %2595 }
  0xc7   :  { %5290 = vst [vmem:[#allocation23_spill] sm:$0xff] %v3470_v56  ;;  %v386_v62 = vmul.f32 1.442695, %v328_v45  ;;  %v299_v37 = vmul.f32 %v267_v49, %v267_v49  ;;  %2609 = vpow2.f32 %v384_v43  ;;  %v298_v63 = vmul.f32 %v266_v61, %v266_v61  ;;  %432 = vadd.xlane.f32.xlu0 %v3464_v44  ;;  %v3477_v47 = vpop.eup %2597 }
  0xc8   :  { %434 = vadd.xlane.f32.xlu1 %v3470_v56  ;;  %v232_v55 = vpop.permute.xlu1 %231  ;;  %v227_v54 = vpop.permute.xlu0 %226  ;;  %v388_v41 = vmul.f32 1.442695, %v329_v53  ;;  %5291 = vst [vmem:[#allocation24_spill] sm:$0xff] %v3477_v47 }
  0xc9   :  { %v331_v42 = vmul.f32 %v3359_v39, %v299_v37  ;;  %v269_v38 = vsub.f32 %v232_v55, %v3352_v34  ;;  %v268_v2 = vsub.f32 %v227_v54, %v3352_v34  ;;  %2611 = vpow2.f32 %v386_v62 }
  0xca   :  { %v330_v45 = vmul.f32 %v3359_v39, %v298_v63  ;;  %2613 = vpow2.f32 %v388_v41 }
  0xcb   :  { %v3480_v43 = vpop.eup %2599  ;;  %v301_v49 = vmul.f32 %v269_v38, %v269_v38  ;;  %v300_v61 = vmul.f32 %v268_v2, %v268_v2  ;;  %436 = vadd.xlane.f32.xlu0 %v3477_v47  ;;  %v392_v37 = vmul.f32 1.442695, %v331_v42 }
  0xcc   :  { %5292 = vst [vmem:[#allocation25_spill] sm:$0xff] %v3480_v43  ;;  %v390_v51 = vmul.f32 1.442695, %v330_v45  ;;  %438 = vadd.xlane.f32.xlu1 %v3480_v43  ;;  %v3484_v53 = vpop.eup %2601 }
  0xcd   :  { %5293 = vst [vmem:[#allocation26_spill] sm:$0xff] %v3484_v53  ;;  %v332_v34 = vmul.f32 %v3359_v39, %v300_v61  ;;  %v333_v54 = vmul.f32 %v3359_v39, %v301_v49 }
  0xce   :  { %2615 = vpow2.f32 %v390_v51  ;;  %v3488_v62 = vpop.eup %2603 }
  0xcf   :  { %5294 = vst [vmem:[#allocation27_spill] sm:$0xff] %v3488_v62  ;;  %v394_v63 = vmul.f32 1.442695, %v332_v34  ;;  %440 = vadd.xlane.f32.xlu0 %v3484_v53  ;;  %2617 = vpow2.f32 %v392_v37  ;;  %v3492_v55 = vpop.eup %2605  ;;  %v396_v38 = vmul.f32 1.442695, %v333_v54 }
  0xd0   :  { %442 = vadd.xlane.f32.xlu1 %v3488_v62  ;;  %5295 = vst [vmem:[#allocation28_spill] sm:$0xff] %v3492_v55  ;;  %v3618_v34 = vld [vmem:[%s5142_s1 + $0x1] ss:$0 sm:$0xff] }
  0xd1   :  { %2619 = vpow2.f32 %v394_v63 }
  0xd2   :  { %2621 = vpow2.f32 %v396_v38 }
  0xd3   :  { %v3494_v2 = vpop.eup %2607  ;;  %444 = vadd.xlane.f32.xlu0 %v3492_v55 }
  0xd4   :  { %5296 = vst [vmem:[#allocation29_spill] sm:$0xff] %v3494_v2  ;;  %446 = vadd.xlane.f32.xlu1 %v3494_v2  ;;  %v3498_v51 = vpop.eup %2609 }
  0xd5   :  { %5297 = vst [vmem:[#allocation30_spill] sm:$0xff] %v3498_v51 }
  0xd6   :  { %v3500_v41 = vpop.eup %2611 }
  0xd7   :  { %5298 = vst [vmem:[#allocation31_spill] sm:$0xff] %v3500_v41  ;;  %448 = vadd.xlane.f32.xlu0 %v3498_v51  ;;  %v3504_v42 = vpop.eup %2613 }
  0xd8   :  { %450 = vadd.xlane.f32.xlu1 %v3500_v41  ;;  %5299 = vst [vmem:[#allocation32_spill] sm:$0xff] %v3504_v42 }
  0xdb   :  { %v3506_v45 = vpop.eup %2615  ;;  %452 = vadd.xlane.f32.xlu0 %v3504_v42 }
  0xdc   :  { %5300 = vst [vmem:[#allocation33_spill] sm:$0xff] %v3506_v45  ;;  %454 = vadd.xlane.f32.xlu1 %v3506_v45  ;;  %v3510_v49 = vpop.eup %2617 }
  0xdd   :  { %5301 = vst [vmem:[#allocation34_spill] sm:$0xff] %v3510_v49 }
  0xde   :  { %v3512_v61 = vpop.eup %2619 }
  0xdf   :  { %5302 = vst [vmem:[#allocation35_spill] sm:$0xff] %v3512_v61  ;;  %456 = vadd.xlane.f32.xlu0 %v3510_v49  ;;  %v3516_v37 = vpop.eup %2621 }
  0xe0   :  { %458 = vadd.xlane.f32.xlu1 %v3512_v61  ;;  %5303 = vst [vmem:[#allocation36_spill] sm:$0xff] %v3516_v37 }
  0xe3   :  { %460 = vadd.xlane.f32.xlu0 %v3516_v37 }
  0xf1   :  { %594 = vperm.xlu1 %2539, %v3165_v1  }
  0xf5   :  { %602 = vperm.xlu1 %2539, %v3160_v0  }
  0xf9   :  { %606 = vperm.xlu1 %2539, %v3172_v3   ;;  %598 = vperm.xlu0 %2540, %v3177_v4  }
  0xfd   :  { %610 = vperm.xlu1 %2539, %v3189_v6   ;;  %634 = vperm.xlu0 %2540, %v3225_v12  }
 0x101   :  { %614 = vperm.xlu1 %2539, %v3184_v5   ;;  %642 = vperm.xlu0 %2540, %v3237_v14  }
 0x105   :  { %618 = vperm.xlu1 %2539, %v3201_v8   ;;  %650 = vperm.xlu0 %2540, %v3249_v16  }
 0x109   :  { %622 = vperm.xlu1 %2539, %v3196_v7   ;;  %658 = vperm.xlu0 %2540, %v3261_v18  }
 0x10d   :  { %626 = vperm.xlu1 %2539, %v3211_v10   ;;  %666 = vperm.xlu0 %2540, %v3273_v20   ;;  %v5152_v20 = vmov 2  }
 0x111   :  { %630 = vperm.xlu1 %2539, %v3206_v9   ;;  %674 = vperm.xlu0 %2540, %v3285_v22  }
 0x115   :  { %638 = vperm.xlu1 %2539, %v3220_v11   ;;  %682 = vperm.xlu0 %2540, %v3297_v24  }
 0x119   :  { %646 = vperm.xlu1 %2539, %v3232_v13   ;;  %690 = vperm.xlu0 %2540, %v3309_v26  }
 0x11d   :  { %654 = vperm.xlu1 %2539, %v3244_v15   ;;  %698 = vperm.xlu0 %2540, %v3321_v28  }
 0x121   :  { %662 = vperm.xlu1 %2539, %v3256_v17   ;;  %706 = vperm.xlu0 %2540, %v3333_v30  }
 0x125   :  { %670 = vperm.xlu1 %2539, %v3268_v19   ;;  %714 = vperm.xlu0 %2540, %v3345_v32  }
 0x129   :  { %678 = vperm.xlu1 %2539, %v3280_v21   ;;  %2542 = vset.pattern.permute.xlu0 %v5152_v20 }
 0x12c   :  { %v3547_v0 = vpop.xlane.xlu0 %398 }
 0x12d   :  { %686 = vperm.xlu1 %2539, %v3292_v23  }
 0x130   :  { %v3550_v1 = vpop.xlane.xlu1 %400  ;;  %v3552_v3 = vpop.xlane.xlu0 %402 }
 0x131   :  { %694 = vperm.xlu1 %2539, %v3304_v25  }
 0x134   :  { %v3557_v5 = vpop.xlane.xlu0 %404 }
 0x135   :  { %702 = vperm.xlu1 %2539, %v3316_v27   ;;  %v3555_v4 = vpop.xlane.xlu1 %406 }
 0x138   :  { %v3562_v7 = vpop.xlane.xlu0 %408 }
 0x139   :  { %710 = vperm.xlu1 %2539, %v3328_v29   ;;  %v3560_v6 = vpop.xlane.xlu1 %410 }
 0x13c   :  { %v3567_v9 = vpop.xlane.xlu0 %412 }
 0x13d   :  { %718 = vperm.xlu1 %2539, %v3340_v31   ;;  %v3565_v8 = vpop.xlane.xlu1 %414 }
 0x140   :  { %v3571_v11 = vpop.xlane.xlu0 %416 }
 0x141   :  { %v3569_v10 = vpop.xlane.xlu1 %418  ;;  %2541 = vset.pattern.permute.xlu1 %v5152_v20 }
 0x144   :  { %v3575_v13 = vpop.xlane.xlu0 %420 }
 0x145   :  { %v3573_v12 = vpop.xlane.xlu1 %422 }
 0x148   :  { %v3579_v15 = vpop.xlane.xlu0 %424 }
 0x149   :  { %v3577_v14 = vpop.xlane.xlu1 %426 }
 0x14c   :  { %v3583_v17 = vpop.xlane.xlu0 %428 }
 0x14d   :  { %v3581_v16 = vpop.xlane.xlu1 %430 }
 0x150   :  { %v3587_v19 = vpop.xlane.xlu0 %432 }
 0x151   :  { %v3585_v18 = vpop.xlane.xlu1 %434 }
 0x154   :  { %v3593_v22 = vpop.xlane.xlu0 %436 }
 0x155   :  { %v3591_v21 = vpop.xlane.xlu1 %438 }
 0x158   :  { %v3597_v24 = vpop.xlane.xlu0 %440 }
 0x159   :  { %v3595_v23 = vpop.xlane.xlu1 %442 }
 0x15c   :  { %v3601_v26 = vpop.xlane.xlu0 %444 }
 0x15d   :  { %v3599_v25 = vpop.xlane.xlu1 %446 }
 0x160   :  { %v3605_v28 = vpop.xlane.xlu0 %448 }
 0x161   :  { %v3603_v27 = vpop.xlane.xlu1 %450  ;;  %5305 = vst [vmem:[#allocation38_spill] sm:$0xff] %v3605_v28 }
 0x162   :  { %5304 = vst [vmem:[#allocation37_spill] sm:$0xff] %v3603_v27 }
 0x164   :  { %v3609_v30 = vpop.xlane.xlu0 %452 }
 0x165   :  { %v3607_v29 = vpop.xlane.xlu1 %454  ;;  %5307 = vst [vmem:[#allocation40_spill] sm:$0xff] %v3609_v30 }
 0x166   :  { %5306 = vst [vmem:[#allocation39_spill] sm:$0xff] %v3607_v29 }
 0x168   :  { %v3613_v32 = vpop.xlane.xlu0 %456 }
 0x169   :  { %v3611_v31 = vpop.xlane.xlu1 %458  ;;  %5309 = vst [vmem:[#allocation42_spill] sm:$0xff] %v3613_v32 }
 0x16a   :  { %5308 = vst [vmem:[#allocation41_spill] sm:$0xff] %v3611_v31 }
 0x16c   :  { %v3621_v20 = vpop.xlane.xlu0 %460 }
 0x16d   :  { %v595_v54 = vpop.permute.xlu1 %594  ;;  %5310 = vst [vmem:[#allocation43_spill] sm:$0xff] %v3621_v20 }
 0x16e   :  { %v725_v63 = vsub.f32 %v595_v54, %v3618_v34 }
 0x170   :  { %v757_v38 = vmul.f32 %v725_v63, %v725_v63 }
 0x171   :  { %v603_v37 = vpop.permute.xlu1 %602 }
 0x172   :  { %v789_v61 = vmul.f32 %v3359_v39, %v757_v38  ;;  %v727_v49 = vsub.f32 %v603_v37, %v3618_v34 }
 0x174   :  { %v821_v45 = vmul.f32 1.442695, %v789_v61  ;;  %v759_v42 = vmul.f32 %v727_v49, %v727_v49  ;;  %v599_v41 = vpop.permute.xlu0 %598 }
 0x175   :  { %v607_v51 = vpop.permute.xlu1 %606  ;;  %v726_v55 = vsub.f32 %v599_v41, %v3618_v34 }
 0x176   :  { %2623 = vpow2.f32 %v821_v45  ;;  %v791_v2 = vmul.f32 %v3359_v39, %v759_v42  ;;  %v728_v59 = vsub.f32 %v607_v51, %v3618_v34 }
 0x177   :  { %v758_v62 = vmul.f32 %v726_v55, %v726_v55 }
 0x178   :  { %v825_v54 = vmul.f32 1.442695, %v791_v2  ;;  %v760_v63 = vmul.f32 %v728_v59, %v728_v59  ;;  %v635_v43 = vpop.permute.xlu0 %634 }
 0x179   :  { %v611_v53 = vpop.permute.xlu1 %610  ;;  %v790_v61 = vmul.f32 %v3359_v39, %v758_v62 }
 0x17a   :  { %2625 = vpow2.f32 %v825_v54  ;;  %v792_v38 = vmul.f32 %v3359_v39, %v760_v63  ;;  %v729_v49 = vsub.f32 %v611_v53, %v3618_v34 }
 0x17b   :  { %v823_v45 = vmul.f32 1.442695, %v790_v61 }
 0x17c   :  { %v827_v37 = vmul.f32 1.442695, %v792_v38  ;;  %v761_v47 = vmul.f32 %v729_v49, %v729_v49  ;;  %v643_v44 = vpop.permute.xlu0 %642 }
 0x17d   :  { %v615_v42 = vpop.permute.xlu1 %614 }
 0x17e   :  { %2627 = vpow2.f32 %v827_v37  ;;  %v793_v51 = vmul.f32 %v3359_v39, %v761_v47  ;;  %v730_v59 = vsub.f32 %v615_v42, %v3618_v34  ;;  %v735_v47 = vsub.f32 %v635_v43, %v3618_v34 }
 0x17f   :  { %2629 = vpow2.f32 %v823_v45 }
 0x180   :  { %v829_v55 = vmul.f32 1.442695, %v793_v51  ;;  %v762_v2 = vmul.f32 %v730_v59, %v730_v59  ;;  %v651_v54 = vpop.permute.xlu0 %650  ;;  %v737_v59 = vsub.f32 %v643_v44, %v3618_v34 }
 0x181   :  { %v619_v41 = vpop.permute.xlu1 %618 }
 0x182   :  { %2631 = vpow2.f32 %v829_v55  ;;  %v794_v62 = vmul.f32 %v3359_v39, %v762_v2  ;;  %v731_v53 = vsub.f32 %v619_v41, %v3618_v34  ;;  %v767_v41 = vmul.f32 %v735_v47, %v735_v47 }
 0x183   :  { %v3635_v63 = vpop.eup %2623  ;;  %v739_v47 = vsub.f32 %v651_v54, %v3618_v34 }
 0x184   :  { %5311 = vst [vmem:[#allocation44_spill] sm:$0xff] %v3635_v63  ;;  %v831_v38 = vmul.f32 1.442695, %v794_v62  ;;  %v763_v61 = vmul.f32 %v731_v53, %v731_v53  ;;  %885 = vadd.xlane.f32.xlu0 %v3635_v63  ;;  %v659_v37 = vpop.permute.xlu0 %658  ;;  %v799_v44 = vmul.f32 %v3359_v39, %v767_v41 }
 0x185   :  { %v623_v49 = vpop.permute.xlu1 %622  ;;  %v741_v41 = vsub.f32 %v659_v37, %v3618_v34 }
 0x186   :  { %2633 = vpow2.f32 %v831_v38  ;;  %v795_v45 = vmul.f32 %v3359_v39, %v763_v61  ;;  %v732_v42 = vsub.f32 %v623_v49, %v3618_v34  ;;  %v769_v49 = vmul.f32 %v737_v59, %v737_v59 }
 0x187   :  { %v3641_v51 = vpop.eup %2625  ;;  %v773_v37 = vmul.f32 %v741_v41, %v741_v41 }
 0x188   :  { %5312 = vst [vmem:[#allocation45_spill] sm:$0xff] %v3641_v51  ;;  %v833_v55 = vmul.f32 1.442695, %v795_v45  ;;  %v764_v2 = vmul.f32 %v732_v42, %v732_v42  ;;  %889 = vadd.xlane.f32.xlu0 %v3641_v51  ;;  %v667_v53 = vpop.permute.xlu0 %666  ;;  %v801_v59 = vmul.f32 %v3359_v39, %v769_v49  ;;  %v771_v51 = vmul.f32 %v739_v47, %v739_v47 }
 0x189   :  { %v627_v62 = vpop.permute.xlu1 %626  ;;  %v743_v47 = vsub.f32 %v667_v53, %v3618_v34 }
 0x18a   :  { %2635 = vpow2.f32 %v833_v55  ;;  %v796_v43 = vmul.f32 %v3359_v39, %v764_v2  ;;  %v733_v38 = vsub.f32 %v627_v62, %v3618_v34  ;;  %v845_v36 = vmul.f32 1.442695, %v801_v59 }
 0x18b   :  { %v3647_v63 = vpop.eup %2627  ;;  %v775_v41 = vmul.f32 %v743_v47, %v743_v47 }
 0x18c   :  { %5313 = vst [vmem:[#allocation46_spill] sm:$0xff] %v3647_v63  ;;  %v3649_v61 = vpop.eup %2629  ;;  %v835_v56 = vmul.f32 1.442695, %v796_v43  ;;  %v765_v57 = vmul.f32 %v733_v38, %v733_v38  ;;  %891 = vadd.xlane.f32.xlu0 %v3647_v63  ;;  %v675_v42 = vpop.permute.xlu0 %674  ;;  %v841_v63 = vmul.f32 1.442695, %v799_v44  ;;  %v803_v44 = vmul.f32 %v3359_v39, %v771_v51 }
 0x18d   :  { %5314 = vst [vmem:[#allocation47_spill] sm:$0xff] %v3649_v61  ;;  %887 = vadd.xlane.f32.xlu1 %v3649_v61  ;;  %v631_v45 = vpop.permute.xlu1 %630  ;;  %v805_v51 = vmul.f32 %v3359_v39, %v773_v37  ;;  %v745_v53 = vsub.f32 %v675_v42, %v3618_v34  ;;  %v807_v37 = vmul.f32 %v3359_v39, %v775_v41 }
 0x18e   :  { %2637 = vpow2.f32 %v835_v56  ;;  %v797_v55 = vmul.f32 %v3359_v39, %v765_v57  ;;  %v734_v2 = vsub.f32 %v631_v45, %v3618_v34 }
 0x18f   :  { %v3657_v62 = vpop.eup %2631  ;;  %v777_v47 = vmul.f32 %v745_v53, %v745_v53 }
 0x190   :  { %5315 = vst [vmem:[#allocation48_spill] sm:$0xff] %v3657_v62  ;;  %v837_v43 = vmul.f32 1.442695, %v797_v55  ;;  %v766_v38 = vmul.f32 %v734_v2, %v734_v2  ;;  %v683_v61 = vpop.permute.xlu0 %682 }
 0x191   :  { %893 = vadd.xlane.f32.xlu1 %v3657_v62  ;;  %v639_v54 = vpop.permute.xlu1 %638  ;;  %v3854_v62 = vld [vmem:[%s5141_s0 + $0x60] sm:$0xff] }
 0x192   :  { %2639 = vpow2.f32 %v837_v43  ;;  %v798_v56 = vmul.f32 %v3359_v39, %v766_v38  ;;  %v736_v57 = vsub.f32 %v639_v54, %v3618_v34 }
 0x193   :  { %v3664_v45 = vpop.eup %2633  ;;  %2641 = vpow2.f32 %v841_v63  ;;  %v849_v63 = vmul.f32 1.442695, %v803_v44  ;;  %v853_v44 = vmul.f32 1.442695, %v805_v51  ;;  %v809_v51 = vmul.f32 %v3359_v39, %v777_v47 }
 0x194   :  { %5316 = vst [vmem:[#allocation49_spill] sm:$0xff] %v3664_v45  ;;  %v839_v48 = vmul.f32 1.442695, %v798_v56  ;;  %v768_v49 = vmul.f32 %v736_v57, %v736_v57  ;;  %895 = vadd.xlane.f32.xlu0 %v3664_v45  ;;  %v691_v56 = vpop.permute.xlu0 %690 }
 0x195   :  { %v647_v55 = vpop.permute.xlu1 %646  ;;  %v749_v41 = vsub.f32 %v691_v56, %v3618_v34 }
 0x196   :  { %2643 = vpow2.f32 %v839_v48  ;;  %v800_v2 = vmul.f32 %v3359_v39, %v768_v49  ;;  %v738_v43 = vsub.f32 %v647_v55, %v3618_v34 }
 0x197   :  { %v3671_v38 = vpop.eup %2635  ;;  %2645 = vpow2.f32 %v845_v36  ;;  %v747_v36 = vsub.f32 %v683_v61, %v3618_v34  ;;  %v781_v47 = vmul.f32 %v749_v41, %v749_v41 }
 0x198   :  { %5317 = vst [vmem:[#allocation50_spill] sm:$0xff] %v3671_v38  ;;  %v843_v59 = vmul.f32 1.442695, %v800_v2  ;;  %v770_v54 = vmul.f32 %v738_v43, %v738_v43  ;;  %897 = vadd.xlane.f32.xlu1 %v3671_v38 }
 0x199   :  { %v655_v57 = vpop.permute.xlu1 %654  ;;  %v779_v45 = vmul.f32 %v747_v36, %v747_v36 }
 0x19a   :  { %2647 = vpow2.f32 %v843_v59  ;;  %v802_v48 = vmul.f32 %v3359_v39, %v770_v54  ;;  %v740_v49 = vsub.f32 %v655_v57, %v3618_v34  ;;  %v699_v54 = vpop.permute.xlu0 %698 }
 0x19b   :  { %v3678_v55 = vpop.eup %2637  ;;  %2649 = vpow2.f32 %v849_v63  ;;  %v857_v63 = vmul.f32 1.442695, %v807_v37  ;;  %v811_v36 = vmul.f32 %v3359_v39, %v779_v45  ;;  %v861_v37 = vmul.f32 1.442695, %v809_v51 }
 0x19c   :  { %5318 = vst [vmem:[#allocation51_spill] sm:$0xff] %v3678_v55  ;;  %v847_v2 = vmul.f32 1.442695, %v802_v48  ;;  %v772_v43 = vmul.f32 %v740_v49, %v740_v49  ;;  %899 = vadd.xlane.f32.xlu0 %v3678_v55  ;;  %v3848_v55 = vld [vmem:[%s5141_s0 + $0xd8] sm:$0xff] }
 0x19d   :  { %v663_v42 = vpop.permute.xlu1 %662 }
 0x19e   :  { %2651 = vpow2.f32 %v847_v2  ;;  %v804_v59 = vmul.f32 %v3359_v39, %v772_v43  ;;  %v742_v57 = vsub.f32 %v663_v42, %v3618_v34 }
 0x19f   :  { %v3685_v38 = vpop.eup %2639  ;;  %2653 = vpow2.f32 %v853_v44 }
 0x1a0   :  { %5319 = vst [vmem:[#allocation52_spill] sm:$0xff] %v3685_v38  ;;  %v851_v61 = vmul.f32 1.442695, %v804_v59  ;;  %v774_v48 = vmul.f32 %v742_v57, %v742_v57  ;;  %901 = vadd.xlane.f32.xlu1 %v3685_v38  ;;  %v3690_v49 = vpop.eup %2641  ;;  %v707_v57 = vpop.permute.xlu0 %706 }
 0x1a1   :  { %v671_v53 = vpop.permute.xlu1 %670  ;;  %5320 = vst [vmem:[#allocation53_spill] sm:$0xff] %v3690_v49 }
 0x1a2   :  { %2655 = vpow2.f32 %v851_v61  ;;  %v806_v2 = vmul.f32 %v3359_v39, %v774_v48  ;;  %v744_v43 = vsub.f32 %v671_v53, %v3618_v34  ;;  %v751_v61 = vsub.f32 %v699_v54, %v3618_v34 }
 0x1a3   :  { %v3694_v42 = vpop.eup %2643  ;;  %2657 = vpow2.f32 %v857_v63  ;;  %v813_v63 = vmul.f32 %v3359_v39, %v781_v47  ;;  %v753_v54 = vsub.f32 %v707_v57, %v3618_v34 }
 0x1a4   :  { %5321 = vst [vmem:[#allocation54_spill] sm:$0xff] %v3694_v42  ;;  %v855_v59 = vmul.f32 1.442695, %v806_v2  ;;  %v776_v44 = vmul.f32 %v744_v43, %v744_v43  ;;  %903 = vadd.xlane.f32.xlu0 %v3694_v42  ;;  %905 = vadd.xlane.f32.xlu1 %v3690_v49  ;;  %v3699_v56 = vpop.eup %2645  ;;  %v865_v43 = vmul.f32 1.442695, %v811_v36  ;;  %v783_v51 = vmul.f32 %v751_v61, %v751_v61  ;;  %v3084_v49 = vld [vmem:[%s5141_s0 + $0x88] sm:$0xff] }
 0x1a5   :  { %5322 = vst [vmem:[#allocation55_spill] sm:$0xff] %v3699_v56  ;;  %v679_v48 = vpop.permute.xlu1 %678  ;;  %v785_v47 = vmul.f32 %v753_v54, %v753_v54 }
 0x1a6   :  { %2659 = vpow2.f32 %v855_v59  ;;  %v808_v53 = vmul.f32 %v3359_v39, %v776_v44  ;;  %v746_v45 = vsub.f32 %v679_v48, %v3618_v34  ;;  %v715_v44 = vpop.permute.xlu0 %714  ;;  %v815_v57 = vmul.f32 %v3359_v39, %v783_v51  ;;  %v3731_v51 = vld [vmem:[%s5143_s2] ss:$0 sm:$0xff] }
 0x1a7   :  { %v3704_v2 = vpop.eup %2647  ;;  %2661 = vpow2.f32 %v861_v37  ;;  %v869_v37 = vmul.f32 1.442695, %v813_v63  ;;  %v817_v54 = vmul.f32 %v3731_v51, %v785_v47 }
 0x1a8   :  { %5323 = vst [vmem:[#allocation56_spill] sm:$0xff] %v3704_v2  ;;  %v859_v38 = vmul.f32 1.442695, %v808_v53  ;;  %v778_v42 = vmul.f32 %v746_v45, %v746_v45  ;;  %907 = vadd.xlane.f32.xlu0 %v3704_v2  ;;  %909 = vadd.xlane.f32.xlu1 %v3699_v56  ;;  %v3710_v59 = vpop.eup %2649  ;;  %v873_v63 = vmul.f32 1.442695, %v815_v57 }
 0x1a9   :  { %v687_v41 = vpop.permute.xlu1 %686  ;;  %5324 = vst [vmem:[#allocation57_spill] sm:$0xff] %v3710_v59 }
 0x1aa   :  { %2663 = vpow2.f32 %v859_v38  ;;  %v810_v48 = vmul.f32 %v3359_v39, %v778_v42  ;;  %v748_v36 = vsub.f32 %v687_v41, %v3618_v34  ;;  %v755_v38 = vsub.f32 %v715_v44, %v3618_v34 }
 0x1ab   :  { %v3714_v53 = vpop.eup %2651  ;;  %2665 = vpow2.f32 %v865_v43 }
 0x1ac   :  { %5325 = vst [vmem:[#allocation58_spill] sm:$0xff] %v3714_v53  ;;  %v863_v45 = vmul.f32 1.442695, %v810_v48  ;;  %v780_v56 = vmul.f32 %v748_v36, %v748_v36  ;;  %911 = vadd.xlane.f32.xlu0 %v3714_v53  ;;  %913 = vadd.xlane.f32.xlu1 %v3710_v59  ;;  %v3720_v2 = vpop.eup %2653 }
 0x1ad   :  { %v695_v61 = vpop.permute.xlu1 %694  ;;  %5326 = vst [vmem:[#allocation59_spill] sm:$0xff] %v3720_v2 }
 0x1ae   :  { %2667 = vpow2.f32 %v863_v45  ;;  %v812_v42 = vmul.f32 %v3359_v39, %v780_v56  ;;  %v750_v43 = vsub.f32 %v695_v61, %v3618_v34  ;;  %v787_v39 = vmul.f32 %v755_v38, %v755_v38 }
 0x1af   :  { %v3724_v41 = vpop.eup %2655  ;;  %2669 = vpow2.f32 %v869_v37 }
 0x1b0   :  { %5327 = vst [vmem:[#allocation60_spill] sm:$0xff] %v3724_v41  ;;  %v867_v48 = vmul.f32 1.442695, %v812_v42  ;;  %v782_v36 = vmul.f32 %v750_v43, %v750_v43  ;;  %915 = vadd.xlane.f32.xlu0 %v3724_v41  ;;  %917 = vadd.xlane.f32.xlu1 %v3720_v2  ;;  %v3734_v44 = vpop.eup %2657  ;;  %v877_v43 = vmul.f32 1.442695, %v817_v54  ;;  %v819_v47 = vmul.f32 %v3731_v51, %v787_v39 }
 0x1b1   :  { %v703_v56 = vpop.permute.xlu1 %702  ;;  %5328 = vst [vmem:[#allocation61_spill] sm:$0xff] %v3734_v44 }
 0x1b2   :  { %2671 = vpow2.f32 %v867_v48  ;;  %v814_v45 = vmul.f32 %v3731_v51, %v782_v36  ;;  %v752_v61 = vsub.f32 %v703_v56, %v3618_v34  ;;  %v881_v54 = vmul.f32 1.442695, %v819_v47 }
 0x1b3   :  { %v3738_v42 = vpop.eup %2659  ;;  %2673 = vpow2.f32 %v873_v63 }
 0x1b4   :  { %5329 = vst [vmem:[#allocation62_spill] sm:$0xff] %v3738_v42  ;;  %v871_v37 = vmul.f32 1.442695, %v814_v45  ;;  %v784_v57 = vmul.f32 %v752_v61, %v752_v61  ;;  %919 = vadd.xlane.f32.xlu0 %v3738_v42  ;;  %921 = vadd.xlane.f32.xlu1 %v3734_v44  ;;  %v3743_v41 = vpop.eup %2661  ;;  %v5345_v42 = vmov 3  }
 0x1b5   :  { %v711_v38 = vpop.permute.xlu1 %710  ;;  %5330 = vst [vmem:[#allocation63_spill] sm:$0xff] %v3743_v41 }
 0x1b6   :  { %2675 = vpow2.f32 %v871_v37  ;;  %v816_v48 = vmul.f32 %v3731_v51, %v784_v57  ;;  %v754_v36 = vsub.f32 %v711_v38, %v3618_v34 }
 0x1b7   :  { %v3747_v56 = vpop.eup %2663  ;;  %2677 = vpow2.f32 %v877_v43 }
 0x1b8   :  { %5331 = vst [vmem:[#allocation64_spill] sm:$0xff] %v3747_v56  ;;  %v875_v45 = vmul.f32 1.442695, %v816_v48  ;;  %v786_v61 = vmul.f32 %v754_v36, %v754_v36  ;;  %923 = vadd.xlane.f32.xlu0 %v3747_v56  ;;  %925 = vadd.xlane.f32.xlu1 %v3743_v41  ;;  %v3751_v63 = vpop.eup %2665  ;;  %v5201_v41 = vmov 3   ;;  %v5343_v56 = vmov 2  }
 0x1b9   :  { %5332 = vst [vmem:[#allocation65_spill] sm:$0xff] %v3751_v63  ;;  %v719_v39 = vpop.permute.xlu1 %718 }
 0x1ba   :  { %2679 = vpow2.f32 %v875_v45  ;;  %v818_v37 = vmul.f32 %v3731_v51, %v786_v61  ;;  %v756_v57 = vsub.f32 %v719_v39, %v3618_v34 }
 0x1bb   :  { %v3755_v59 = vpop.eup %2667  ;;  %2681 = vpow2.f32 %v881_v54 }
 0x1bc   :  { %5333 = vst [vmem:[#allocation66_spill] sm:$0xff] %v3755_v59  ;;  %v879_v38 = vmul.f32 1.442695, %v818_v37  ;;  %v788_v53 = vmul.f32 %v756_v57, %v756_v57  ;;  %927 = vadd.xlane.f32.xlu0 %v3755_v59  ;;  %929 = vadd.xlane.f32.xlu1 %v3751_v63  ;;  %v3759_v48 = vpop.eup %2669  ;;  %v3072_v57 = vld [vmem:[%s5141_s0] sm:$0xff]  ;;  %v3086_v63 = vld [vmem:[%s5141_s0 + $0x98] sm:$0xff] }
 0x1bd   :  { %5334 = vst [vmem:[#allocation67_spill] sm:$0xff] %v3759_v48  ;;  %v3841_v59 = vld [vmem:[%s5141_s0 + $0x58] sm:$0xff] }
 0x1be   :  { %2683 = vpow2.f32 %v879_v38  ;;  %v820_v43 = vmul.f32 %v3731_v51, %v788_v53  ;;  %v3073_v38 = vld [vmem:[%s5141_s0 + $0x10] sm:$0xff] }
 0x1bf   :  { %v3762_v47 = vpop.eup %2671 }
 0x1c0   :  { %5335 = vst [vmem:[#allocation68_spill] sm:$0xff] %v3762_v47  ;;  %v883_v36 = vmul.f32 1.442695, %v820_v43  ;;  %931 = vadd.xlane.f32.xlu0 %v3762_v47  ;;  %933 = vadd.xlane.f32.xlu1 %v3759_v48  ;;  %v3766_v34 = vpop.eup %2673  ;;  %v3074_v43 = vld [vmem:[%s5141_s0 + $0x18] sm:$0xff]  ;;  %v3823_v48 = vld [vmem:[%s5141_s0 + $0x40] sm:$0xff]  ;;  %v3832_v47 = vld [vmem:[%s5141_s0 + $0xc8] sm:$0xff] }
 0x1c1   :  { %5336 = vst [vmem:[#allocation69_spill] sm:$0xff] %v3766_v34 }
 0x1c2   :  { %2685 = vpow2.f32 %v883_v36  ;;  %v3075_v36 = vld [vmem:[%s5141_s0 + $0x8] sm:$0xff] }
 0x1c3   :  { %v3768_v45 = vpop.eup %2675 }
 0x1c4   :  { %5337 = vst [vmem:[#allocation70_spill] sm:$0xff] %v3768_v45  ;;  %935 = vadd.xlane.f32.xlu0 %v3768_v45  ;;  %937 = vadd.xlane.f32.xlu1 %v3766_v34  ;;  %v3772_v61 = vpop.eup %2677  ;;  %v3081_v34 = vld [vmem:[%s5141_s0 + $0xb8] sm:$0xff]  ;;  %v3082_v45 = vld [vmem:[%s5141_s0 + $0x80] sm:$0xff] }
 0x1c5   :  { %5338 = vst [vmem:[#allocation71_spill] sm:$0xff] %v3772_v61 }
 0x1c7   :  { %v3774_v54 = vpop.eup %2679 }
 0x1c8   :  { %5339 = vst [vmem:[#allocation72_spill] sm:$0xff] %v3774_v54  ;;  %939 = vadd.xlane.f32.xlu0 %v3774_v54  ;;  %941 = vadd.xlane.f32.xlu1 %v3772_v61  ;;  %v3778_v53 = vpop.eup %2681  ;;  %v3078_v61 = vld [vmem:[%s5141_s0 + $0x28] sm:$0xff]  ;;  %v3080_v54 = vld [vmem:[%s5141_s0 + $0x30] sm:$0xff] }
 0x1c9   :  { %5340 = vst [vmem:[#allocation73_spill] sm:$0xff] %v3778_v53 }
 0x1cb   :  { %v3780_v39 = vpop.eup %2683 }
 0x1cc   :  { %5341 = vst [vmem:[#allocation74_spill] sm:$0xff] %v3780_v39  ;;  %943 = vadd.xlane.f32.xlu0 %v3780_v39  ;;  %945 = vadd.xlane.f32.xlu1 %v3778_v53  ;;  %v3077_v53 = vld [vmem:[%s5141_s0 + $0x90] sm:$0xff]  ;;  %v3079_v39 = vld [vmem:[%s5141_s0 + $0xa8] sm:$0xff] }
 0x1cf   :  { %v3784_v37 = vpop.eup %2685 }
 0x1d0   :  { %5342 = vst [vmem:[#allocation75_spill] sm:$0xff] %v3784_v37  ;;  %947 = vadd.xlane.f32.xlu0 %v3784_v37  ;;  %v3076_v37 = vld [vmem:[%s5141_s0 + $0x20] sm:$0xff] }
 0x1dd   :  { %1113 = vperm.xlu1 %2541, %v3072_v57  }
 0x1e1   :  { %1121 = vperm.xlu1 %2541, %v3073_v38  }
 0x1e5   :  { %1125 = vperm.xlu1 %2541, %v3074_v43  }
 0x1e6   :  { %1117 = vperm.xlu0 %2542, %v3075_v36  }
 0x1e9   :  { %1129 = vperm.xlu1 %2541, %v3076_v37  }
 0x1ea   :  { %1185 = vperm.xlu0 %2542, %v3077_v53  }
 0x1ed   :  { %1133 = vperm.xlu1 %2541, %v3078_v61  }
 0x1ee   :  { %1197 = vperm.xlu0 %2542, %v3079_v39  }
 0x1f1   :  { %1137 = vperm.xlu1 %2541, %v3080_v54  }
 0x1f2   :  { %1205 = vperm.xlu0 %2542, %v3081_v34  }
 0x1f5   :  { %1177 = vperm.xlu1 %2541, %v3082_v45  }
 0x1f6   :  { %1145 = vperm.xlu0 %2542, %v3823_v48  }
 0x1f9   :  { %1181 = vperm.xlu1 %2541, %v3084_v49  }
 0x1fa   :  { %1213 = vperm.xlu0 %2542, %v3832_v47  }
 0x1fd   :  { %1189 = vperm.xlu1 %2541, %v3086_v63  }
 0x1fe   :  { %1157 = vperm.xlu0 %2542, %v3841_v59  }
 0x201   :  { %2543 = vset.pattern.permute.xlu1 %v5201_v41  ;;  %v3860_v41 = vld [vmem:[%s5141_s0 + $0xe8] sm:$0xff] }
 0x202   :  { %1221 = vperm.xlu0 %2542, %v3848_v55   ;;  %1636 = vperm.xlu1 %2543, %v3075_v36   ;;  %v3866_v36 = vld [vmem:[%s5141_s0 + $0x78] sm:$0xff] }
 0x206   :  { %1161 = vperm.xlu0 %2542, %v3854_v62   ;;  %1696 = vperm.xlu1 %2543, %v3082_v45   ;;  %v3872_v45 = vld [vmem:[%s5141_s0 + $0xf8] sm:$0xff] }
 0x20a   :  { %1229 = vperm.xlu0 %2542, %v3860_v41   ;;  %1640 = vperm.xlu1 %2543, %v3073_v38   ;;  %v3093_v38 = vld [vmem:[%s5141_s0 + $0xa0] sm:$0xff] }
 0x20d   :  { %v3879_v44 = vpop.xlane.xlu0 %885 }
 0x20e   :  { %1173 = vperm.xlu0 %2542, %v3866_v36   ;;  %1704 = vperm.xlu1 %2543, %v3077_v53   ;;  %5344 = vst [vmem:[#allocation76_spill] sm:$0xff] %v3879_v44  ;;  %v3094_v53 = vld [vmem:[%s5141_s0 + $0x38] sm:$0xff] }
 0x211   :  { %v3885_v2 = vpop.xlane.xlu0 %889 }
 0x212   :  { %1237 = vperm.xlu0 %2542, %v3872_v45   ;;  %2544 = vset.pattern.permute.xlu1 %v5343_v56  ;;  %5346 = vst [vmem:[#allocation77_spill] sm:$0xff] %v3885_v2 }
 0x213   :  { %1193 = vperm.xlu1 %2544, %v3093_v38  }
 0x216   :  { %2549 = vset.pattern.permute.xlu0 %v5345_v42  ;;  %v3887_v50 = vpop.xlane.xlu1 %887 }
 0x217   :  { %1632 = vperm.xlu0 %2549, %v3072_v57   ;;  %1141 = vperm.xlu1 %2544, %v3094_v53   ;;  %5347 = vst [vmem:[#allocation78_spill] sm:$0xff] %v3887_v50  ;;  %v3893_v57 = vpop.xlane.xlu0 %891 }
 0x218   :  { %5348 = vst [vmem:[#allocation79_spill] sm:$0xff] %v3893_v57 }
 0x21a   :  { %v3895_v60 = vpop.xlane.xlu1 %893 }
 0x21b   :  { %1700 = vperm.xlu0 %2549, %v3084_v49   ;;  %1201 = vperm.xlu1 %2544, %v3095_v35   ;;  %5349 = vst [vmem:[#allocation80_spill] sm:$0xff] %v3895_v60 }
 0x21d   :  { %v3897_v46 = vpop.xlane.xlu0 %895 }
 0x21e   :  { %5350 = vst [vmem:[#allocation81_spill] sm:$0xff] %v3897_v46 }
 0x21f   :  { %1644 = vperm.xlu0 %2549, %v3074_v43   ;;  %2545 = vset.pattern.permute.xlu1 %v5345_v42 }
 0x220   :  { %1648 = vperm.xlu1 %2545, %v3076_v37  }
 0x221   :  { %v3899_v52 = vpop.xlane.xlu1 %897 }
 0x222   :  { %5351 = vst [vmem:[#allocation82_spill] sm:$0xff] %v3899_v52 }
 0x223   :  { %1708 = vperm.xlu0 %2549, %v3086_v63  }
 0x224   :  { %1712 = vperm.xlu1 %2545, %v3093_v38  }
 0x225   :  { %v3901_v49 = vpop.xlane.xlu0 %899 }
 0x226   :  { %5352 = vst [vmem:[#allocation83_spill] sm:$0xff] %v3901_v49 }
 0x227   :  { %1652 = vperm.xlu0 %2549, %v3078_v61   ;;  %v3096_v61 = vld [vmem:[%s5141_s0 + $0x48] sm:$0xff] }
 0x228   :  { %1716 = vperm.xlu1 %2545, %v3079_v39  }
 0x229   :  { %v3903_v33 = vpop.xlane.xlu1 %901 }
 0x22a   :  { %5353 = vst [vmem:[#allocation84_spill] sm:$0xff] %v3903_v33 }
 0x22b   :  { %1656 = vperm.xlu0 %2549, %v3080_v54  }
 0x22c   :  { %1660 = vperm.xlu1 %2545, %v3094_v53   ;;  %v3098_v53 = vld [vmem:[%s5141_s0 + $0xc0] sm:$0xff] }
 0x22d   :  { %v3905_v43 = vpop.xlane.xlu1 %905  ;;  %v3907_v37 = vpop.xlane.xlu0 %903 }
 0x22e   :  { %5354 = vst [vmem:[#allocation85_spill] sm:$0xff] %v3905_v43  ;;  %5355 = vst [vmem:[#allocation86_spill] sm:$0xff] %v3907_v37 }
 0x22f   :  { %1720 = vperm.xlu0 %2549, %v3095_v35   ;;  %v3097_v35 = vld [vmem:[%s5141_s0 + $0x50] sm:$0xff] }
 0x230   :  { %1724 = vperm.xlu1 %2545, %v3081_v34  }
 0x231   :  { %v3909_v63 = vpop.xlane.xlu1 %909  ;;  %v3911_v38 = vpop.xlane.xlu0 %907 }
 0x232   :  { %5356 = vst [vmem:[#allocation87_spill] sm:$0xff] %v3909_v63  ;;  %5357 = vst [vmem:[#allocation88_spill] sm:$0xff] %v3911_v38  ;;  %v3100_v63 = vld [vmem:[%s5141_s0 + $0x68] sm:$0xff] }
 0x233   :  { %1668 = vperm.xlu0 %2549, %v3096_v61  }
 0x234   :  { %2546 = vset.pattern.permute.xlu1 %v5343_v56 }
 0x235   :  { %v3917_v39 = vpop.xlane.xlu1 %913  ;;  %1149 = vperm.xlu1 %2546, %v3096_v61   ;;  %v3919_v54 = vpop.xlane.xlu0 %911  ;;  %v3099_v61 = vld [vmem:[%s5141_s0 + $0xd0] sm:$0xff] }
 0x236   :  { %5358 = vst [vmem:[#allocation89_spill] sm:$0xff] %v3917_v39  ;;  %5359 = vst [vmem:[#allocation90_spill] sm:$0xff] %v3919_v54 }
 0x237   :  { %1672 = vperm.xlu0 %2549, %v3097_v35  }
 0x239   :  { %v3924_v34 = vpop.xlane.xlu1 %917  ;;  %1209 = vperm.xlu1 %2546, %v3098_v53   ;;  %v3929_v38 = vpop.xlane.xlu0 %915 }
 0x23a   :  { %5360 = vst [vmem:[#allocation91_spill] sm:$0xff] %v3924_v34  ;;  %5361 = vst [vmem:[#allocation92_spill] sm:$0xff] %v3929_v38  ;;  %v3101_v38 = vld [vmem:[%s5141_s0 + $0x70] sm:$0xff] }
 0x23b   :  { %1736 = vperm.xlu0 %2549, %v3099_v61  }
 0x23d   :  { %v3934_v54 = vpop.xlane.xlu1 %921  ;;  %1153 = vperm.xlu1 %2546, %v3097_v35   ;;  %v3936_v39 = vpop.xlane.xlu0 %919 }
 0x23e   :  { %5362 = vst [vmem:[#allocation93_spill] sm:$0xff] %v3934_v54  ;;  %5363 = vst [vmem:[#allocation94_spill] sm:$0xff] %v3936_v39 }
 0x23f   :  { %1684 = vperm.xlu0 %2549, %v3100_v63  }
 0x241   :  { %v3941_v37 = vpop.xlane.xlu1 %925  ;;  %1217 = vperm.xlu1 %2546, %v3099_v61   ;;  %v3943_v40 = vpop.xlane.xlu0 %923 }
 0x242   :  { %5364 = vst [vmem:[#allocation95_spill] sm:$0xff] %v3941_v37  ;;  %5365 = vst [vmem:[#allocation96_spill] sm:$0xff] %v3943_v40  ;;  %v3102_v37 = vld [vmem:[%s5141_s0 + $0xf0] sm:$0xff] }
 0x243   :  { %1688 = vperm.xlu0 %2549, %v3101_v38  }
 0x245   :  { %v3948_v58 = vpop.xlane.xlu1 %929  ;;  %2547 = vset.pattern.permute.xlu1 %v5345_v42  ;;  %v3951_v35 = vpop.xlane.xlu0 %927 }
 0x246   :  { %5366 = vst [vmem:[#allocation97_spill] sm:$0xff] %v3948_v58  ;;  %5367 = vst [vmem:[#allocation98_spill] sm:$0xff] %v3951_v35  ;;  %1664 = vperm.xlu1 %2547, %v3823_v48  }
 0x247   :  { %1752 = vperm.xlu0 %2549, %v3102_v37  }
 0x249   :  { %v3957_v61 = vpop.xlane.xlu1 %933  ;;  %v3959_v40 = vpop.xlane.xlu0 %931 }
 0x24a   :  { %5368 = vst [vmem:[#allocation99_spill] sm:$0xff] %v3957_v61  ;;  %5369 = vst [vmem:[#allocation100_spill] sm:$0xff] %v3959_v40  ;;  %1728 = vperm.xlu1 %2547, %v3098_v53   ;;  %v3979_v53 = vld [vmem:[%s5142_s1 + $0x2] ss:$0 sm:$0xff] }
 0x24d   :  { %v3961_v39 = vpop.xlane.xlu1 %937  ;;  %v3963_v54 = vpop.xlane.xlu0 %935 }
 0x24e   :  { %5370 = vst [vmem:[#allocation101_spill] sm:$0xff] %v3961_v39  ;;  %5371 = vst [vmem:[#allocation102_spill] sm:$0xff] %v3963_v54  ;;  %1732 = vperm.xlu1 %2547, %v3832_v47  }
 0x251   :  { %v3966_v58 = vpop.xlane.xlu1 %941  ;;  %v3968_v35 = vpop.xlane.xlu0 %939 }
 0x252   :  { %5372 = vst [vmem:[#allocation103_spill] sm:$0xff] %v3966_v58  ;;  %5373 = vst [vmem:[#allocation104_spill] sm:$0xff] %v3968_v35  ;;  %1676 = vperm.xlu1 %2547, %v3841_v59  }
 0x255   :  { %v3971_v48 = vpop.xlane.xlu1 %945  ;;  %v3974_v61 = vpop.xlane.xlu0 %943 }
 0x256   :  { %5374 = vst [vmem:[#allocation105_spill] sm:$0xff] %v3971_v48  ;;  %1740 = vperm.xlu1 %2547, %v3848_v55   ;;  %5375 = vst [vmem:[#allocation106_spill] sm:$0xff] %v3974_v61  ;;  %v3103_v55 = vld [vmem:[%s5141_s0 + $0xe0] sm:$0xff] }
 0x259   :  { %v1114_v54 = vpop.permute.xlu1 %1113  ;;  %v3983_v35 = vpop.xlane.xlu0 %947 }
 0x25a   :  { %v1244_v47 = vsub.f32 %v1114_v54, %v3979_v53  ;;  %2548 = vset.pattern.permute.xlu1 %v5343_v56  ;;  %5376 = vst [vmem:[#allocation107_spill] sm:$0xff] %v3983_v35 }
 0x25b   :  { %1165 = vperm.xlu1 %2548, %v3100_v63  }
 0x25c   :  { %v1276_v58 = vmul.f32 %v1244_v47, %v1244_v47 }
 0x25d   :  { %v1122_v59 = vpop.permute.xlu1 %1121 }
 0x25e   :  { %v1308_v48 = vmul.f32 %v3731_v51, %v1276_v58 }
 0x25f   :  { %1225 = vperm.xlu1 %2548, %v3103_v55  }
 0x260   :  { %v1340_v61 = vmul.f32 1.442695, %v1308_v48 }
 0x261   :  { %v1126_v39 = vpop.permute.xlu1 %1125  ;;  %v1118_v40 = vpop.permute.xlu0 %1117 }
 0x262   :  { %2687 = vpow2.f32 %v1340_v61  ;;  %v1245_v50 = vsub.f32 %v1118_v40, %v3979_v53 }
 0x263   :  { %1169 = vperm.xlu1 %2548, %v3101_v38  }
 0x265   :  { %v3989_v54 = vpop.permute.xlu1 %1129  ;;  %v1186_v56 = vpop.permute.xlu0 %1185 }
 0x267   :  { %1233 = vperm.xlu1 %2548, %v3102_v37   ;;  %v1247_v37 = vsub.f32 %v1126_v39, %v3979_v53 }
 0x269   :  { %v3991_v63 = vpop.permute.xlu1 %1133  ;;  %v3993_v47 = vpop.permute.xlu0 %1197  ;;  %v1279_v33 = vmul.f32 %v1247_v37, %v1247_v37 }
 0x26b   :  { %2550 = vset.pattern.permute.xlu1 %v5345_v42  ;;  %v1311_v39 = vmul.f32 %v3731_v51, %v1279_v33 }
 0x26c   :  { %1680 = vperm.xlu1 %2550, %v3854_v62  }
 0x26d   :  { %v3997_v58 = vpop.permute.xlu1 %1137  ;;  %v3999_v35 = vpop.permute.xlu0 %1205 }
 0x26f   :  { %v4001_v48 = vpop.eup %2687 }
 0x270   :  { %5377 = vst [vmem:[#allocation108_spill] sm:$0xff] %v4001_v48  ;;  %1744 = vperm.xlu1 %2550, %v3103_v55   ;;  %1404 = vadd.xlane.f32.xlu0 %v4001_v48 }
 0x271   :  { %v1178_v38 = vpop.permute.xlu1 %1177  ;;  %v4004_v61 = vpop.permute.xlu0 %1145 }
 0x272   :  { %v1260_v34 = vsub.f32 %v1178_v38, %v3979_v53 }
 0x274   :  { %v1292_v43 = vmul.f32 %v1260_v34, %v1260_v34  ;;  %1748 = vperm.xlu1 %2550, %v3860_v41  }
 0x275   :  { %v1182_v62 = vpop.permute.xlu1 %1181  ;;  %v4009_v42 = vpop.permute.xlu0 %1213 }
 0x276   :  { %v1324_v49 = vmul.f32 %v3731_v51, %v1292_v43  ;;  %v1261_v55 = vsub.f32 %v1182_v62, %v3979_v53  ;;  %v4022_v43 = vld [vmem:[%s5142_s1 + $0x3] ss:$0 sm:$0xff]  ;;  %v1346_v62 = vmul.f32 1.442695, %v1311_v39  ;;  %v1246_v39 = vsub.f32 %v1122_v59, %v3979_v53 }
 0x278   :  { %v1372_v52 = vmul.f32 1.442695, %v1324_v49  ;;  %v1293_v48 = vmul.f32 %v1261_v55, %v1261_v55  ;;  %1692 = vperm.xlu1 %2550, %v3866_v36   ;;  %v1278_v40 = vmul.f32 %v1246_v39, %v1246_v39 }
 0x279   :  { %v1190_v46 = vpop.permute.xlu1 %1189  ;;  %v4014_v60 = vpop.permute.xlu0 %1157 }
 0x27a   :  { %2689 = vpow2.f32 %v1372_v52  ;;  %v1325_v41 = vmul.f32 %v3731_v51, %v1293_v48  ;;  %v1263_v34 = vsub.f32 %v1190_v46, %v3979_v53 }
 0x27c   :  { %v1374_v38 = vmul.f32 1.442695, %v1325_v41  ;;  %v1295_v49 = vmul.f32 %v1263_v34, %v1263_v34  ;;  %1756 = vperm.xlu1 %2550, %v3872_v45  }
 0x27d   :  { %v1637_v36 = vpop.permute.xlu1 %1636  ;;  %v4025_v37 = vpop.permute.xlu0 %1221 }
 0x27e   :  { %2691 = vpow2.f32 %v1374_v38  ;;  %v1327_v33 = vmul.f32 %v3731_v51, %v1295_v49  ;;  %v1764_v52 = vsub.f32 %v1637_v36, %v4022_v43  ;;  %v1277_v38 = vmul.f32 %v1245_v50, %v1245_v50 }
 0x27f   :  { %2693 = vpow2.f32 %v1346_v62  ;;  %v1262_v36 = vsub.f32 %v1186_v56, %v3979_v53 }
 0x280   :  { %v1796_v48 = vmul.f32 %v1764_v52, %v1764_v52  ;;  %v1378_v41 = vmul.f32 1.442695, %v1327_v33  ;;  %v1309_v33 = vmul.f32 %v3731_v51, %v1277_v38 }
 0x281   :  { %v1697_v46 = vpop.permute.xlu1 %1696  ;;  %v4029_v55 = vpop.permute.xlu0 %1161  ;;  %v1294_v50 = vmul.f32 %v1262_v36, %v1262_v36 }
 0x282   :  { %v1828_v34 = vmul.f32 %v3731_v51, %v1796_v48  ;;  %2695 = vpow2.f32 %v1378_v41  ;;  %v1310_v41 = vmul.f32 %v3731_v51, %v1278_v40  ;;  %v1779_v38 = vsub.f32 %v1697_v46, %v4022_v43 }
 0x283   :  { %v1326_v56 = vmul.f32 %v3731_v51, %v1294_v50 }
 0x284   :  { %v1861_v49 = vmul.f32 1.442695, %v1828_v34  ;;  %v1342_v34 = vmul.f32 1.442695, %v1309_v33  ;;  %v1344_v39 = vmul.f32 1.442695, %v1310_v41  ;;  %v1811_v32 = vmul.f32 %v1779_v38, %v1779_v38 }
 0x285   :  { %v1641_v45 = vpop.permute.xlu1 %1640  ;;  %v4033_v57 = vpop.permute.xlu0 %1229  ;;  %v1376_v40 = vmul.f32 1.442695, %v1326_v56 }
 0x286   :  { %2697 = vpow2.f32 %v1861_v49  ;;  %v1843_v56 = vmul.f32 %v3731_v51, %v1811_v32 }
 0x287   :  { %v4036_v2 = vpop.eup %2689  ;;  %2699 = vpow2.f32 %v1342_v34 }
 0x288   :  { %5378 = vst [vmem:[#allocation109_spill] sm:$0xff] %v4036_v2  ;;  %1436 = vadd.xlane.f32.xlu0 %v4036_v2  ;;  %2701 = vpow2.f32 %v1344_v39  ;;  %v1891_v32 = vmul.f32 1.442695, %v1843_v56 }
 0x289   :  { %v1705_v62 = vpop.permute.xlu1 %1704  ;;  %v4040_v52 = vpop.permute.xlu0 %1173  ;;  %2703 = vpow2.f32 %v1376_v40  ;;  %v1248_v40 = vsub.f32 %v3989_v54, %v3979_v53 }
 0x28a   :  { %v1781_v39 = vsub.f32 %v1705_v62, %v4022_v43 }
 0x28b   :  { %v4043_v48 = vpop.eup %2691  ;;  %v1280_v54 = vmul.f32 %v1248_v40, %v1248_v40 }
 0x28c   :  { %5379 = vst [vmem:[#allocation110_spill] sm:$0xff] %v4043_v48  ;;  %1438 = vadd.xlane.f32.xlu0 %v4043_v48  ;;  %v4049_v44 = vpop.eup %2693  ;;  %v1813_v62 = vmul.f32 %v1781_v39, %v1781_v39 }
 0x28d   :  { %v4046_v59 = vpop.permute.xlu0 %1237  ;;  %5380 = vst [vmem:[#allocation111_spill] sm:$0xff] %v4049_v44  ;;  %v1312_v40 = vmul.f32 %v3731_v51, %v1280_v54 }
 0x28e   :  { %v1194_v2 = vpop.permute.xlu1 %1193  ;;  %v1845_v39 = vmul.f32 %v3731_v51, %v1813_v62 }
 0x28f   :  { %v4054_v48 = vpop.eup %2695 }
 0x290   :  { %1410 = vadd.xlane.f32.xlu0 %v4049_v44  ;;  %5381 = vst [vmem:[#allocation112_spill] sm:$0xff] %v4054_v48  ;;  %v1765_v44 = vsub.f32 %v1641_v45, %v4022_v43  ;;  %v1895_v62 = vmul.f32 1.442695, %v1845_v39 }
 0x292   :  { %v1142_v49 = vpop.permute.xlu1 %1141  ;;  %v1633_v20 = vpop.permute.xlu0 %1632 }
 0x293   :  { %v1763_v36 = vsub.f32 %v1633_v20, %v4022_v43  ;;  %v4061_v41 = vpop.eup %2697 }
 0x294   :  { %1442 = vadd.xlane.f32.xlu0 %v4054_v48  ;;  %5382 = vst [vmem:[#allocation113_spill] sm:$0xff] %v4061_v41  ;;  %v4077_v29 = vpop.eup %2699 }
 0x295   :  { %v1795_v33 = vmul.f32 %v1763_v36, %v1763_v36  ;;  %v1797_v36 = vmul.f32 %v1765_v44, %v1765_v44 }
 0x296   :  { %v4059_v31 = vpop.permute.xlu1 %1201  ;;  %v1701_v50 = vpop.permute.xlu0 %1700 }
 0x297   :  { %v1827_v46 = vmul.f32 %v3731_v51, %v1795_v33  ;;  %v1780_v34 = vsub.f32 %v1701_v50, %v4022_v43  ;;  %v1249_v33 = vsub.f32 %v3991_v63, %v3979_v53  ;;  %v1829_v44 = vmul.f32 %v3731_v51, %v1797_v36 }
 0x298   :  { %1925 = vadd.xlane.f32.xlu0 %v4061_v41 }
 0x299   :  { %v1859_v20 = vmul.f32 1.442695, %v1827_v46  ;;  %v1812_v38 = vmul.f32 %v1780_v34, %v1780_v34  ;;  %v1281_v28 = vmul.f32 %v1249_v33, %v1249_v33  ;;  %v1863_v36 = vmul.f32 1.442695, %v1829_v44 }
 0x29a   :  { %v1645_v45 = vpop.permute.xlu0 %1644 }
 0x29b   :  { %v1766_v48 = vsub.f32 %v1645_v45, %v4022_v43  ;;  %v4069_v30 = vpop.permute.xlu1 %1648  ;;  %2705 = vpow2.f32 %v1859_v20  ;;  %v1844_v50 = vmul.f32 %v3731_v51, %v1812_v38  ;;  %v1265_v45 = vsub.f32 %v3993_v47, %v3979_v53  ;;  %v4088_v47 = vpop.eup %2701 }
 0x29c   :  { %v1313_v33 = vmul.f32 %v3731_v51, %v1281_v28  ;;  %v4095_v44 = vpop.eup %2703 }
 0x29d   :  { %v1798_v46 = vmul.f32 %v1766_v48, %v1766_v48  ;;  %v1893_v34 = vmul.f32 1.442695, %v1844_v50  ;;  %v1264_v50 = vsub.f32 %v1194_v2, %v3979_v53  ;;  %5383 = vst [vmem:[#allocation114_spill] sm:$0xff] %v4095_v44  ;;  %v1250_v2 = vsub.f32 %v3997_v58, %v3979_v53 }
 0x29e   :  { %v1709_v41 = vpop.permute.xlu0 %1708  ;;  %v1350_v28 = vmul.f32 1.442695, %v1313_v33 }
 0x29f   :  { %v1830_v63 = vmul.f32 %v3731_v51, %v1798_v46  ;;  %v1782_v20 = vsub.f32 %v1709_v41, %v4022_v43  ;;  %v4083_v38 = vpop.permute.xlu1 %1712  ;;  %2707 = vpow2.f32 %v1893_v34  ;;  %v1297_v46 = vmul.f32 %v1265_v45, %v1265_v45 }
 0x2a0   :  { %1406 = vadd.xlane.f32.xlu1 %v4077_v29  ;;  %2709 = vpow2.f32 %v1891_v32  ;;  %v1251_v34 = vsub.f32 %v1142_v49, %v3979_v53  ;;  %v1296_v45 = vmul.f32 %v1264_v50, %v1264_v50  ;;  %v1267_v49 = vsub.f32 %v3999_v35, %v3979_v53 }
 0x2a1   :  { %v1865_v48 = vmul.f32 1.442695, %v1830_v63  ;;  %v1814_v56 = vmul.f32 %v1782_v20, %v1782_v20  ;;  %v1329_v63 = vmul.f32 %v3731_v51, %v1297_v46  ;;  %v1282_v39 = vmul.f32 %v1250_v2, %v1250_v2 }
 0x2a2   :  { %v1653_v58 = vpop.permute.xlu0 %1652  ;;  %v1328_v50 = vmul.f32 %v3731_v51, %v1296_v45  ;;  %v1299_v33 = vmul.f32 %v1267_v49, %v1267_v49  ;;  %v1767_v2 = vsub.f32 %v4069_v30, %v4022_v43 }
 0x2a3   :  { %2711 = vpow2.f32 %v1865_v48  ;;  %v1846_v41 = vmul.f32 %v3731_v51, %v1814_v56  ;;  %v1717_v27 = vpop.permute.xlu1 %1716  ;;  %v1283_v48 = vmul.f32 %v1251_v34, %v1251_v34  ;;  %v1266_v56 = vsub.f32 %v4059_v31, %v3979_v53 }
 0x2a4   :  { %1408 = vadd.xlane.f32.xlu1 %v4088_v47  ;;  %2713 = vpow2.f32 %v1863_v36  ;;  %v1348_v36 = vmul.f32 1.442695, %v1312_v40  ;;  %v1382_v46 = vmul.f32 1.442695, %v1329_v63  ;;  %v1768_v34 = vsub.f32 %v1653_v58, %v4022_v43 }
 0x2a5   :  { %v1897_v32 = vmul.f32 1.442695, %v1846_v41  ;;  %v1315_v35 = vmul.f32 %v3731_v51, %v1283_v48  ;;  %v1314_v31 = vmul.f32 %v3731_v51, %v1282_v39  ;;  %v1380_v40 = vmul.f32 1.442695, %v1328_v50 }
 0x2a6   :  { %v1784_v45 = vsub.f32 %v1717_v27, %v4022_v43  ;;  %v1800_v48 = vmul.f32 %v1768_v34, %v1768_v34  ;;  %v1799_v39 = vmul.f32 %v1767_v2, %v1767_v2  ;;  %v1783_v50 = vsub.f32 %v4083_v38, %v4022_v43  ;;  %v2551_v38 = vld [vmem:[%s5145_s4 + $0x38] sm:$0xff]  }
 0x2a7   :  { %2715 = vpow2.f32 %v1897_v32  ;;  %v1661_v20 = vpop.permute.xlu1 %1660  ;;  %v1354_v49 = vmul.f32 1.442695, %v1315_v35  ;;  %v1352_v30 = vmul.f32 1.442695, %v1314_v31  ;;  %2468 = vmatprep.subr.bf16.mxu0 %v2551_v38  ;;  %2516 = vmatprep.subr.bf16.mxu1 %v2551_v38 }
 0x2a8   :  { %1440 = vadd.xlane.f32.xlu1 %v4095_v44  ;;  %v4103_v54 = vpop.eup %2705  ;;  %2717 = vpow2.f32 %v1895_v62  ;;  %v1298_v44 = vmul.f32 %v1266_v56, %v1266_v56  ;;  %v1832_v34 = vmul.f32 %v3731_v51, %v1800_v48  ;;  %v1815_v2 = vmul.f32 %v1783_v50, %v1783_v50  ;;  %2469 = vmatpush3.bf16.msra.mxu0 %v2551_v38 }
 0x2a9   :  { %2719 = vpow2.f32 %v1350_v28  ;;  %v1331_v28 = vmul.f32 %v3731_v51, %v1299_v33  ;;  %2524 = vmatpush3.bf16.msra.mxu1 %v2551_v38 }
 0x2aa   :  { %2721 = vpow2.f32 %v1348_v36  ;;  %v1330_v58 = vmul.f32 %v3731_v51, %v1298_v44  ;;  %v1657_v36 = vpop.permute.xlu0 %1656  ;;  %v1770_v44 = vsub.f32 %v1661_v20, %v4022_v43  ;;  %v1869_v48 = vmul.f32 1.442695, %v1832_v34 }
 0x2ab   :  { %v1725_v41 = vpop.permute.xlu1 %1724  ;;  %2723 = vpow2.f32 %v1382_v46  ;;  %v1816_v46 = vmul.f32 %v1784_v45, %v1784_v45  ;;  %v1386_v35 = vmul.f32 1.442695, %v1331_v28  ;;  %v1769_v45 = vsub.f32 %v1657_v36, %v4022_v43 }
 0x2ac   :  { %1923 = vadd.xlane.f32.xlu1 %v4103_v54  ;;  %v4111_v32 = vpop.eup %2707  ;;  %2725 = vpow2.f32 %v1380_v40  ;;  %v1384_v31 = vmul.f32 1.442695, %v1330_v58  ;;  %v1831_v40 = vmul.f32 %v3731_v51, %v1799_v39  ;;  %v1802_v58 = vmul.f32 %v1770_v44, %v1770_v44  ;;  %v2552_v39 = vld [vmem:[%s5145_s4 + $0x30] sm:$0xff]  }
 0x2ad   :  { %1957 = vadd.xlane.f32.xlu0 %v4111_v32  ;;  %v4117_v62 = vpop.eup %2709  ;;  %2727 = vpow2.f32 %v1354_v49  ;;  %v1848_v20 = vmul.f32 %v3731_v51, %v1816_v46  ;;  %v1847_v46 = vmul.f32 %v3731_v51, %v1815_v2  ;;  %2470 = vmatprep.subr.bf16.mxu0 %v2552_v39  ;;  %v1252_v2 = vsub.f32 %v4004_v61, %v3979_v53 }
 0x2ae   :  { %5384 = vst [vmem:[#allocation115_spill] sm:$0xff] %v4117_v62  ;;  %2729 = vpow2.f32 %v1352_v30  ;;  %v1721_v49 = vpop.permute.xlu0 %1720  ;;  %v1867_v50 = vmul.f32 1.442695, %v1831_v40  ;;  %2517 = vmatprep.subr.bf16.mxu1 %v2552_v39  ;;  %2471 = vmatpush3.bf16.msra.mxu0 %v2552_v39 }
 0x2af   :  { %2731 = vpow2.f32 %v1386_v35  ;;  %v1801_v35 = vmul.f32 %v1769_v45, %v1769_v45  ;;  %v1785_v34 = vsub.f32 %v1721_v49, %v4022_v43  ;;  %v1901_v44 = vmul.f32 1.442695, %v1848_v20  ;;  %v2553_v45 = vld [vmem:[%s5145_s4 + $0x28] sm:$0xff]   ;;  %2525 = vmatpush3.bf16.msra.mxu1 %v2552_v39 }
 0x2b0   :  { %v4120_v63 = vpop.eup %2711  ;;  %v1150_v56 = vpop.permute.xlu1 %1149  ;;  %1955 = vadd.xlane.f32.xlu1 %v4117_v62  ;;  %2733 = vpow2.f32 %v1384_v31  ;;  %v1834_v31 = vmul.f32 %v3731_v51, %v1802_v58  ;;  %v1899_v20 = vmul.f32 1.442695, %v1847_v46  ;;  %2472 = vmatprep.subr.bf16.mxu0 %v2553_v45 }
 0x2b1   :  { %1929 = vadd.xlane.f32.xlu0 %v4120_v63  ;;  %v4128_v27 = vpop.eup %2713  ;;  %2735 = vpow2.f32 %v1869_v48  ;;  %v1269_v48 = vsub.f32 %v4009_v42, %v3979_v53  ;;  %2518 = vmatprep.subr.bf16.mxu1 %v2553_v45  ;;  %v2554_v42 = vld [vmem:[%s5145_s4 + $0x20] sm:$0xff]  }
 0x2b2   :  { %5385 = vst [vmem:[#allocation116_spill] sm:$0xff] %v4128_v27  ;;  %2737 = vpow2.f32 %v1867_v50  ;;  %v1873_v61 = vmul.f32 1.442695, %v1834_v31  ;;  %2473 = vmatpush3.bf16.msra.mxu0 %v2553_v45 }
 0x2b3   :  { %2739 = vpow2.f32 %v1901_v44  ;;  %2526 = vmatpush3.bf16.msra.mxu1 %v2553_v45  ;;  %v1301_v44 = vmul.f32 %v1269_v48, %v1269_v48  ;;  %2474 = vmatprep.subr.bf16.mxu0 %v2554_v42 }
 0x2b4   :  { %v4130_v33 = vpop.eup %2715  ;;  %v1210_v62 = vpop.permute.xlu1 %1209  ;;  %1927 = vadd.xlane.f32.xlu1 %v4128_v27  ;;  %v1786_v27 = vsub.f32 %v1725_v41, %v4022_v43  ;;  %2741 = vpow2.f32 %v1899_v20  ;;  %2519 = vmatprep.subr.bf16.mxu1 %v2554_v42 }
 0x2b5   :  { %5386 = vst [vmem:[#allocation117_spill] sm:$0xff] %v4130_v33  ;;  %1961 = vadd.xlane.f32.xlu0 %v4130_v33  ;;  %v4141_v28 = vpop.eup %2717  ;;  %v1253_v33 = vsub.f32 %v1150_v56, %v3979_v53  ;;  %v1817_v56 = vmul.f32 %v1785_v34, %v1785_v34  ;;  %v1268_v50 = vsub.f32 %v1210_v62, %v3979_v53  ;;  %2743 = vpow2.f32 %v1873_v61 }
 0x2b6   :  { %5387 = vst [vmem:[#allocation118_spill] sm:$0xff] %v4141_v28  ;;  %v4148_v36 = vpop.eup %2719  ;;  %v1255_v62 = vsub.f32 %v4014_v60, %v3979_v53  ;;  %2475 = vmatpush3.bf16.msra.mxu0 %v2554_v42  ;;  %v1333_v61 = vmul.f32 %v3731_v51, %v1301_v44 }
 0x2b7   :  { %v4156_v41 = vpop.eup %2721  ;;  %v1300_v45 = vmul.f32 %v1268_v50, %v1268_v50  ;;  %2527 = vmatpush3.bf16.msra.mxu1 %v2554_v42  ;;  %v1271_v50 = vsub.f32 %v4025_v37, %v3979_v53  ;;  %v1669_v42 = vpop.permute.xlu0 %1668 }
 0x2b8   :  { %v4145_v30 = vpop.permute.xlu1 %1153  ;;  %1959 = vadd.xlane.f32.xlu1 %v4141_v28  ;;  %5388 = vst [vmem:[#allocation119_spill] sm:$0xff] %v4156_v41  ;;  %v1818_v28 = vmul.f32 %v1786_v27, %v1786_v27  ;;  %v4163_v40 = vpop.eup %2723  ;;  %v1833_v27 = vmul.f32 %v3731_v51, %v1801_v35  ;;  %v1284_v35 = vmul.f32 %v1252_v2, %v1252_v2 }
 0x2b9   :  { %1414 = vadd.xlane.f32.xlu0 %v4148_v36  ;;  %5389 = vst [vmem:[#allocation120_spill] sm:$0xff] %v4163_v40  ;;  %v4172_v49 = vpop.eup %2725 }
 0x2ba   :  { %5390 = vst [vmem:[#allocation121_spill] sm:$0xff] %v4172_v49  ;;  %v1850_v58 = vmul.f32 %v3731_v51, %v1818_v28  ;;  %v4178_v39 = vpop.eup %2727  ;;  %v1871_v34 = vmul.f32 1.442695, %v1833_v27  ;;  %v1849_v28 = vmul.f32 %v3731_v51, %v1817_v56  ;;  %v2555_v27 = vld [vmem:[%s5145_s4 + $0x18] sm:$0xff]   ;;  %v1316_v60 = vmul.f32 %v3731_v51, %v1284_v35 }
 0x2bb   :  { %5391 = vst [vmem:[#allocation122_spill] sm:$0xff] %v4178_v39  ;;  %2476 = vmatprep.subr.bf16.mxu0 %v2555_v27  ;;  %2520 = vmatprep.subr.bf16.mxu1 %v2555_v27 }
 0x2bc   :  { %v4160_v38 = vpop.permute.xlu1 %1217  ;;  %1412 = vadd.xlane.f32.xlu1 %v4156_v41  ;;  %v1285_v41 = vmul.f32 %v1253_v33, %v1253_v33  ;;  %v4188_v33 = vpop.eup %2729  ;;  %v1905_v31 = vmul.f32 1.442695, %v1850_v58  ;;  %2745 = vpow2.f32 %v1871_v34  ;;  %v1903_v48 = vmul.f32 1.442695, %v1849_v28  ;;  %2477 = vmatpush3.bf16.msra.mxu0 %v2555_v27  ;;  %v2556_v28 = vld [vmem:[%s5145_s4 + $0x10] sm:$0xff]  }
 0x2bd   :  { %1446 = vadd.xlane.f32.xlu0 %v4163_v40  ;;  %5392 = vst [vmem:[#allocation123_spill] sm:$0xff] %v4188_v33  ;;  %v4194_v2 = vpop.eup %2731  ;;  %v1287_v58 = vmul.f32 %v1255_v62, %v1255_v62  ;;  %2528 = vmatpush3.bf16.msra.mxu1 %v2555_v27  ;;  %v1356_v44 = vmul.f32 1.442695, %v1316_v60  ;;  %v1270_v37 = vsub.f32 %v4160_v38, %v3979_v53 }
 0x2be   :  { %5393 = vst [vmem:[#allocation124_spill] sm:$0xff] %v4194_v2  ;;  %v4201_v56 = vpop.eup %2733  ;;  %2747 = vpow2.f32 %v1905_v31  ;;  %v1772_v31 = vsub.f32 %v1669_v42, %v4022_v43  ;;  %2478 = vmatprep.subr.bf16.mxu0 %v2556_v28  ;;  %2521 = vmatprep.subr.bf16.mxu1 %v2556_v28 }
 0x2bf   :  { %5394 = vst [vmem:[#allocation125_spill] sm:$0xff] %v4201_v56  ;;  %v4211_v35 = vpop.eup %2735  ;;  %2749 = vpow2.f32 %v1903_v48  ;;  %v2557_v48 = vld [vmem:[%s5145_s4 + $0x8] sm:$0xff]  }
 0x2c0   :  { %1444 = vadd.xlane.f32.xlu1 %v4172_v49  ;;  %v1317_v49 = vmul.f32 %v3731_v51, %v1285_v41  ;;  %v1254_v41 = vsub.f32 %v4145_v30, %v3979_v53  ;;  %v1332_v30 = vmul.f32 %v3731_v51, %v1300_v45  ;;  %v1390_v45 = vmul.f32 1.442695, %v1333_v61  ;;  %2479 = vmatpush3.bf16.msra.mxu0 %v2556_v28 }
 0x2c1   :  { %v4181_v46 = vpop.permute.xlu1 %1664  ;;  %1418 = vadd.xlane.f32.xlu0 %v4178_v39  ;;  %2529 = vmatpush3.bf16.msra.mxu1 %v2556_v28  ;;  %v1302_v61 = vmul.f32 %v1270_v37, %v1270_v37  ;;  %v2558_v37 = vld [vmem:[%s5145_s4] sm:$0xff]   ;;  %s4523_s4 = sld [smem:[#allocation2 + $0x1]] }
 0x2c2   :  { %v1358_v39 = vmul.f32 1.442695, %v1317_v49  ;;  %v1286_v62 = vmul.f32 %v1254_v41, %v1254_v41  ;;  %v4220_v49 = vpop.eup %2737  ;;  %v1388_v60 = vmul.f32 1.442695, %v1332_v30  ;;  %2480 = vmatprep.subr.bf16.mxu0 %v2557_v48  ;;  %2522 = vmatprep.subr.bf16.mxu1 %v2557_v48 }
 0x2c3   :  { %5395 = vst [vmem:[#allocation126_spill] sm:$0xff] %v4220_v49  ;;  %v4225_v27 = vpop.eup %2739 }
 0x2c4   :  { %1416 = vadd.xlane.f32.xlu1 %v4188_v33  ;;  %2751 = vpow2.f32 %v1358_v39  ;;  %5396 = vst [vmem:[#allocation127_spill] sm:$0xff] %v4225_v27  ;;  %v1318_v41 = vmul.f32 %v3731_v51, %v1286_v62  ;;  %v4234_v39 = vpop.eup %2741  ;;  %2481 = vmatpush3.bf16.msra.mxu0 %v2557_v48  ;;  %v1673_v62 = vpop.permute.xlu0 %1672 }
 0x2c5   :  { %v4196_v20 = vpop.permute.xlu1 %1728  ;;  %1450 = vadd.xlane.f32.xlu0 %v4194_v2  ;;  %v1303_v2 = vmul.f32 %v1271_v50, %v1271_v50  ;;  %2753 = vpow2.f32 %v1356_v44  ;;  %5397 = vst [vmem:[#allocation128_spill] sm:$0xff] %v4234_v39  ;;  %v1804_v50 = vmul.f32 %v1772_v31, %v1772_v31  ;;  %v4239_v44 = vpop.eup %2743  ;;  %2530 = vmatpush3.bf16.msra.mxu1 %v2557_v48 }
 0x2c6   :  { %2755 = vpow2.f32 %v1390_v45  ;;  %5398 = vst [vmem:[#allocation129_spill] sm:$0xff] %v4239_v44  ;;  %v1360_v31 = vmul.f32 1.442695, %v1318_v41  ;;  %2482 = vmatprep.subr.bf16.mxu0 %v2558_v37  ;;  %2523 = vmatprep.subr.bf16.mxu1 %v2558_v37 }
 0x2c7   :  { %v1335_v30 = vmul.f32 %v3731_v51, %v1303_v2  ;;  %2757 = vpow2.f32 %v1388_v60  ;;  %v1787_v2 = vsub.f32 %v4196_v20, %v4022_v43  ;;  %v4253_v60 = vld [vmem:[%s5143_s2] ss:$0 sm:$0xff]  ;;  %s494_s2 = sld [smem:[#allocation2]] }
 0x2c8   :  { %1448 = vadd.xlane.f32.xlu1 %v4201_v56  ;;  %v1319_v56 = vmul.f32 %v3731_v51, %v1287_v58  ;;  %v1771_v58 = vsub.f32 %v4181_v46, %v4022_v43  ;;  %2483 = vmatpush3.bf16.msra.mxu0 %v2558_v37 }
 0x2c9   :  { %v1733_v34 = vpop.permute.xlu1 %1732  ;;  %1933 = vadd.xlane.f32.xlu0 %v4211_v35  ;;  %v1394_v48 = vmul.f32 1.442695, %v1335_v30  ;;  %2531 = vmatpush3.bf16.msra.mxu1 %v2558_v37 }
 0x2ca   :  { %v1362_v42 = vmul.f32 1.442695, %v1319_v56  ;;  %v1788_v28 = vsub.f32 %v1733_v34, %v4022_v43  ;;  %v1334_v56 = vmul.f32 %v3731_v51, %v1302_v61  ;;  %v1803_v45 = vmul.f32 %v1771_v58, %v1771_v58  ;;  %v4248_v34 = vpop.eup %2745 }
 0x2cb   :  { %5399 = vst [vmem:[#allocation130_spill] sm:$0xff] %v4248_v34  ;;  %v4258_v20 = vpop.eup %2747  ;;  %v1773_v61 = vsub.f32 %v1673_v62, %v4022_v43 }
 0x2cc   :  { %1931 = vadd.xlane.f32.xlu1 %v4220_v49  ;;  %2759 = vpow2.f32 %v1362_v42  ;;  %v1820_v51 = vmul.f32 %v1788_v28, %v1788_v28  ;;  %5400 = vst [vmem:[#allocation131_spill] sm:$0xff] %v4258_v20  ;;  %v1392_v58 = vmul.f32 1.442695, %v1334_v56  ;;  %v4263_v30 = vpop.eup %2749 }
 0x2cd   :  { %v1677_v38 = vpop.permute.xlu1 %1676  ;;  %1965 = vadd.xlane.f32.xlu0 %v4225_v27  ;;  %2761 = vpow2.f32 %v1360_v31  ;;  %5401 = vst [vmem:[#allocation132_spill] sm:$0xff] %v4263_v30  ;;  %v1805_v37 = vmul.f32 %v1773_v61, %v1773_v61 }
 0x2ce   :  { %v1774_v41 = vsub.f32 %v1677_v38, %v4022_v43  ;;  %v1737_v38 = vpop.permute.xlu0 %1736  ;;  %2763 = vpow2.f32 %v1394_v48 }
 0x2cf   :  { %v1789_v31 = vsub.f32 %v1737_v38, %v4022_v43  ;;  %2765 = vpow2.f32 %v1392_v58 }
 0x2d0   :  { %1963 = vadd.xlane.f32.xlu1 %v4234_v39  ;;  %v1836_v39 = vmul.f32 %v4253_v60, %v1804_v50  ;;  %v1819_v50 = vmul.f32 %v1787_v2, %v1787_v2  ;;  %v1806_v27 = vmul.f32 %v1774_v41, %v1774_v41 }
 0x2d1   :  { %v1741_v46 = vpop.permute.xlu1 %1740  ;;  %1937 = vadd.xlane.f32.xlu0 %v4239_v44  ;;  %v1835_v44 = vmul.f32 %v4253_v60, %v1803_v45  ;;  %v4268_v62 = vpop.eup %2751  ;;  %v1821_v38 = vmul.f32 %v1789_v31, %v1789_v31 }
 0x2d2   :  { %v1877_v28 = vmul.f32 1.442695, %v1836_v39  ;;  %v1790_v33 = vsub.f32 %v1741_v46, %v4022_v43  ;;  %5402 = vst [vmem:[#allocation133_spill] sm:$0xff] %v4268_v62  ;;  %v1851_v45 = vmul.f32 %v4253_v60, %v1819_v50  ;;  %v4273_v2 = vpop.eup %2753  ;;  %v1838_v46 = vmul.f32 %v4253_v60, %v1806_v27 }
 0x2d3   :  { %v1875_v56 = vmul.f32 1.442695, %v1835_v44  ;;  %5403 = vst [vmem:[#allocation134_spill] sm:$0xff] %v4273_v2  ;;  %v4278_v61 = vpop.eup %2755  ;;  %v1256_v44 = vsub.f32 %v4029_v55, %v3979_v53  ;;  %v1837_v50 = vmul.f32 %v4253_v60, %v1805_v37 }
 0x2d4   :  { %1935 = vadd.xlane.f32.xlu1 %v4248_v34  ;;  %v1852_v34 = vmul.f32 %v4253_v60, %v1820_v51  ;;  %2767 = vpow2.f32 %v1877_v28  ;;  %v1822_v51 = vmul.f32 %v1790_v33, %v1790_v33  ;;  %5404 = vst [vmem:[#allocation135_spill] sm:$0xff] %v4278_v61  ;;  %v4282_v58 = vpop.eup %2757  ;;  %v1907_v28 = vmul.f32 1.442695, %v1851_v45 }
 0x2d5   :  { %1969 = vadd.xlane.f32.xlu0 %v4258_v20  ;;  %5405 = vst [vmem:[#allocation136_spill] sm:$0xff] %v4282_v58  ;;  %2769 = vpow2.f32 %v1875_v56  ;;  %v1273_v33 = vsub.f32 %v4033_v57, %v3979_v53  ;;  %v1288_v31 = vmul.f32 %v1256_v44, %v1256_v44  ;;  %v1879_v56 = vmul.f32 1.442695, %v1837_v50  ;;  %v5502_v20 = vld [vmem:[#allocation61_spill] sm:$0xff] }
 0x2d6   :  { %v1166_v42 = vpop.permute.xlu1 %1165  ;;  %v1909_v48 = vmul.f32 1.442695, %v1852_v34  ;;  %v1881_v34 = vmul.f32 1.442695, %v1838_v46  ;;  %v1853_v45 = vmul.f32 %v4253_v60, %v1821_v38  ;;  %v1259_v46 = vsub.f32 %v4040_v52, %v3979_v53 }
 0x2d7   :  { %v1257_v41 = vsub.f32 %v1166_v42, %v3979_v53  ;;  %v1854_v42 = vmul.f32 %v4253_v60, %v1822_v51  ;;  %v1320_v50 = vmul.f32 %v4253_v60, %v1288_v31  ;;  %v1275_v52 = vsub.f32 %v4046_v59, %v3979_v53  ;;  %v1685_v31 = vpop.permute.xlu0 %1684 }
 0x2d8   :  { %1967 = vadd.xlane.f32.xlu1 %v4263_v30  ;;  %2771 = vpow2.f32 %v1909_v48  ;;  %v1305_v48 = vmul.f32 %v1273_v33, %v1273_v33  ;;  %v1911_v38 = vmul.f32 1.442695, %v1853_v45 }
 0x2d9   :  { %1422 = vadd.xlane.f32.xlu0 %v4268_v62  ;;  %v1289_v62 = vmul.f32 %v1257_v41, %v1257_v41  ;;  %v4290_v55 = vpop.eup %2759  ;;  %2773 = vpow2.f32 %v1907_v28  ;;  %v1913_v51 = vmul.f32 1.442695, %v1854_v42 }
 0x2da   :  { %v1226_v39 = vpop.permute.xlu1 %1225  ;;  %5406 = vst [vmem:[#allocation137_spill] sm:$0xff] %v4290_v55  ;;  %v4295_v57 = vpop.eup %2761  ;;  %2775 = vpow2.f32 %v1881_v34  ;;  %v1337_v42 = vmul.f32 %v4253_v60, %v1305_v48 }
 0x2db   :  { %v1272_v37 = vsub.f32 %v1226_v39, %v3979_v53  ;;  %5407 = vst [vmem:[#allocation138_spill] sm:$0xff] %v4295_v57  ;;  %v1321_v41 = vmul.f32 %v4253_v60, %v1289_v62  ;;  %v4301_v39 = vpop.eup %2763  ;;  %2777 = vpow2.f32 %v1879_v56  ;;  %v1364_v56 = vmul.f32 1.442695, %v1320_v50 }
 0x2dc   :  { %1420 = vadd.xlane.f32.xlu1 %v4273_v2  ;;  %5408 = vst [vmem:[#allocation139_spill] sm:$0xff] %v4301_v39  ;;  %v4306_v33 = vpop.eup %2765  ;;  %2779 = vpow2.f32 %v1913_v51  ;;  %v1398_v48 = vmul.f32 1.442695, %v1337_v42  ;;  %v1776_v51 = vsub.f32 %v1685_v31, %v4022_v43 }
 0x2dd   :  { %1454 = vadd.xlane.f32.xlu0 %v4278_v61  ;;  %v1304_v44 = vmul.f32 %v1272_v37, %v1272_v37  ;;  %5409 = vst [vmem:[#allocation140_spill] sm:$0xff] %v4306_v33  ;;  %v1366_v37 = vmul.f32 1.442695, %v1321_v41  ;;  %2781 = vpow2.f32 %v1911_v38 }
 0x2de   :  { %v1170_v27 = vpop.permute.xlu1 %1169  ;;  %v1808_v42 = vmul.f32 %v1776_v51, %v1776_v51 }
 0x2df   :  { %v1258_v28 = vsub.f32 %v1170_v27, %v3979_v53  ;;  %v1336_v27 = vmul.f32 %v4253_v60, %v1304_v44  ;;  %2783 = vpow2.f32 %v1366_v37 }
 0x2e0   :  { %1452 = vadd.xlane.f32.xlu1 %v4282_v58  ;;  %2785 = vpow2.f32 %v1364_v56  ;;  %v1840_v51 = vmul.f32 %v4253_v60, %v1808_v42  ;;  %v463_v42 = vadd.f32 1e-09, %v3550_v1 }
 0x2e1   :  { %1426 = vadd.xlane.f32.xlu0 %v4290_v55  ;;  %v4310_v62 = vpop.eup %2767  ;;  %v1290_v45 = vmul.f32 %v1258_v28, %v1258_v28  ;;  %v1307_v55 = vmul.f32 %v1275_v52, %v1275_v52  ;;  %v1396_v44 = vmul.f32 1.442695, %v1336_v27  ;;  %2787 = vpow2.f32 %v1398_v48  ;;  %v1689_v27 = vpop.permute.xlu0 %1688 }
 0x2e2   :  { %v1234_v61 = vpop.permute.xlu1 %1233  ;;  %5410 = vst [vmem:[#allocation141_spill] sm:$0xff] %v4310_v62  ;;  %v4317_v59 = vpop.eup %2769 }
 0x2e3   :  { %5411 = vst [vmem:[#allocation142_spill] sm:$0xff] %v4317_v59  ;;  %2789 = vpow2.f32 %v1396_v44 }
 0x2e4   :  { %1424 = vadd.xlane.f32.xlu1 %v4295_v57  ;;  %v1291_v57 = vmul.f32 %v1259_v46, %v1259_v46 }
 0x2e5   :  { %1458 = vadd.xlane.f32.xlu0 %v4301_v39  ;;  %v1274_v39 = vsub.f32 %v1234_v61, %v3979_v53  ;;  %v4322_v41 = vpop.eup %2771  ;;  %v1322_v53 = vmul.f32 %v4253_v60, %v1290_v45 }
 0x2e6   :  { %v1323_v46 = vmul.f32 %v4253_v60, %v1291_v57  ;;  %5412 = vst [vmem:[#allocation143_spill] sm:$0xff] %v4322_v41  ;;  %v4327_v38 = vpop.eup %2773  ;;  %v1339_v57 = vmul.f32 %v4253_v60, %v1307_v55 }
 0x2e7   :  { %v1681_v34 = vpop.permute.xlu1 %1680  ;;  %v1306_v61 = vmul.f32 %v1274_v39, %v1274_v39  ;;  %5413 = vst [vmem:[#allocation144_spill] sm:$0xff] %v4327_v38  ;;  %v4332_v31 = vpop.eup %2775  ;;  %v1368_v39 = vmul.f32 1.442695, %v1322_v53  ;;  %v462_v53 = vadd.f32 1e-09, %v3547_v0 }
 0x2e8   :  { %1456 = vadd.xlane.f32.xlu1 %v4306_v33  ;;  %v1775_v50 = vsub.f32 %v1681_v34, %v4022_v43  ;;  %v1370_v52 = vmul.f32 1.442695, %v1323_v46  ;;  %5414 = vst [vmem:[#allocation145_spill] sm:$0xff] %v4332_v31  ;;  %v4337_v55 = vpop.eup %2777  ;;  %v1402_v48 = vmul.f32 1.442695, %v1339_v57 }
 0x2e9   :  { %1941 = vadd.xlane.f32.xlu0 %v4310_v62  ;;  %v1338_v34 = vmul.f32 %v4253_v60, %v1306_v61  ;;  %5415 = vst [vmem:[#allocation146_spill] sm:$0xff] %v4337_v55  ;;  %v4342_v44 = vpop.eup %2779 }
 0x2ea   :  { %v1807_v56 = vmul.f32 %v1775_v50, %v1775_v50  ;;  %2791 = vpow2.f32 %v1370_v52  ;;  %5416 = vst [vmem:[#allocation147_spill] sm:$0xff] %v4342_v44  ;;  %v4348_v52 = vpop.eup %2781 }
 0x2eb   :  { %v1745_v58 = vpop.permute.xlu1 %1744  ;;  %2793 = vpow2.f32 %v1368_v39  ;;  %v1400_v61 = vmul.f32 1.442695, %v1338_v34  ;;  %5417 = vst [vmem:[#allocation148_spill] sm:$0xff] %v4348_v52  ;;  %v464_v34 = vadd.f32 1e-09, %v3552_v3 }
 0x2ec   :  { %1939 = vadd.xlane.f32.xlu1 %v4317_v59  ;;  %v1791_v45 = vsub.f32 %v1745_v58, %v4022_v43  ;;  %v1777_v58 = vsub.f32 %v1689_v27, %v4022_v43  ;;  %v1839_v50 = vmul.f32 %v4253_v60, %v1807_v56  ;;  %2795 = vpow2.f32 %v1402_v48  ;;  %v4354_v39 = vpop.eup %2783 }
 0x2ed   :  { %1973 = vadd.xlane.f32.xlu0 %v4322_v41  ;;  %5418 = vst [vmem:[#allocation149_spill] sm:$0xff] %v4354_v39  ;;  %2797 = vrcp.f32 %v462_v53 }
 0x2ee   :  { %v1823_v57 = vmul.f32 %v1791_v45, %v1791_v45  ;;  %v1809_v56 = vmul.f32 %v1777_v58, %v1777_v58  ;;  %2799 = vpow2.f32 %v1400_v61  ;;  %v1883_v1 = vmul.f32 1.442695, %v1839_v50 }
 0x2ef   :  { %v1749_v28 = vpop.permute.xlu1 %1748  ;;  %2801 = vrcp.f32 %v463_v42 }
 0x2f0   :  { %v1792_v37 = vsub.f32 %v1749_v28, %v4022_v43  ;;  %1971 = vadd.xlane.f32.xlu1 %v4327_v38  ;;  %v1855_v48 = vmul.f32 %v4253_v60, %v1823_v57  ;;  %v1841_v61 = vmul.f32 %v4253_v60, %v1809_v56 }
 0x2f1   :  { %1945 = vadd.xlane.f32.xlu0 %v4332_v31 }
 0x2f2   :  { %v1824_v28 = vmul.f32 %v1792_v37, %v1792_v37  ;;  %v1753_v37 = vpop.permute.xlu0 %1752  ;;  %v1915_v57 = vmul.f32 1.442695, %v1855_v48 }
 0x2f3   :  { %v1693_v46 = vpop.permute.xlu1 %1692  ;;  %v1793_v45 = vsub.f32 %v1753_v37, %v4022_v43  ;;  %v1887_v37 = vmul.f32 1.442695, %v1841_v61  ;;  %v475_v61 = vadd.f32 1e-09, %v3579_v15 }
 0x2f4   :  { %v1778_v33 = vsub.f32 %v1693_v46, %v4022_v43  ;;  %1943 = vadd.xlane.f32.xlu1 %v4337_v55  ;;  %v1885_v55 = vmul.f32 1.442695, %v1840_v51  ;;  %v1856_v31 = vmul.f32 %v4253_v60, %v1824_v28  ;;  %v4360_v51 = vpop.eup %2785 }
 0x2f5   :  { %1977 = vadd.xlane.f32.xlu0 %v4342_v44  ;;  %5419 = vst [vmem:[#allocation150_spill] sm:$0xff] %v4360_v51  ;;  %v4365_v3 = vpop.eup %2787  ;;  %v1825_v50 = vmul.f32 %v1793_v45, %v1793_v45 }
 0x2f6   :  { %v1810_v0 = vmul.f32 %v1778_v33, %v1778_v33  ;;  %v466_v33 = vadd.f32 1e-09, %v3555_v4  ;;  %2803 = vpow2.f32 %v1885_v55  ;;  %v1917_v28 = vmul.f32 1.442695, %v1856_v31  ;;  %5420 = vst [vmem:[#allocation151_spill] sm:$0xff] %v4365_v3  ;;  %v4368_v58 = vpop.eup %2789 }
 0x2f7   :  { %v1757_v46 = vpop.permute.xlu1 %1756  ;;  %2805 = vrcp.f32 %v464_v34  ;;  %5421 = vst [vmem:[#allocation152_spill] sm:$0xff] %v4368_v58  ;;  %v468_v4 = vadd.f32 1e-09, %v3560_v6  ;;  %v4375_v42 = vpop.eup %2791  ;;  %v470_v6 = vadd.f32 1e-09, %v3565_v8 }
 0x2f8   :  { %v1794_v27 = vsub.f32 %v1757_v46, %v4022_v43  ;;  %1975 = vadd.xlane.f32.xlu1 %v4348_v52  ;;  %v1842_v53 = vmul.f32 %v4253_v60, %v1810_v0  ;;  %v465_v43 = vadd.f32 1e-09, %v3557_v5  ;;  %2807 = vpow2.f32 %v1883_v1  ;;  %5422 = vst [vmem:[#allocation153_spill] sm:$0xff] %v4375_v42 }
 0x2f9   :  { %1430 = vadd.xlane.f32.xlu0 %v4354_v39  ;;  %2809 = vrcp.f32 %v466_v33  ;;  %v467_v5 = vadd.f32 1e-09, %v3562_v7  ;;  %v1857_v0 = vmul.f32 %v4253_v60, %v1825_v50  ;;  %v469_v7 = vadd.f32 1e-09, %v3567_v9 }
 0x2fa   :  { %v1826_v46 = vmul.f32 %v1794_v27, %v1794_v27  ;;  %2811 = vpow2.f32 %v1917_v28  ;;  %v1889_v31 = vmul.f32 1.442695, %v1842_v53  ;;  %v4380_v27 = vpop.eup %2793  ;;  %v472_v8 = vadd.f32 1e-09, %v3569_v10 }
 0x2fb   :  { %2813 = vrcp.f32 %v465_v43  ;;  %5423 = vst [vmem:[#allocation154_spill] sm:$0xff] %v4380_v27  ;;  %v4383_v34 = vpop.eup %2795  ;;  %v471_v33 = vadd.f32 1e-09, %v3571_v11  ;;  %v474_v9 = vadd.f32 1e-09, %v3573_v12 }
 0x2fc   :  { %1428 = vadd.xlane.f32.xlu1 %v4360_v51  ;;  %v1858_v55 = vmul.f32 %v4253_v60, %v1826_v46  ;;  %2815 = vpow2.f32 %v1915_v57  ;;  %5424 = vst [vmem:[#allocation155_spill] sm:$0xff] %v4383_v34  ;;  %v4387_v45 = vpop.eup %2797  ;;  %v1919_v60 = vmul.f32 1.442695, %v1857_v0  ;;  %v473_v46 = vadd.f32 1e-09, %v3575_v13 }
 0x2fd   :  { %1462 = vadd.xlane.f32.xlu0 %v4365_v3  ;;  %2817 = vrcp.f32 %v468_v4  ;;  %v4390_v1 = vpop.eup %2799  ;;  %v476_v11 = vadd.f32 1e-09, %v3577_v14  ;;  %v478_v13 = vadd.f32 1e-09, %v3581_v16  ;;  %v477_v57 = vadd.f32 1e-09, %v3583_v17  ;;  %v4428_v17 = vpop.xlane.xlu0 %1404 }
 0x2fe   :  { %2819 = vpow2.f32 %v1889_v31  ;;  %v1921_v56 = vmul.f32 1.442695, %v1858_v55  ;;  %5425 = vst [vmem:[#allocation156_spill] sm:$0xff] %v4390_v1  ;;  %v4393_v48 = vpop.eup %2801  ;;  %v480_v4 = vadd.f32 1e-09, %v3585_v18 }
 0x2ff   :  { %2821 = vrcp.f32 %v467_v5  ;;  %v479_v31 = vadd.f32 1e-09, %v3587_v19  ;;  %v482_v55 = vadd.f32 1e-09, %v3591_v21  ;;  %v484_v19 = vadd.f32 1e-09, %v3595_v23 }
 0x300   :  { %1460 = vadd.xlane.f32.xlu1 %v4368_v58  ;;  %2823 = vpow2.f32 %v1887_v37  ;;  %v481_v37 = vadd.f32 1e-09, %v3593_v22 }
 0x301   :  { %1434 = vadd.xlane.f32.xlu0 %v4375_v42  ;;  %2825 = vrcp.f32 %v470_v6  ;;  %v483_v6 = vadd.f32 1e-09, %v3597_v24  ;;  %v5434_v24 = vld [vmem:[#allocation37_spill] sm:$0xff] }
 0x302   :  { %2827 = vpow2.f32 %v1921_v56  ;;  %v486_v56 = vadd.f32 1e-09, %v3599_v25 }
 0x303   :  { %v4397_v28 = vpop.eup %2803  ;;  %2829 = vrcp.f32 %v469_v7 }
 0x304   :  { %1432 = vadd.xlane.f32.xlu1 %v4380_v27  ;;  %5426 = vst [vmem:[#allocation157_spill] sm:$0xff] %v4397_v28  ;;  %v4400_v53 = vpop.eup %2805  ;;  %2831 = vpow2.f32 %v1919_v60  ;;  %v485_v60 = vadd.f32 1e-09, %v3601_v26 }
 0x305   :  { %1466 = vadd.xlane.f32.xlu0 %v4383_v34  ;;  %v4404_v10 = vpop.eup %2807  ;;  %2833 = vrcp.f32 %v472_v8  ;;  %v488_v8 = vadd.f32 1e-09, %v5434_v24 }
 0x306   :  { %5427 = vst [vmem:[#allocation158_spill] sm:$0xff] %v4404_v10  ;;  %v4407_v43 = vpop.eup %2809  ;;  %2835 = vrcp.f32 %v471_v33 }
 0x307   :  { %v4411_v12 = vpop.eup %2811  ;;  %2837 = vrcp.f32 %v474_v9  ;;  %v5435_v9 = vld [vmem:[#allocation38_spill] sm:$0xff] }
 0x308   :  { %1464 = vadd.xlane.f32.xlu1 %v4390_v1  ;;  %5428 = vst [vmem:[#allocation159_spill] sm:$0xff] %v4411_v12  ;;  %v4414_v50 = vpop.eup %2813  ;;  %2839 = vrcp.f32 %v473_v46  ;;  %v487_v46 = vadd.f32 1e-09, %v5435_v9  ;;  %v5443_v9 = vld [vmem:[#allocation43_spill] sm:$0xff] }
 0x309   :  { %1949 = vadd.xlane.f32.xlu0 %v4397_v28  ;;  %v4418_v14 = vpop.eup %2815  ;;  %2841 = vrcp.f32 %v476_v11  ;;  %v5436_v11 = vld [vmem:[#allocation39_spill] sm:$0xff] }
 0x30a   :  { %5429 = vst [vmem:[#allocation160_spill] sm:$0xff] %v4418_v14  ;;  %v4421_v15 = vpop.eup %2817  ;;  %2843 = vrcp.f32 %v475_v61  ;;  %v490_v61 = vadd.f32 1e-09, %v5436_v11  ;;  %v493_v11 = vadd.f32 1e-09, %v5443_v9 }
 0x30b   :  { %v4425_v16 = vpop.eup %2819  ;;  %2845 = vrcp.f32 %v478_v13  ;;  %v5438_v13 = vld [vmem:[#allocation40_spill] sm:$0xff] }
 0x30c   :  { %1947 = vadd.xlane.f32.xlu1 %v4404_v10  ;;  %5430 = vst [vmem:[#allocation161_spill] sm:$0xff] %v4425_v16  ;;  %v4430_v5 = vpop.eup %2821  ;;  %2847 = vrcp.f32 %v477_v57  ;;  %v489_v57 = vadd.f32 1e-09, %v5438_v13  ;;  %v5444_v13 = vld [vmem:[#allocation76_spill] sm:$0xff] }
 0x30d   :  { %1981 = vadd.xlane.f32.xlu0 %v4411_v12  ;;  %v4434_v18 = vpop.eup %2823  ;;  %2849 = vrcp.f32 %v480_v4  ;;  %v4498_v12 = vstv %s494_s2 }
 0x30e   :  { %5431 = vst [vmem:[#allocation162_spill] sm:$0xff] %v4434_v18  ;;  %v4437_v0 = vpop.eup %2825  ;;  %2851 = vrcp.f32 %v479_v31  ;;  %v5439_v31 = vld [vmem:[#allocation41_spill] sm:$0xff] }
 0x30f   :  { %v4441_v21 = vpop.eup %2827  ;;  %2853 = vrcp.f32 %v482_v55  ;;  %v492_v55 = vadd.f32 1e-09, %v5439_v31  ;;  %v5446_v31 = vld [vmem:[#allocation77_spill] sm:$0xff] }
 0x310   :  { %1979 = vadd.xlane.f32.xlu1 %v4418_v14  ;;  %5432 = vst [vmem:[#allocation163_spill] sm:$0xff] %v4441_v21  ;;  %v4446_v7 = vpop.eup %2829  ;;  %2855 = vrcp.f32 %v481_v37 }
 0x311   :  { %1953 = vadd.xlane.f32.xlu0 %v4425_v16  ;;  %v4444_v22 = vpop.xlane.xlu0 %1436  ;;  %v4450_v23 = vpop.eup %2831  ;;  %2857 = vrcp.f32 %v484_v19 }
 0x312   :  { %5433 = vst [vmem:[#allocation164_spill] sm:$0xff] %v4450_v23  ;;  %v4453_v33 = vpop.eup %2833  ;;  %2859 = vrcp.f32 %v483_v6  ;;  %v5441_v6 = vld [vmem:[#allocation42_spill] sm:$0xff] }
 0x313   :  { %v4457_v25 = vpop.eup %2835  ;;  %2861 = vrcp.f32 %v486_v56  ;;  %v491_v24 = vadd.f32 1e-09, %v5441_v6 }
 0x314   :  { %1951 = vadd.xlane.f32.xlu1 %v4434_v18  ;;  %v4460_v26 = vpop.eup %2837  ;;  %2863 = vrcp.f32 %v485_v60 }
 0x315   :  { %1985 = vadd.xlane.f32.xlu0 %v4441_v21  ;;  %5437 = vst [vmem:[#allocation37_spill] sm:$0xff] %v4460_v26  ;;  %v4463_v4 = vpop.eup %2839  ;;  %2865 = vrcp.f32 %v488_v8  ;;  %v4466_v37 = vpop.xlane.xlu0 %1438  ;;  %v949_v8 = vadd.f32 1e-09, %v5444_v13  ;;  %v951_v21 = vadd.f32 1e-09, %v5446_v31  ;;  %v5473_v26 = vld [vmem:[#allocation11_spill] sm:$0xff] }
 0x316   :  { %v4468_v19 = vpop.eup %2841  ;;  %2867 = vrcp.f32 %v487_v46  ;;  %v5447_v46 = vld [vmem:[#allocation79_spill] sm:$0xff] }
 0x317   :  { %5440 = vst [vmem:[#allocation38_spill] sm:$0xff] %v4468_v19  ;;  %v4471_v56 = vpop.eup %2843  ;;  %2869 = vrcp.f32 %v490_v61  ;;  %v952_v6 = vadd.f32 1e-09, %v5447_v46  ;;  %v5448_v61 = vld [vmem:[#allocation78_spill] sm:$0xff] }
 0x318   :  { %1983 = vadd.xlane.f32.xlu1 %v4450_v23  ;;  %5442 = vst [vmem:[#allocation39_spill] sm:$0xff] %v4471_v56  ;;  %v4474_v60 = vpop.eup %2845  ;;  %2871 = vrcp.f32 %v489_v57  ;;  %v950_v9 = vadd.f32 1e-09, %v5448_v61  ;;  %v5449_v57 = vld [vmem:[#allocation80_spill] sm:$0xff]  ;;  %v5466_v56 = vld [vmem:[#allocation7_spill] sm:$0xff] }
 0x319   :  { %v4477_v23 = vpop.eup %2847  ;;  %2873 = vrcp.f32 %v492_v55  ;;  %v1411_v34 = vpop.xlane.xlu0 %1410  ;;  %v953_v13 = vadd.f32 1e-09, %v5449_v57  ;;  %v5450_v55 = vld [vmem:[#allocation81_spill] sm:$0xff]  ;;  %v5454_v57 = vld [vmem:[#allocation84_spill] sm:$0xff] }
 0x31a   :  { %5445 = vst [vmem:[#allocation40_spill] sm:$0xff] %v4477_v23  ;;  %v4480_v1 = vpop.eup %2849  ;;  %2875 = vrcp.f32 %v491_v24  ;;  %v954_v31 = vadd.f32 1e-09, %v5450_v55  ;;  %v5451_v24 = vld [vmem:[#allocation82_spill] sm:$0xff]  ;;  %v957_v10 = vadd.f32 1e-09, %v5454_v57 }
 0x31b   :  { %v4483_v18 = vpop.eup %2851  ;;  %2877 = vrcp.f32 %v493_v11  ;;  %v955_v46 = vadd.f32 1e-09, %v5451_v24  ;;  %v5452_v11 = vld [vmem:[#allocation83_spill] sm:$0xff]  ;;  %v5455_v55 = vld [vmem:[#allocation85_spill] sm:$0xff] }
 0x31c   :  { %v4486_v16 = vpop.eup %2853  ;;  %2879 = vrcp.f32 %v949_v8  ;;  %v956_v61 = vadd.f32 1e-09, %v5452_v11  ;;  %v959_v58 = vadd.f32 1e-09, %v5455_v55  ;;  %v528_v11 = vmul.f32 %v4387_v45, %v4498_v12 }
 0x31d   :  { %v4489_v14 = vpop.eup %2855  ;;  %2881 = vrcp.f32 %v951_v21  ;;  %v530_v45 = vmul.f32 %v4400_v53, %v4498_v12 }
 0x31e   :  { %v4492_v42 = vpop.eup %2857  ;;  %2883 = vrcp.f32 %v952_v6  ;;  %v4506_v6 = vpop.xlane.xlu0 %1442 }
 0x31f   :  { %v4495_v27 = vpop.eup %2859  ;;  %2885 = vrcp.f32 %v950_v9  ;;  %v5457_v9 = vld [vmem:[#allocation91_spill] sm:$0xff] }
 0x320   :  { %v4500_v8 = vpop.eup %2861  ;;  %2887 = vrcp.f32 %v953_v13  ;;  %v965_v28 = vadd.f32 1e-09, %v5457_v9  ;;  %v5459_v13 = vld [vmem:[#allocation93_spill] sm:$0xff]  ;;  %v5463_v9 = vld [vmem:[#allocation94_spill] sm:$0xff] }
 0x321   :  { %5453 = vst [vmem:[#allocation41_spill] sm:$0xff] %v4500_v8  ;;  %v4503_v21 = vpop.eup %2863  ;;  %2889 = vrcp.f32 %v954_v31  ;;  %v967_v57 = vadd.f32 1e-09, %v5459_v13  ;;  %v529_v31 = vmul.f32 %v4393_v48, %v4498_v12  ;;  %v966_v13 = vadd.f32 1e-09, %v5463_v9  ;;  %v5464_v48 = vld [vmem:[#allocation5_spill] sm:$0xff] }
 0x322   :  { %v4508_v24 = vpop.eup %2865  ;;  %2891 = vrcp.f32 %v955_v46  ;;  %v1468_v46 = vadd.f32 1e-09, %v4428_v17  ;;  %v4531_v19 = vmul.f32 %v5464_v48, %v528_v11  ;;  %v1926_v17 = vpop.xlane.xlu0 %1925  ;;  %v1485_v11 = vadd.f32 1e-09, %v4466_v37  ;;  %v5469_v37 = vld [vmem:[#allocation9_spill] sm:$0xff] }
 0x323   :  { %5456 = vst [vmem:[#allocation42_spill] sm:$0xff] %v4508_v24  ;;  %v4513_v3 = vpop.eup %2867  ;;  %2893 = vrcp.f32 %v956_v61  ;;  %v4539_v53 = vmul.f32 %v5466_v56, %v529_v31  ;;  %v1471_v48 = vadd.f32 1e-09, %v1411_v34  ;;  %v5493_v24 = vld [vmem:[#allocation24_spill] sm:$0xff] }
 0x324   :  { %5458 = vst [vmem:[#allocation43_spill] sm:$0xff] %v4513_v3  ;;  %v4518_v55 = vpop.eup %2869  ;;  %2895 = vrcp.f32 %v957_v10 }
 0x325   :  { %5460 = vst [vmem:[#allocation76_spill] sm:$0xff] %v4518_v55  ;;  %v4520_v23 = vpop.eup %2871  ;;  %2897 = vrcp.f32 %v959_v58  ;;  %v1484_v58 = vadd.f32 1e-09, %v4444_v22 }
 0x326   :  { %5461 = vst [vmem:[#allocation77_spill] sm:$0xff] %v4520_v23  ;;  %v4527_v61 = vpop.eup %2873  ;;  %2899 = vrcp.f32 %v965_v28  ;;  %v531_v28 = vmul.f32 %v4414_v50, %v4498_v12  ;;  %v536_v50 = vmul.f32 %v4437_v0, %v4498_v12  ;;  %v538_v0 = vmul.f32 %v4453_v33, %v4498_v12 }
 0x327   :  { %5462 = vst [vmem:[#allocation79_spill] sm:$0xff] %v4527_v61  ;;  %v4535_v10 = vpop.eup %2875  ;;  %2901 = vrcp.f32 %v967_v57  ;;  %v534_v57 = vmul.f32 %v4421_v15, %v4498_v12  ;;  %v5468_v61 = vld [vmem:[#allocation6_spill] sm:$0xff] }
 0x328   :  { %5465 = vst [vmem:[#allocation78_spill] sm:$0xff] %v4535_v10  ;;  %v4543_v9 = vpop.eup %2877  ;;  %v4551_v56 = vmul.f32 %v5468_v61, %v530_v45  ;;  %v5470_v10 = vld [vmem:[#allocation8_spill] sm:$0xff] }
 0x329   :  { %v1407_v39 = vpop.xlane.xlu1 %1406  ;;  %5467 = vst [vmem:[#allocation80_spill] sm:$0xff] %v4543_v9  ;;  %v2880_v22 = vpop.eup %2879  ;;  %v1988_v9 = vadd.f32 1e-09, %v1926_v17  ;;  %v4561_v45 = vmul.f32 %v5470_v10, %v531_v28  ;;  %v4570_v52 = vmul.f32 %v5473_v26, %v534_v57  ;;  %v4576_v10 = vstv %s4523_s4  ;;  %v5475_v28 = vld [vmem:[#allocation13_spill] sm:$0xff]  ;;  %v5477_v26 = vld [vmem:[#allocation12_spill] sm:$0xff] }
 0x32a   :  { %v1469_v51 = vadd.f32 1e-09, %v1407_v39  ;;  %v532_v39 = vmul.f32 %v4407_v43, %v4498_v12  ;;  %v533_v43 = vmul.f32 %v4430_v5, %v4498_v12  ;;  %v2882_v31 = vpop.eup %2881  ;;  %v535_v5 = vmul.f32 %v4446_v7, %v4498_v12 }
 0x32b   :  { %v2884_v15 = vpop.eup %2883  ;;  %v4579_v44 = vmul.f32 %v5475_v28, %v536_v50  ;;  %v4592_v57 = vmul.f32 %v4457_v25, %v4498_v12  ;;  %v1487_v50 = vadd.f32 1e-09, %v4506_v6  ;;  %v1015_v28 = vmul.f32 %v2880_v22, %v4576_v10 }
 0x32c   :  { %2903 = vrcp.f32 %v1469_v51  ;;  %v4556_v51 = vmul.f32 %v5469_v37, %v532_v39  ;;  %v2886_v61 = vpop.eup %2885  ;;  %v5472_v39 = vld [vmem:[#allocation10_spill] sm:$0xff]  ;;  %v545_v25 = vmul.f32 %v4483_v18, %v4498_v12  ;;  %v1017_v38 = vmul.f32 %v2882_v31, %v4576_v10  ;;  %v5484_v18 = vld [vmem:[#allocation87_spill] sm:$0xff] }
 0x32d   :  { %v1409_v55 = vpop.xlane.xlu1 %1408  ;;  %2905 = vrcp.f32 %v1468_v46  ;;  %v4567_v37 = vmul.f32 %v5472_v39, %v533_v43  ;;  %v4572_v7 = vpop.eup %2887  ;;  %5476 = vst [vmem:[#allocation81_spill] sm:$0xff] %v4579_v44  ;;  %v4588_v43 = vmul.f32 %v5477_v26, %v535_v5  ;;  %5478 = vst [vmem:[#allocation82_spill] sm:$0xff] %v4592_v57  ;;  %v5479_v39 = vld [vmem:[#allocation15_spill] sm:$0xff]  ;;  %v961_v59 = vadd.f32 1e-09, %v5484_v18  ;;  %v5489_v44 = vld [vmem:[#allocation45_spill] sm:$0xff] }
 0x32e   :  { %2907 = vrcp.f32 %v966_v13  ;;  %v1470_v46 = vadd.f32 1e-09, %v1409_v55  ;;  %v5471_v13 = vld [vmem:[#allocation96_spill] sm:$0xff]  ;;  %v5474_v55 = vld [vmem:[#allocation86_spill] sm:$0xff]  ;;  %v4581_v33 = vpop.eup %2889  ;;  %v547_v31 = vmul.f32 %v4489_v14, %v4498_v12  ;;  %v1049_v23 = vmul.f32 %v5489_v44, %v1017_v38  ;;  %v5491_v57 = vld [vmem:[#allocation47_spill] sm:$0xff] }
 0x32f   :  { %2909 = vrcp.f32 %v1484_v58  ;;  %v968_v17 = vadd.f32 1e-09, %v5471_v13  ;;  %v958_v58 = vadd.f32 1e-09, %v5474_v55  ;;  %v4600_v55 = vmul.f32 %v5479_v39, %v538_v0  ;;  %v5490_v14 = vld [vmem:[#allocation46_spill] sm:$0xff] }
 0x330   :  { %2911 = vrcp.f32 %v1485_v11  ;;  %v544_v11 = vmul.f32 %v4474_v60, %v4498_v12  ;;  %v4642_v38 = vmul.f32 %v4486_v16, %v4498_v12 }
 0x331   :  { %v1441_v34 = vpop.xlane.xlu1 %1440  ;;  %2913 = vrcp.f32 %v1471_v48  ;;  %v4594_v48 = vpop.eup %2891  ;;  %5480 = vst [vmem:[#allocation83_spill] sm:$0xff] %v4600_v55 }
 0x332   :  { %2915 = vrcp.f32 %v1988_v9  ;;  %v546_v9 = vmul.f32 %v4480_v1, %v4498_v12  ;;  %v4602_v60 = vpop.eup %2893  ;;  %v1486_v6 = vadd.f32 1e-09, %v1441_v34  ;;  %v1018_v1 = vmul.f32 %v2884_v15, %v4576_v10  ;;  %v5485_v15 = vld [vmem:[#allocation23_spill] sm:$0xff] }
 0x333   :  { %2917 = vrcp.f32 %v1470_v46  ;;  %v4607_v26 = vpop.eup %2895 }
 0x334   :  { %2919 = vrcp.f32 %v968_v17  ;;  %5481 = vst [vmem:[#allocation84_spill] sm:$0xff] %v4607_v26  ;;  %v4611_v0 = vpop.eup %2897  ;;  %v1016_v17 = vmul.f32 %v2886_v61, %v4576_v10  ;;  %v4623_v34 = vmul.f32 %v5485_v15, %v546_v9  ;;  %v1050_v3 = vmul.f32 %v5490_v14, %v1018_v1 }
 0x335   :  { %v1924_v13 = vpop.xlane.xlu1 %1923  ;;  %2921 = vrcp.f32 %v958_v58  ;;  %5482 = vst [vmem:[#allocation85_spill] sm:$0xff] %v4611_v0  ;;  %v2900_v41 = vpop.eup %2899 }
 0x336   :  { %v1987_v5 = vadd.f32 1e-09, %v1924_v13  ;;  %v1958_v46 = vpop.xlane.xlu0 %1957  ;;  %v5483_v13 = vld [vmem:[#allocation21_spill] sm:$0xff] }
 0x337   :  { %v2004_v39 = vadd.f32 1e-09, %v1958_v46  ;;  %v4615_v22 = vmul.f32 %v5483_v13, %v544_v11  ;;  %v5486_v46 = vld [vmem:[#allocation44_spill] sm:$0xff]  ;;  %v5487_v13 = vld [vmem:[#allocation22_spill] sm:$0xff] }
 0x338   :  { %2923 = vrcp.f32 %v1987_v5  ;;  %v2902_v5 = vpop.eup %2901  ;;  %v1047_v11 = vmul.f32 %v5486_v46, %v1015_v28  ;;  %v4627_v62 = vmul.f32 %v5487_v13, %v545_v25  ;;  %v5492_v25 = vld [vmem:[#allocation97_spill] sm:$0xff] }
 0x339   :  { %2925 = vrcp.f32 %v1487_v50  ;;  %v1956_v58 = vpop.xlane.xlu1 %1955  ;;  %v2904_v18 = vpop.eup %2903  ;;  %v5488_v50 = vld [vmem:[#allocation95_spill] sm:$0xff]  ;;  %v971_v46 = vadd.f32 1e-09, %v5492_v25  ;;  %v4657_v25 = vstv %s4618_s24  ;;  %v1033_v0 = vmul.f32 %v2902_v5, %v4576_v10 }
 0x33a   :  { %2927 = vrcp.f32 %v2004_v39  ;;  %v2003_v61 = vadd.f32 1e-09, %v1956_v58  ;;  %v969_v2 = vadd.f32 1e-09, %v5488_v50  ;;  %v1930_v55 = vpop.xlane.xlu0 %1929  ;;  %v2906_v9 = vpop.eup %2905  ;;  %v1048_v39 = vmul.f32 %v5491_v57, %v1016_v17 }
 0x33b   :  { %2929 = vrcp.f32 %v1486_v6  ;;  %v1990_v15 = vadd.f32 1e-09, %v1930_v55  ;;  %v4634_v58 = vstv %s4583_s23  ;;  %v2908_v28 = vpop.eup %2907  ;;  %v4638_v50 = vmul.f32 %v5493_v24, %v547_v31 }
 0x33c   :  { %2931 = vrcp.f32 %v2003_v61  ;;  %v2910_v44 = vpop.eup %2909  ;;  %v1079_v55 = vadd.f32 %v1047_v11, %v4531_v19  ;;  %v1535_v57 = vmul.f32 %v2904_v18, %v4634_v58  ;;  %v1534_v17 = vmul.f32 %v2906_v9, %v4634_v58  ;;  %v5494_v18 = vld [vmem:[#allocation98_spill] sm:$0xff] }
 0x33d   :  { %2933 = vrcp.f32 %v961_v59  ;;  %v1928_v13 = vpop.xlane.xlu1 %1927  ;;  %v2912_v1 = vpop.eup %2911  ;;  %v1031_v24 = vmul.f32 %v2900_v41, %v4576_v10  ;;  %v4649_v31 = vadd.f32 %v1049_v23, %v4551_v56  ;;  %v1080_v14 = vadd.f32 %v1048_v39, %v4539_v53  ;;  %v5495_v23 = vld [vmem:[#allocation100_spill] sm:$0xff] }
 0x33e   :  { %2935 = vrcp.f32 %v1990_v15  ;;  %v1989_v6 = vadd.f32 1e-09, %v1928_v13  ;;  %v1962_v59 = vpop.xlane.xlu0 %1961  ;;  %v2914_v16 = vpop.eup %2913  ;;  %v4653_v19 = vadd.f32 %v1050_v3, %v4561_v45  ;;  %v1032_v41 = vmul.f32 %v2908_v28, %v4576_v10  ;;  %v5496_v3 = vld [vmem:[#allocation108_spill] sm:$0xff] }
 0x33f   :  { %2937 = vrcp.f32 %v969_v2  ;;  %v2006_v61 = vadd.f32 1e-09, %v1962_v59  ;;  %v2916_v11 = vpop.eup %2915  ;;  %v970_v2 = vadd.f32 1e-09, %v5494_v18  ;;  %v972_v56 = vadd.f32 1e-09, %v5495_v23 }
 0x340   :  { %2939 = vrcp.f32 %v1989_v6  ;;  %v2918_v9 = vpop.eup %2917  ;;  %v1567_v6 = vmul.f32 %v4077_v29, %v1535_v57  ;;  %v1566_v45 = vmul.f32 %v5496_v3, %v1534_v17  ;;  %v5497_v59 = vld [vmem:[#allocation59_spill] sm:$0xff]  ;;  %v1550_v18 = vmul.f32 %v2910_v44, %v4634_v58  ;;  %v5499_v28 = vld [vmem:[#allocation88_spill] sm:$0xff]  ;;  %v5500_v17 = vld [vmem:[#allocation62_spill] sm:$0xff] }
 0x341   :  { %2941 = vrcp.f32 %v971_v46  ;;  %v1960_v15 = vpop.xlane.xlu1 %1959  ;;  %v2920_v53 = vpop.eup %2919  ;;  %v1063_v46 = vmul.f32 %v5497_v59, %v1031_v24  ;;  %v4669_v26 = vadd.f32 1e-09, %v5499_v28  ;;  %v1551_v29 = vmul.f32 %v2912_v1, %v4634_v58 }
 0x342   :  { %2943 = vrcp.f32 %v2006_v61  ;;  %v2005_v13 = vadd.f32 1e-09, %v1960_v15  ;;  %v1415_v39 = vpop.xlane.xlu0 %1414  ;;  %v4666_v8 = vpop.eup %2921  ;;  %v2054_v61 = vmul.f32 %v2916_v11, %v4657_v25  ;;  %v1064_v23 = vmul.f32 %v5500_v17, %v1032_v41 }
 0x343   :  { %5498 = vst [vmem:[#allocation91_spill] sm:$0xff] %v4666_v8  ;;  %v1536_v24 = vmul.f32 %v2918_v9, %v4634_v58  ;;  %v1537_v44 = vmul.f32 %v2914_v16, %v4634_v58  ;;  %v1599_v3 = vadd.f32 %v1567_v6, %v1080_v14  ;;  %v1598_v8 = vadd.f32 %v1566_v45, %v1079_v55  ;;  %v5503_v16 = vld [vmem:[#allocation113_spill] sm:$0xff] }
 0x344   :  { %2945 = vrcp.f32 %v2005_v13  ;;  %v1034_v13 = vmul.f32 %v2920_v53, %v4576_v10  ;;  %v1095_v1 = vadd.f32 %v1063_v46, %v4615_v22  ;;  %v1065_v41 = vmul.f32 %v5502_v20, %v1033_v0  ;;  %v5505_v22 = vld [vmem:[#allocation111_spill] sm:$0xff] }
 0x345   :  { %v2924_v57 = vpop.eup %2923  ;;  %2947 = vrcp.f32 %v970_v2  ;;  %v1413_v15 = vpop.xlane.xlu1 %1412  ;;  %v5501_v2 = vld [vmem:[#allocation109_spill] sm:$0xff]  ;;  %v2086_v49 = vmul.f32 %v5503_v16, %v2054_v61  ;;  %v1096_v40 = vadd.f32 %v1064_v23, %v4627_v62  ;;  %v1568_v55 = vmul.f32 %v4088_v47, %v1536_v24  ;;  %v5506_v61 = vld [vmem:[#allocation64_spill] sm:$0xff] }
 0x346   :  { %v2926_v5 = vpop.eup %2925  ;;  %2949 = vrcp.f32 %v972_v56  ;;  %v2053_v59 = vmul.f32 %v2924_v57, %v4657_v25  ;;  %v1447_v11 = vpop.xlane.xlu0 %1446  ;;  %v1582_v30 = vmul.f32 %v5501_v2, %v1550_v18  ;;  %v5504_v56 = vld [vmem:[#allocation110_spill] sm:$0xff]  ;;  %v1569_v45 = vmul.f32 %v5505_v22, %v1537_v44 }
 0x347   :  { %v2928_v28 = vpop.eup %2927  ;;  %v1583_v14 = vmul.f32 %v5504_v56, %v1551_v29  ;;  %v1553_v46 = vmul.f32 %v2926_v5, %v4634_v58  ;;  %v1066_v29 = vmul.f32 %v5506_v61, %v1034_v13  ;;  %v1472_v24 = vadd.f32 1e-09, %v1413_v15  ;;  %v5507_v56 = vld [vmem:[#allocation115_spill] sm:$0xff] }
 0x348   :  { %v2930_v17 = vpop.eup %2929  ;;  %v2085_v9 = vmul.f32 %v4103_v54, %v2053_v59  ;;  %v2070_v6 = vmul.f32 %v2928_v28, %v4657_v25  ;;  %v2118_v54 = vadd.f32 %v2086_v49, %v1599_v3  ;;  %v1473_v28 = vadd.f32 1e-09, %v1415_v39 }
 0x349   :  { %v2932_v57 = vpop.eup %2931  ;;  %v1445_v53 = vpop.xlane.xlu1 %1444  ;;  %v1614_v16 = vadd.f32 %v1582_v30, %v1095_v1  ;;  %v1552_v47 = vmul.f32 %v2930_v17, %v4634_v58  ;;  %v1615_v5 = vadd.f32 %v1583_v14, %v1096_v40  ;;  %v1601_v13 = vadd.f32 %v1569_v45, %v4653_v19  ;;  %v5508_v30 = vld [vmem:[#allocation112_spill] sm:$0xff] }
 0x34a   :  { %v4689_v20 = vpop.eup %2933  ;;  %v2117_v0 = vadd.f32 %v2085_v9, %v1598_v8  ;;  %v2069_v18 = vmul.f32 %v2932_v57, %v4657_v25  ;;  %v1419_v2 = vpop.xlane.xlu0 %1418  ;;  %v2102_v62 = vmul.f32 %v4111_v32, %v2070_v6  ;;  %v1600_v9 = vadd.f32 %v1568_v55, %v4649_v31  ;;  %v5509_v55 = vld [vmem:[#allocation114_spill] sm:$0xff] }
 0x34b   :  { %v2936_v59 = vpop.eup %2935  ;;  %v1585_v1 = vmul.f32 %v5508_v30, %v1553_v46  ;;  %v1489_v17 = vadd.f32 1e-09, %v1447_v11  ;;  %2951 = vrcp.f32 %v1473_v28  ;;  %v1488_v57 = vadd.f32 1e-09, %v1445_v53  ;;  %v5510_v46 = vld [vmem:[#allocation116_spill] sm:$0xff] }
 0x34c   :  { %v4695_v23 = vpop.eup %2937  ;;  %v2149_v44 = vpack.c.bf16 %v2118_v54, %v2117_v0  ;;  %v2101_v8 = vmul.f32 %v5507_v56, %v2069_v18  ;;  %v2056_v39 = vmul.f32 %v2936_v59, %v4657_v25  ;;  %v2134_v15 = vadd.f32 %v2102_v62, %v1615_v5  ;;  %v5511_v56 = vld [vmem:[#allocation117_spill] sm:$0xff] }
 0x34d   :  { %v2940_v49 = vpop.eup %2939  ;;  %v1417_v3 = vpop.xlane.xlu1 %1416  ;;  %v1584_v19 = vmul.f32 %v5509_v55, %v1552_v47  ;;  %2953 = vrcp.f32 %v1472_v24  ;;  %v1475_v45 = vadd.f32 1e-09, %v1419_v2  ;;  %v1097_v59 = vadd.f32 %v1065_v41, %v4623_v34 }
 0x34e   :  { %v4702_v32 = vpop.eup %2941  ;;  %2484 = vmatprep.mubr.bf16.mxu0 %v2149_v44  ;;  %v2133_v6 = vadd.f32 %v2101_v8, %v1614_v16  ;;  %v2055_v40 = vmul.f32 %v2940_v49, %v4657_v25  ;;  %v1451_v22 = vpop.xlane.xlu0 %1450  ;;  %v2088_v31 = vmul.f32 %v4120_v63, %v2056_v39  ;;  %v1474_v11 = vadd.f32 1e-09, %v1417_v3 }
 0x34f   :  { %v2944_v14 = vpop.eup %2943  ;;  %v1098_v16 = vadd.f32 %v1066_v29, %v4638_v50  ;;  %2955 = vrcp.f32 %v1489_v17  ;;  %v1616_v44 = vadd.f32 %v1584_v19, %v1097_v59  ;;  %v5512_v29 = vld [vmem:[#allocation118_spill] sm:$0xff]  ;;  %v1491_v49 = vadd.f32 1e-09, %v1451_v22 }
 0x350   :  { %v2157_v0 = vpack.c.bf16 %v2134_v15, %v2133_v6  ;;  %v2087_v54 = vmul.f32 %v5510_v46, %v2055_v40  ;;  %v2072_v28 = vmul.f32 %v2944_v14, %v4657_v25  ;;  %v2120_v62 = vadd.f32 %v2088_v31, %v1601_v13 }
 0x351   :  { %v2946_v18 = vpop.eup %2945  ;;  %v1449_v61 = vpop.xlane.xlu1 %1448  ;;  %2957 = vrcp.f32 %v1488_v57  ;;  %v1617_v5 = vadd.f32 %v1585_v1, %v1098_v16  ;;  %v550_v13 = vmul.f32 %v4492_v42, %v4498_v12  ;;  %v549_v15 = vmul.f32 %v4495_v27, %v4498_v12  ;;  %v5513_v57 = vld [vmem:[#allocation89_spill] sm:$0xff] }
 0x352   :  { %v4711_v53 = vpop.eup %2947  ;;  %2500 = vmatprep.mubr.bf16.mxu1 %v2157_v0  ;;  %v2119_v63 = vadd.f32 %v2087_v54, %v1600_v9  ;;  %v2071_v2 = vmul.f32 %v2946_v18, %v4657_v25  ;;  %v1934_v24 = vpop.xlane.xlu0 %1933  ;;  %v2104_v34 = vmul.f32 %v5511_v56, %v2072_v28  ;;  %2959 = vrcp.f32 %v1475_v45  ;;  %v5515_v45 = vld [vmem:[#allocation25_spill] sm:$0xff]  ;;  %v5517_v18 = vld [vmem:[#allocation26_spill] sm:$0xff] }
 0x353   :  { %v4714_v47 = vpop.eup %2949  ;;  %v1992_v50 = vadd.f32 1e-09, %v1934_v24  ;;  %2961 = vrcp.f32 %v1474_v11  ;;  %v1019_v9 = vmul.f32 %v4572_v7, %v4576_v10  ;;  %v1490_v17 = vadd.f32 1e-09, %v1449_v61  ;;  %v5519_v16 = vld [vmem:[#allocation49_spill] sm:$0xff]  ;;  %v5522_v56 = vld [vmem:[#allocation50_spill] sm:$0xff] }
 0x354   :  { %v2150_v41 = vpack.c.bf16 %v2120_v62, %v2119_v63  ;;  %v2103_v8 = vmul.f32 %v5512_v29, %v2071_v2  ;;  %v2136_v1 = vadd.f32 %v2104_v34, %v1617_v5  ;;  %v551_v40 = vmul.f32 %v4503_v21, %v4498_v12  ;;  %v5514_v21 = vld [vmem:[#allocation48_spill] sm:$0xff]  ;;  %v5521_v2 = vld [vmem:[#allocation99_spill] sm:$0xff] }
 0x355   :  { %v1932_v3 = vpop.xlane.xlu1 %1931  ;;  %2963 = vrcp.f32 %v1992_v50  ;;  %v1020_v42 = vmul.f32 %v4581_v33, %v4576_v10  ;;  %v963_v22 = vadd.f32 1e-09, %v5513_v57  ;;  %v4734_v55 = vmul.f32 %v4463_v4, %v4498_v12  ;;  %v5516_v33 = vld [vmem:[#allocation90_spill] sm:$0xff]  ;;  %v5520_v63 = vld [vmem:[#allocation28_spill] sm:$0xff]  ;;  %v5526_v57 = vld [vmem:[#allocation63_spill] sm:$0xff] }
 0x356   :  { %v1991_v39 = vadd.f32 1e-09, %v1932_v3  ;;  %2485 = vmatmul.mubr.bf16.vlgmr.msra.gmra.mxu0 %v2150_v41  ;;  %v2135_v30 = vadd.f32 %v2103_v8, %v1616_v44  ;;  %2965 = vrcp.f32 %v4669_v26  ;;  %v1966_v6 = vpop.xlane.xlu0 %1965  ;;  %v1021_v26 = vmul.f32 %v4594_v48, %v4576_v10  ;;  %v5518_v48 = vld [vmem:[#allocation27_spill] sm:$0xff] }
 0x357   :  { %v2008_v7 = vadd.f32 1e-09, %v1966_v6  ;;  %v1051_v19 = vmul.f32 %v5514_v21, %v1019_v9  ;;  %v4739_v0 = vmul.f32 %v5515_v45, %v4642_v38  ;;  %v962_v46 = vadd.f32 1e-09, %v5516_v33  ;;  %v5528_v45 = vld [vmem:[#allocation65_spill] sm:$0xff] }
 0x358   :  { %2967 = vrcp.f32 %v1991_v39  ;;  %v2158_v14 = vpack.c.bf16 %v2136_v1, %v2135_v30  ;;  %v4743_v11 = vmul.f32 %v5517_v18, %v549_v15  ;;  %v4746_v61 = vmul.f32 %v5518_v48, %v550_v13  ;;  %v2952_v4 = vpop.eup %2951  ;;  %v5524_v15 = vld [vmem:[#allocation51_spill] sm:$0xff] }
 0x359   :  { %2969 = vrcp.f32 %v1491_v49  ;;  %v1964_v31 = vpop.xlane.xlu1 %1963  ;;  %v1052_v28 = vmul.f32 %v5519_v16, %v1020_v42  ;;  %v4750_v62 = vmul.f32 %v5520_v63, %v551_v40  ;;  %v973_v24 = vadd.f32 1e-09, %v5521_v2 }
 0x35a   :  { %2971 = vrcp.f32 %v2008_v7  ;;  %v2007_v27 = vadd.f32 1e-09, %v1964_v31  ;;  %2501 = vmatmul.mubr.bf16.vlgmr.msra.gmra.mxu1 %v2158_v14  ;;  %v1938_v54 = vpop.xlane.xlu0 %1937  ;;  %v2954_v38 = vpop.eup %2953  ;;  %v1022_v5 = vmul.f32 %v4602_v60, %v4576_v10  ;;  %v1053_v34 = vmul.f32 %v5522_v56, %v1021_v26  ;;  %v5525_v14 = vld [vmem:[#allocation102_spill] sm:$0xff] }
 0x35b   :  { %2973 = vrcp.f32 %v1490_v17  ;;  %v1994_v59 = vadd.f32 1e-09, %v1938_v54  ;;  %v1083_v41 = vadd.f32 %v1051_v19, %v4556_v51  ;;  %v1035_v29 = vmul.f32 %v4695_v23, %v4576_v10  ;;  %v5523_v23 = vld [vmem:[#allocation101_spill] sm:$0xff] }
 0x35c   :  { %2975 = vrcp.f32 %v2007_v27  ;;  %v2956_v8 = vpop.eup %2955  ;;  %v1539_v3 = vmul.f32 %v2952_v4, %v4634_v58  ;;  %v1036_v9 = vmul.f32 %v4711_v53, %v4576_v10  ;;  %v1037_v60 = vmul.f32 %v4702_v32, %v4576_v10  ;;  %v5527_v27 = vld [vmem:[#allocation66_spill] sm:$0xff] }
 0x35d   :  { %2977 = vrcp.f32 %v963_v22  ;;  %v1936_v44 = vpop.xlane.xlu1 %1935  ;;  %v1084_v30 = vadd.f32 %v1052_v28, %v4567_v37  ;;  %v1538_v51 = vmul.f32 %v2954_v38, %v4634_v58  ;;  %v975_v17 = vadd.f32 1e-09, %v5523_v23  ;;  %v5534_v23 = vld [vmem:[#allocation122_spill] sm:$0xff] }
 0x35e   :  { %2979 = vrcp.f32 %v1994_v59  ;;  %v1993_v50 = vadd.f32 1e-09, %v1936_v44  ;;  %v1970_v49 = vpop.xlane.xlu0 %1969  ;;  %v2958_v13 = vpop.eup %2957  ;;  %v1054_v40 = vmul.f32 %v5524_v15, %v1022_v5  ;;  %v4769_v7 = vadd.f32 %v1053_v34, %v4570_v52  ;;  %v5529_v52 = vld [vmem:[#allocation119_spill] sm:$0xff] }
 0x35f   :  { %2981 = vrcp.f32 %v962_v46  ;;  %v2010_v39 = vadd.f32 1e-09, %v1970_v49  ;;  %v2960_v1 = vpop.eup %2959  ;;  %v974_v32 = vadd.f32 1e-09, %v5525_v14  ;;  %v1067_v22 = vmul.f32 %v5526_v57, %v1035_v29  ;;  %v5536_v57 = vld [vmem:[#allocation127_spill] sm:$0xff] }
 0x360   :  { %2983 = vrcp.f32 %v1993_v50  ;;  %v2962_v53 = vpop.eup %2961  ;;  %v1571_v26 = vmul.f32 %v4148_v36, %v1539_v3  ;;  %v1068_v21 = vmul.f32 %v5527_v27, %v1036_v9  ;;  %v1555_v19 = vmul.f32 %v2956_v8, %v4634_v58  ;;  %v5530_v50 = vld [vmem:[#allocation120_spill] sm:$0xff]  ;;  %v5531_v9 = vld [vmem:[#allocation126_spill] sm:$0xff] }
 0x361   :  { %2985 = vrcp.f32 %v973_v24  ;;  %v1968_v6 = vpop.xlane.xlu1 %1967  ;;  %v1069_v33 = vmul.f32 %v5528_v45, %v1037_v60  ;;  %v1570_v54 = vmul.f32 %v5529_v52, %v1538_v51  ;;  %v1554_v48 = vmul.f32 %v2958_v13, %v4634_v58  ;;  %v5532_v13 = vld [vmem:[#allocation121_spill] sm:$0xff]  ;;  %v5537_v45 = vld [vmem:[#allocation128_spill] sm:$0xff] }
 0x362   :  { %2987 = vrcp.f32 %v2010_v39  ;;  %v2009_v42 = vadd.f32 1e-09, %v1968_v6  ;;  %v2964_v37 = vpop.eup %2963  ;;  %v1423_v31 = vpop.xlane.xlu0 %1422  ;;  %v1540_v36 = vmul.f32 %v2962_v53, %v4634_v58  ;;  %v1541_v16 = vmul.f32 %v2960_v1, %v4634_v58  ;;  %v5533_v1 = vld [vmem:[#allocation123_spill] sm:$0xff] }
 0x363   :  { %v4777_v46 = vpop.eup %2965  ;;  %v2058_v18 = vmul.f32 %v2964_v37, %v4657_v25  ;;  %v1038_v28 = vmul.f32 %v4714_v47, %v4576_v10  ;;  %v1086_v24 = vadd.f32 %v1054_v40, %v4588_v43  ;;  %v1099_v56 = vadd.f32 %v1067_v22, %v4739_v0 }
 0x364   :  { %2989 = vrcp.f32 %v2009_v42  ;;  %v1100_v34 = vadd.f32 %v1068_v21, %v4743_v11  ;;  %v1587_v29 = vmul.f32 %v5530_v50, %v1555_v19  ;;  %v4793_v8 = vadd.f32 %v1069_v33, %v4746_v61  ;;  %v5540_v50 = vld [vmem:[#allocation125_spill] sm:$0xff] }
 0x365   :  { %v2968_v4 = vpop.eup %2967  ;;  %2991 = vrcp.f32 %v975_v17  ;;  %v1421_v59 = vpop.xlane.xlu1 %1420  ;;  %v2090_v2 = vmul.f32 %v4211_v35, %v2058_v18  ;;  %v1602_v49 = vadd.f32 %v1570_v54, %v1083_v41  ;;  %v1603_v3 = vadd.f32 %v1571_v26, %v1084_v30  ;;  %v5535_v17 = vld [vmem:[#allocation68_spill] sm:$0xff] }
 0x366   :  { %v2970_v63 = vpop.eup %2969  ;;  %2993 = vrcp.f32 %v974_v32  ;;  %v2057_v38 = vmul.f32 %v2968_v4, %v4657_v25  ;;  %v1455_v5 = vpop.xlane.xlu0 %1454  ;;  %v1586_v35 = vmul.f32 %v5532_v13, %v1554_v48  ;;  %v1572_v0 = vmul.f32 %v5533_v1, %v1540_v36 }
 0x367   :  { %v2972_v44 = vpop.eup %2971  ;;  %v1573_v11 = vmul.f32 %v5534_v23, %v1541_v16  ;;  %v1070_v6 = vmul.f32 %v5535_v17, %v1038_v28  ;;  %v2122_v40 = vadd.f32 %v2090_v2, %v1603_v3  ;;  %v1557_v30 = vmul.f32 %v2970_v63, %v4634_v58 }
 0x368   :  { %v2974_v47 = vpop.eup %2973  ;;  %v2089_v60 = vmul.f32 %v5531_v9, %v2057_v38  ;;  %v2074_v51 = vmul.f32 %v2972_v44, %v4657_v25  ;;  %v1477_v14 = vadd.f32 1e-09, %v1423_v31  ;;  %v1619_v42 = vadd.f32 %v1587_v29, %v1100_v34 }
 0x369   :  { %v2976_v39 = vpop.eup %2975  ;;  %v1453_v43 = vpop.xlane.xlu1 %1452  ;;  %v1556_v37 = vmul.f32 %v2974_v47, %v4634_v58  ;;  %v1476_v27 = vadd.f32 1e-09, %v1421_v59  ;;  %v1618_v19 = vadd.f32 %v1586_v35, %v1099_v56  ;;  %v1493_v54 = vadd.f32 1e-09, %v1455_v5  ;;  %v5538_v59 = vld [vmem:[#allocation124_spill] sm:$0xff]  ;;  %v5539_v5 = vld [vmem:[#allocation129_spill] sm:$0xff] }
 0x36a   :  { %v4801_v15 = vpop.eup %2977  ;;  %v2121_v61 = vadd.f32 %v2089_v60, %v1602_v49  ;;  %v2073_v41 = vmul.f32 %v2976_v39, %v4657_v25  ;;  %v1427_v32 = vpop.xlane.xlu0 %1426  ;;  %v2106_v22 = vmul.f32 %v5536_v57, %v2074_v51  ;;  %v1604_v48 = vadd.f32 %v1572_v0, %v4769_v7  ;;  %v5541_v47 = vld [vmem:[#allocation130_spill] sm:$0xff]  ;;  %v5545_v57 = vld [vmem:[#allocation84_spill] sm:$0xff] }
 0x36b   :  { %v2980_v53 = vpop.eup %2979  ;;  %v1605_v4 = vadd.f32 %v1573_v11, %v1086_v24  ;;  %v1589_v38 = vmul.f32 %v5538_v59, %v1557_v30  ;;  %2995 = vrcp.f32 %v1477_v14  ;;  %v1492_v44 = vadd.f32 1e-09, %v1453_v43  ;;  %v5542_v43 = vld [vmem:[#allocation104_spill] sm:$0xff] }
 0x36c   :  { %v4807_v26 = vpop.eup %2981  ;;  %v2151_v21 = vpack.c.bf16 %v2122_v40, %v2121_v61  ;;  %v2105_v33 = vmul.f32 %v5537_v45, %v2073_v41  ;;  %v2060_v31 = vmul.f32 %v2980_v53, %v4657_v25  ;;  %v2138_v28 = vadd.f32 %v2106_v22, %v1619_v42  ;;  %v5543_v41 = vld [vmem:[#allocation131_spill] sm:$0xff]  ;;  %v5544_v53 = vld [vmem:[#allocation132_spill] sm:$0xff] }
 0x36d   :  { %v2984_v52 = vpop.eup %2983  ;;  %v1425_v18 = vpop.xlane.xlu1 %1424  ;;  %v1588_v7 = vmul.f32 %v5540_v50, %v1556_v37  ;;  %2997 = vrcp.f32 %v1476_v27  ;;  %v1479_v24 = vadd.f32 1e-09, %v1427_v32  ;;  %v1102_v13 = vadd.f32 %v1070_v6, %v4750_v62  ;;  %v5546_v37 = vld [vmem:[#allocation41_spill] sm:$0xff] }
 0x36e   :  { %v4812_v36 = vpop.eup %2985  ;;  %2488 = vmatprep.mubr.bf16.mxu0 %v2151_v21  ;;  %v2137_v16 = vadd.f32 %v2105_v33, %v1618_v19  ;;  %v2059_v63 = vmul.f32 %v2984_v52, %v4657_v25  ;;  %v1459_v56 = vpop.xlane.xlu0 %1458  ;;  %v2092_v34 = vmul.f32 %v5539_v5, %v2060_v31  ;;  %2999 = vrcp.f32 %v1493_v54  ;;  %v5547_v52 = vld [vmem:[#allocation91_spill] sm:$0xff] }
 0x36f   :  { %v2988_v2 = vpop.eup %2987  ;;  %v1478_v9 = vadd.f32 1e-09, %v1425_v18  ;;  %v976_v51 = vadd.f32 1e-09, %v5542_v43  ;;  %3001 = vrcp.f32 %v1492_v44  ;;  %v1620_v61 = vadd.f32 %v1588_v7, %v4793_v8  ;;  %v5548_v18 = vld [vmem:[#allocation85_spill] sm:$0xff]  ;;  %v5552_v44 = vld [vmem:[#allocation14_spill] sm:$0xff] }
 0x370   :  { %v2159_v29 = vpack.c.bf16 %v2138_v28, %v2137_v16  ;;  %v2091_v49 = vmul.f32 %v5541_v47, %v2059_v63  ;;  %v2076_v35 = vmul.f32 %v2988_v2, %v4657_v25  ;;  %v2124_v0 = vadd.f32 %v2092_v34, %v1605_v4  ;;  %v5549_v16 = vld [vmem:[#allocation42_spill] sm:$0xff]  ;;  %v5550_v63 = vld [vmem:[#allocation92_spill] sm:$0xff]  ;;  %v5553_v5 = vld [vmem:[#allocation43_spill] sm:$0xff] }
 0x371   :  { %v2990_v3 = vpop.eup %2989  ;;  %v1457_v60 = vpop.xlane.xlu1 %1456  ;;  %v1621_v40 = vadd.f32 %v1589_v38, %v1102_v13  ;;  %3003 = vrcp.f32 %v1479_v24  ;;  %v1495_v32 = vadd.f32 1e-09, %v1459_v56  ;;  %v1023_v22 = vmul.f32 %v5545_v57, %v4576_v10  ;;  %v5551_v2 = vld [vmem:[#allocation82_spill] sm:$0xff]  ;;  %v5554_v7 = vld [vmem:[#allocation52_spill] sm:$0xff] }
 0x372   :  { %v4821_v39 = vpop.eup %2991  ;;  %2504 = vmatprep.mubr.bf16.mxu1 %v2159_v29  ;;  %v2123_v1 = vadd.f32 %v2091_v49, %v1604_v48  ;;  %v2075_v23 = vmul.f32 %v2990_v3, %v4657_v25  ;;  %v1942_v17 = vpop.xlane.xlu0 %1941  ;;  %v2108_v62 = vmul.f32 %v5543_v41, %v2076_v35  ;;  %3005 = vrcp.f32 %v1478_v9  ;;  %v5555_v29 = vld [vmem:[#allocation77_spill] sm:$0xff]  ;;  %v5556_v3 = vld [vmem:[#allocation54_spill] sm:$0xff]  ;;  %v5561_v41 = vld [vmem:[#allocation103_spill] sm:$0xff] }
 0x373   :  { %v4825_v11 = vpop.eup %2993  ;;  %v1996_v6 = vadd.f32 1e-09, %v1942_v17  ;;  %v552_v27 = vmul.f32 %v5546_v37, %v4498_v12  ;;  %v1494_v45 = vadd.f32 1e-09, %v1457_v60  ;;  %v1024_v54 = vmul.f32 %v5547_v52, %v4576_v10  ;;  %v5557_v60 = vld [vmem:[#allocation16_spill] sm:$0xff]  ;;  %v5558_v35 = vld [vmem:[#allocation53_spill] sm:$0xff] }
 0x374   :  { %v2152_v30 = vpack.c.bf16 %v2124_v0, %v2123_v1  ;;  %v2107_v14 = vmul.f32 %v5544_v53, %v2075_v23  ;;  %v2140_v19 = vadd.f32 %v2108_v62, %v1621_v40  ;;  %v1025_v48 = vmul.f32 %v5548_v18, %v4576_v10  ;;  %v5559_v0 = vld [vmem:[#allocation29_spill] sm:$0xff]  ;;  %v5560_v17 = vld [vmem:[#allocation31_spill] sm:$0xff] }
 0x375   :  { %v1940_v42 = vpop.xlane.xlu1 %1939  ;;  %3007 = vrcp.f32 %v1996_v6  ;;  %v554_v28 = vmul.f32 %v5549_v16, %v4498_v12  ;;  %v964_v59 = vadd.f32 1e-09, %v5550_v63  ;;  %v569_v56 = vmul.f32 %v5552_v44, %v5551_v2  ;;  %v5569_v2 = vld [vmem:[#allocation107_spill] sm:$0xff] }
 0x376   :  { %v1995_v21 = vadd.f32 1e-09, %v1940_v42  ;;  %2489 = vmatmul.mubr.bf16.gmra.mxu0 %v2152_v30  ;;  %v2139_v8 = vadd.f32 %v2107_v14, %v1620_v61  ;;  %3009 = vrcp.f32 %v976_v51  ;;  %v1974_v33 = vpop.xlane.xlu0 %1973  ;;  %v553_v34 = vmul.f32 %v5553_v5, %v4498_v12  ;;  %v5562_v30 = vld [vmem:[#allocation30_spill] sm:$0xff]  ;;  %v5563_v42 = vld [vmem:[#allocation81_spill] sm:$0xff] }
 0x377   :  { %v2012_v4 = vadd.f32 1e-09, %v1974_v33  ;;  %v1055_v24 = vmul.f32 %v5554_v7, %v1023_v22  ;;  %v555_v47 = vmul.f32 %v5555_v29, %v4498_v12  ;;  %v1056_v9 = vmul.f32 %v5556_v3, %v1024_v54  ;;  %v5564_v22 = vld [vmem:[#allocation32_spill] sm:$0xff] }
 0x378   :  { %3011 = vrcp.f32 %v1995_v21  ;;  %v2160_v31 = vpack.c.bf16 %v2140_v19, %v2139_v8  ;;  %v571_v13 = vmul.f32 %v5557_v60, %v4734_v55  ;;  %v1057_v43 = vmul.f32 %v5558_v35, %v1025_v48  ;;  %v2996_v51 = vpop.eup %2995  ;;  %v5573_v35 = vld [vmem:[#allocation133_spill] sm:$0xff] }
 0x379   :  { %3013 = vrcp.f32 %v1495_v32  ;;  %v1972_v38 = vpop.xlane.xlu1 %1971  ;;  %v584_v23 = vmul.f32 %v5559_v0, %v552_v27  ;;  %v4854_v61 = vmul.f32 %v5560_v17, %v554_v28  ;;  %v977_v62 = vadd.f32 1e-09, %v5561_v41  ;;  %v5567_v28 = vld [vmem:[#allocation56_spill] sm:$0xff]  ;;  %v5574_v17 = vld [vmem:[#allocation135_spill] sm:$0xff] }
 0x37a   :  { %3015 = vrcp.f32 %v2012_v4  ;;  %v2011_v50 = vadd.f32 1e-09, %v1972_v38  ;;  %2505 = vmatmul.mubr.bf16.gmra.mxu1 %v2160_v31  ;;  %v1946_v49 = vpop.xlane.xlu0 %1945  ;;  %v2998_v40 = vpop.eup %2997  ;;  %v585_v53 = vmul.f32 %v5562_v30, %v553_v34  ;;  %v1026_v55 = vmul.f32 %v4777_v46, %v4576_v10  ;;  %v5566_v4 = vld [vmem:[#allocation105_spill] sm:$0xff] }
 0x37b   :  { %3017 = vrcp.f32 %v1494_v45  ;;  %v1998_v1 = vadd.f32 1e-09, %v1946_v49  ;;  %v3000_v14 = vpop.eup %2999  ;;  %v1087_v57 = vadd.f32 %v1055_v24, %v5563_v42  ;;  %v4862_v37 = vmul.f32 %v5564_v22, %v555_v47  ;;  %v5565_v45 = vld [vmem:[#allocation83_spill] sm:$0xff]  ;;  %v5571_v24 = vld [vmem:[#allocation70_spill] sm:$0xff]  ;;  %v5575_v30 = vld [vmem:[#allocation141_spill] sm:$0xff] }
 0x37c   :  { %3019 = vrcp.f32 %v2011_v50  ;;  %v1088_v21 = vadd.f32 %v1056_v9, %v569_v56  ;;  %v1039_v8 = vmul.f32 %v4812_v36, %v4576_v10  ;;  %v1040_v19 = vmul.f32 %v4825_v11, %v4576_v10  ;;  %v3002_v46 = vpop.eup %3001  ;;  %v5570_v50 = vld [vmem:[#allocation67_spill] sm:$0xff]  ;;  %v5572_v9 = vld [vmem:[#allocation134_spill] sm:$0xff] }
 0x37d   :  { %3021 = vrcp.f32 %v964_v59  ;;  %v1944_v6 = vpop.xlane.xlu1 %1943  ;;  %v4869_v33 = vadd.f32 %v1057_v43, %v5565_v45  ;;  %v1542_v54 = vmul.f32 %v2998_v40, %v4634_v58  ;;  %v1543_v18 = vmul.f32 %v2996_v51, %v4634_v58  ;;  %v5568_v59 = vld [vmem:[#allocation106_spill] sm:$0xff] }
 0x37e   :  { %3023 = vrcp.f32 %v1998_v1  ;;  %v1997_v32 = vadd.f32 1e-09, %v1944_v6  ;;  %v1978_v27 = vpop.xlane.xlu0 %1977  ;;  %v3004_v48 = vpop.eup %3003  ;;  %v979_v31 = vadd.f32 1e-09, %v5566_v4  ;;  %v1559_v36 = vmul.f32 %v3000_v14, %v4634_v58 }
 0x37f   :  { %v2014_v52 = vadd.f32 1e-09, %v1978_v27  ;;  %v1058_v63 = vmul.f32 %v5567_v28, %v1026_v55  ;;  %v3006_v11 = vpop.eup %3005  ;;  %v978_v38 = vadd.f32 1e-09, %v5568_v59  ;;  %v980_v44 = vadd.f32 1e-09, %v5569_v2 }
 0x380   :  { %3025 = vrcp.f32 %v1997_v32  ;;  %v1071_v7 = vmul.f32 %v5570_v50, %v1039_v8  ;;  %v1072_v29 = vmul.f32 %v5571_v24, %v1040_v19  ;;  %v1558_v47 = vmul.f32 %v3002_v46, %v4634_v58  ;;  %v5576_v8 = vld [vmem:[#allocation136_spill] sm:$0xff]  ;;  %v5579_v28 = vld [vmem:[#allocation137_spill] sm:$0xff]  ;;  %v5581_v50 = vld [vmem:[#allocation143_spill] sm:$0xff] }
 0x381   :  { %3027 = vrcp.f32 %v977_v62  ;;  %v1976_v16 = vpop.xlane.xlu1 %1975  ;;  %v1041_v49 = vmul.f32 %v4821_v39, %v4576_v10  ;;  %v1574_v60 = vmul.f32 %v5572_v9, %v1542_v54  ;;  %v1575_v43 = vmul.f32 %v5573_v35, %v1543_v18  ;;  %v5578_v18 = vld [vmem:[#allocation69_spill] sm:$0xff] }
 0x382   :  { %3029 = vrcp.f32 %v2014_v52  ;;  %v2013_v56 = vadd.f32 1e-09, %v1976_v16  ;;  %v3008_v5 = vpop.eup %3007  ;;  %v1431_v34 = vpop.xlane.xlu0 %1430  ;;  %v1591_v40 = vmul.f32 %v5574_v17, %v1559_v36  ;;  %v1090_v41 = vadd.f32 %v1058_v63, %v571_v13  ;;  %v5577_v52 = vld [vmem:[#allocation142_spill] sm:$0xff]  ;;  %v5583_v17 = vld [vmem:[#allocation72_spill] sm:$0xff] }
 0x383   :  { %v3010_v3 = vpop.eup %3009  ;;  %v2062_v51 = vmul.f32 %v3008_v5, %v4657_v25  ;;  %v1545_v62 = vmul.f32 %v3004_v48, %v4634_v58  ;;  %v1544_v14 = vmul.f32 %v3006_v11, %v4634_v58  ;;  %v1103_v22 = vadd.f32 %v1071_v7, %v584_v23 }
 0x384   :  { %3031 = vrcp.f32 %v2013_v56  ;;  %v1104_v27 = vadd.f32 %v1072_v29, %v585_v53  ;;  %v1590_v19 = vmul.f32 %v5576_v8, %v1558_v47  ;;  %v1606_v46 = vadd.f32 %v1574_v60, %v1087_v57  ;;  %v5586_v8 = vld [vmem:[#allocation146_spill] sm:$0xff] }
 0x385   :  { %v3012_v1 = vpop.eup %3011  ;;  %3033 = vrcp.f32 %v979_v31  ;;  %v1429_v0 = vpop.xlane.xlu1 %1428  ;;  %v2094_v55 = vmul.f32 %v5575_v30, %v2062_v51  ;;  %v1607_v13 = vadd.f32 %v1575_v43, %v1088_v21  ;;  %v1073_v48 = vmul.f32 %v5578_v18, %v1041_v49  ;;  %v5580_v21 = vld [vmem:[#allocation138_spill] sm:$0xff]  ;;  %v5582_v49 = vld [vmem:[#allocation144_spill] sm:$0xff] }
 0x386   :  { %v3014_v6 = vpop.eup %3013  ;;  %3035 = vrcp.f32 %v978_v38  ;;  %v2061_v39 = vmul.f32 %v3012_v1, %v4657_v25  ;;  %v1463_v42 = vpop.xlane.xlu0 %1462  ;;  %v1623_v16 = vadd.f32 %v1591_v40, %v1104_v27  ;;  %v1577_v63 = vmul.f32 %v5579_v28, %v1545_v62 }
 0x387   :  { %v3016_v32 = vpop.eup %3015  ;;  %3037 = vrcp.f32 %v980_v44  ;;  %v1042_v11 = vmul.f32 %v3010_v3, %v4576_v10  ;;  %v2126_v59 = vadd.f32 %v2094_v55, %v1607_v13  ;;  %v1576_v38 = vmul.f32 %v5580_v21, %v1544_v14 }
 0x388   :  { %v3018_v45 = vpop.eup %3017  ;;  %v2093_v54 = vmul.f32 %v5577_v52, %v2061_v39  ;;  %v2078_v36 = vmul.f32 %v3016_v32, %v4657_v25  ;;  %v1481_v44 = vadd.f32 1e-09, %v1431_v34  ;;  %v1622_v5 = vadd.f32 %v1590_v19, %v1103_v22  ;;  %v5584_v32 = vld [vmem:[#allocation145_spill] sm:$0xff] }
 0x389   :  { %v3020_v4 = vpop.eup %3019  ;;  %v1461_v31 = vpop.xlane.xlu1 %1460  ;;  %v1561_v24 = vmul.f32 %v3014_v6, %v4634_v58  ;;  %v1480_v29 = vadd.f32 1e-09, %v1429_v0  ;;  %v1560_v9 = vmul.f32 %v3018_v45, %v4634_v58  ;;  %v1497_v35 = vadd.f32 1e-09, %v1463_v42  ;;  %v5587_v45 = vld [vmem:[#allocation140_spill] sm:$0xff] }
 0x38a   :  { %v4897_v23 = vpop.eup %3021  ;;  %v2125_v53 = vadd.f32 %v2093_v54, %v1606_v46  ;;  %v2077_v57 = vmul.f32 %v3020_v4, %v4657_v25  ;;  %v1435_v56 = vpop.xlane.xlu0 %1434  ;;  %v2110_v7 = vmul.f32 %v5581_v50, %v2078_v36  ;;  %v1609_v51 = vadd.f32 %v1577_v63, %v1090_v41  ;;  %v5585_v41 = vld [vmem:[#allocation139_spill] sm:$0xff] }
 0x38b   :  { %v3024_v2 = vpop.eup %3023  ;;  %v1074_v34 = vmul.f32 %v5583_v17, %v1042_v11  ;;  %v1608_v0 = vadd.f32 %v1576_v38, %v4869_v33  ;;  %3039 = vrcp.f32 %v1481_v44  ;;  %v1496_v55 = vadd.f32 1e-09, %v1461_v31 }
 0x38c   :  { %v2153_v47 = vpack.c.bf16 %v2126_v59, %v2125_v53  ;;  %v2109_v3 = vmul.f32 %v5582_v49, %v2077_v57  ;;  %v2064_v1 = vmul.f32 %v3024_v2, %v4657_v25  ;;  %v2142_v39 = vadd.f32 %v2110_v7, %v1623_v16  ;;  %v5588_v57 = vld [vmem:[#allocation147_spill] sm:$0xff] }
 0x38d   :  { %v3026_v60 = vpop.eup %3025  ;;  %v1433_v43 = vpop.xlane.xlu1 %1432  ;;  %v1593_v22 = vmul.f32 %v5585_v41, %v1561_v24  ;;  %3041 = vrcp.f32 %v1480_v29  ;;  %v1592_v46 = vmul.f32 %v5587_v45, %v1560_v9  ;;  %v1483_v52 = vadd.f32 1e-09, %v1435_v56  ;;  %v5589_v56 = vld [vmem:[#allocation148_spill] sm:$0xff] }
 0x38e   :  { %v4907_v40 = vpop.eup %3027  ;;  %2492 = vmatprep.mubr.bf16.mxu0 %v2153_v47  ;;  %v2141_v62 = vadd.f32 %v2109_v3, %v1622_v5  ;;  %v2063_v6 = vmul.f32 %v3026_v60, %v4657_v25  ;;  %v1467_v14 = vpop.xlane.xlu0 %1466  ;;  %v2096_v42 = vmul.f32 %v5584_v32, %v2064_v1  ;;  %3043 = vrcp.f32 %v1497_v35  ;;  %v5590_v60 = vld [vmem:[#allocation37_spill] sm:$0xff]  ;;  %v5592_v1 = vld [vmem:[#allocation38_spill] sm:$0xff] }
 0x38f   :  { %v3030_v30 = vpop.eup %3029  ;;  %v1106_v54 = vadd.f32 %v1074_v34, %v4862_v37  ;;  %v1105_v36 = vadd.f32 %v1073_v48, %v4854_v61  ;;  %3045 = vrcp.f32 %v1496_v55  ;;  %v1482_v11 = vadd.f32 1e-09, %v1433_v43  ;;  %v5591_v43 = vld [vmem:[#allocation39_spill] sm:$0xff]  ;;  %v5595_v55 = vld [vmem:[#allocation78_spill] sm:$0xff] }
 0x390   :  { %v2161_v27 = vpack.c.bf16 %v2142_v39, %v2141_v62  ;;  %v2095_v19 = vmul.f32 %v5586_v8, %v2063_v6  ;;  %v2080_v18 = vmul.f32 %v3030_v30, %v4657_v25  ;;  %v2128_v16 = vadd.f32 %v2096_v42, %v1609_v51  ;;  %v5593_v62 = vld [vmem:[#allocation40_spill] sm:$0xff] }
 0x391   :  { %v3032_v13 = vpop.eup %3031  ;;  %v1465_v33 = vpop.xlane.xlu1 %1464  ;;  %v1625_v59 = vadd.f32 %v1593_v22, %v1106_v54  ;;  %v1624_v44 = vadd.f32 %v1592_v46, %v1105_v36  ;;  %3047 = vrcp.f32 %v1483_v52  ;;  %v1499_v50 = vadd.f32 1e-09, %v1467_v14  ;;  %v5594_v6 = vld [vmem:[#allocation76_spill] sm:$0xff] }
 0x392   :  { %v4917_v4 = vpop.eup %3033  ;;  %2508 = vmatprep.mubr.bf16.mxu1 %v2161_v27  ;;  %v2127_v31 = vadd.f32 %v2095_v19, %v1608_v0  ;;  %v2079_v28 = vmul.f32 %v3032_v13, %v4657_v25  ;;  %v1950_v53 = vpop.xlane.xlu0 %1949  ;;  %v2112_v21 = vmul.f32 %v5588_v57, %v2080_v18  ;;  %v1498_v29 = vadd.f32 1e-09, %v1465_v33  ;;  %v5596_v27 = vld [vmem:[#allocation17_spill] sm:$0xff]  ;;  %v5597_v19 = vld [vmem:[#allocation18_spill] sm:$0xff]  ;;  %v5598_v13 = vld [vmem:[#allocation19_spill] sm:$0xff] }
 0x393   :  { %v3036_v63 = vpop.eup %3035  ;;  %v2000_v37 = vadd.f32 1e-09, %v1950_v53  ;;  %v540_v35 = vmul.f32 %v5590_v60, %v4498_v12  ;;  %v541_v51 = vmul.f32 %v5591_v43, %v4498_v12  ;;  %v542_v17 = vmul.f32 %v5592_v1, %v4498_v12  ;;  %v5601_v53 = vld [vmem:[#allocation34_spill] sm:$0xff] }
 0x394   :  { %v4922_v38 = vpop.eup %3037  ;;  %v2154_v2 = vpack.c.bf16 %v2128_v16, %v2127_v31  ;;  %v2111_v5 = vmul.f32 %v5589_v56, %v2079_v28  ;;  %v2144_v24 = vadd.f32 %v2112_v21, %v1625_v59  ;;  %v543_v39 = vmul.f32 %v5593_v62, %v4498_v12  ;;  %v5599_v31 = vld [vmem:[#allocation20_spill] sm:$0xff]  ;;  %v5600_v28 = vld [vmem:[#allocation33_spill] sm:$0xff] }
 0x395   :  { %v1948_v7 = vpop.xlane.xlu1 %1947  ;;  %3049 = vrcp.f32 %v2000_v37  ;;  %v556_v30 = vmul.f32 %v5594_v6, %v4498_v12  ;;  %v557_v14 = vmul.f32 %v5595_v55, %v4498_v12  ;;  %v572_v8 = vmul.f32 %v5596_v27, %v540_v35  ;;  %v5609_v62 = vld [vmem:[#allocation149_spill] sm:$0xff] }
 0x396   :  { %v1999_v61 = vadd.f32 1e-09, %v1948_v7  ;;  %2493 = vmatmul.mubr.bf16.gmra.mxu0 %v2154_v2  ;;  %v2143_v48 = vadd.f32 %v2111_v5, %v1624_v44  ;;  %3051 = vrcp.f32 %v1482_v11  ;;  %v1982_v47 = vpop.xlane.xlu0 %1981  ;;  %v573_v45 = vmul.f32 %v5597_v19, %v541_v51  ;;  %v5603_v5 = vld [vmem:[#allocation55_spill] sm:$0xff]  ;;  %v5613_v19 = vld [vmem:[#allocation157_spill] sm:$0xff] }
 0x397   :  { %v2016_v49 = vadd.f32 1e-09, %v1982_v47  ;;  %v1027_v46 = vmul.f32 %v4689_v20, %v4576_v10  ;;  %v4942_v52 = vmul.f32 %v5598_v13, %v542_v17  ;;  %v1028_v18 = vmul.f32 %v4807_v26, %v4576_v10  ;;  %v5602_v20 = vld [vmem:[#allocation79_spill] sm:$0xff]  ;;  %v5608_v17 = vld [vmem:[#allocation150_spill] sm:$0xff]  ;;  %v5614_v13 = vld [vmem:[#allocation60_spill] sm:$0xff] }
 0x398   :  { %3053 = vrcp.f32 %v1999_v61  ;;  %v2162_v3 = vpack.c.bf16 %v2144_v24, %v2143_v48  ;;  %v3040_v32 = vpop.eup %3039  ;;  %v4947_v16 = vmul.f32 %v5599_v31, %v543_v39  ;;  %v588_v11 = vmul.f32 %v5600_v28, %v556_v30  ;;  %v5607_v51 = vld [vmem:[#allocation35_spill] sm:$0xff]  ;;  %v5615_v31 = vld [vmem:[#allocation152_spill] sm:$0xff] }
 0x399   :  { %3055 = vrcp.f32 %v1499_v50  ;;  %v1980_v9 = vpop.xlane.xlu1 %1979  ;;  %v589_v59 = vmul.f32 %v5601_v53, %v557_v14  ;;  %v1044_v57 = vmul.f32 %v3036_v63, %v4576_v10  ;;  %v558_v21 = vmul.f32 %v5602_v20, %v4498_v12  ;;  %v5610_v30 = vld [vmem:[#allocation71_spill] sm:$0xff] }
 0x39a   :  { %3057 = vrcp.f32 %v2016_v49  ;;  %v2015_v34 = vadd.f32 1e-09, %v1980_v9  ;;  %2509 = vmatmul.mubr.bf16.gmra.mxu1 %v2162_v3  ;;  %v1954_v0 = vpop.xlane.xlu0 %1953  ;;  %v3042_v41 = vpop.eup %3041  ;;  %v1547_v26 = vmul.f32 %v3040_v32, %v4634_v58  ;;  %v1059_v50 = vmul.f32 %v5603_v5, %v1027_v46  ;;  %v5605_v9 = vld [vmem:[#allocation74_spill] sm:$0xff]  ;;  %v5611_v14 = vld [vmem:[#allocation151_spill] sm:$0xff] }
 0x39b   :  { %3059 = vrcp.f32 %v1498_v29  ;;  %v2002_v42 = vadd.f32 1e-09, %v1954_v0  ;;  %v3044_v33 = vpop.eup %3043  ;;  %v1546_v44 = vmul.f32 %v3042_v41, %v4634_v58  ;;  %v1043_v7 = vmul.f32 %v4907_v40, %v4576_v10  ;;  %v5604_v29 = vld [vmem:[#allocation58_spill] sm:$0xff]  ;;  %v5606_v40 = vld [vmem:[#allocation80_spill] sm:$0xff] }
 0x39c   :  { %3061 = vrcp.f32 %v2015_v34  ;;  %v3046_v37 = vpop.eup %3045  ;;  %v1563_v61 = vmul.f32 %v3044_v33, %v4634_v58  ;;  %v1029_v63 = vmul.f32 %v4801_v15, %v4576_v10  ;;  %v1060_v47 = vmul.f32 %v5604_v29, %v1028_v18  ;;  %v5618_v29 = vld [vmem:[#allocation154_spill] sm:$0xff] }
 0x39d   :  { %v1952_v22 = vpop.xlane.xlu1 %1951  ;;  %3063 = vrcp.f32 %v2002_v42  ;;  %v1030_v49 = vmul.f32 %v4897_v23, %v4576_v10  ;;  %v1076_v60 = vmul.f32 %v5605_v9, %v1044_v57  ;;  %v1562_v35 = vmul.f32 %v3046_v37, %v4634_v58  ;;  %v5612_v42 = vld [vmem:[#allocation57_spill] sm:$0xff] }
 0x39e   :  { %v2001_v54 = vadd.f32 1e-09, %v1952_v22  ;;  %v1986_v36 = vpop.xlane.xlu0 %1985  ;;  %v3048_v48 = vpop.eup %3047  ;;  %v559_v43 = vmul.f32 %v5606_v40, %v4498_v12  ;;  %v4970_v1 = vmul.f32 %v5607_v51, %v558_v21  ;;  %v1578_v34 = vmul.f32 %v5608_v17, %v1546_v44  ;;  %v5616_v21 = vld [vmem:[#allocation158_spill] sm:$0xff] }
 0x39f   :  { %v2018_v2 = vadd.f32 1e-09, %v1986_v36  ;;  %v1579_v39 = vmul.f32 %v5609_v62, %v1547_v26  ;;  %v1091_v6 = vadd.f32 %v1059_v50, %v572_v8  ;;  %v1075_v55 = vmul.f32 %v5610_v30, %v1043_v7 }
 0x3a0   :  { %3065 = vrcp.f32 %v2001_v54  ;;  %v1595_v32 = vmul.f32 %v5611_v14, %v1563_v61  ;;  %v1061_v41 = vmul.f32 %v5612_v42, %v1029_v63  ;;  %v1092_v22 = vadd.f32 %v1060_v47, %v573_v45  ;;  %v5617_v61 = vld [vmem:[#allocation159_spill] sm:$0xff] }
 0x3a1   :  { %v1984_v56 = vpop.xlane.xlu1 %1983  ;;  %3067 = vrcp.f32 %v2018_v2  ;;  %v1062_v33 = vmul.f32 %v5614_v13, %v1030_v49  ;;  %v1108_v18 = vadd.f32 %v1076_v60, %v589_v59  ;;  %v1594_v36 = vmul.f32 %v5615_v31, %v1562_v35  ;;  %v5619_v49 = vld [vmem:[#allocation153_spill] sm:$0xff]  ;;  %v5620_v60 = vld [vmem:[#allocation160_spill] sm:$0xff] }
 0x3a2   :  { %v2017_v24 = vadd.f32 1e-09, %v1984_v56  ;;  %v3050_v3 = vpop.eup %3049  ;;  %v1549_v28 = vmul.f32 %v3048_v48, %v4634_v58  ;;  %v1610_v57 = vadd.f32 %v1578_v34, %v1091_v6  ;;  %v1611_v20 = vadd.f32 %v1579_v39, %v1092_v22  ;;  %v5622_v34 = vld [vmem:[#allocation75_spill] sm:$0xff]  ;;  %v5623_v6 = vld [vmem:[#allocation161_spill] sm:$0xff] }
 0x3a3   :  { %v3052_v15 = vpop.eup %3051  ;;  %v2066_v0 = vmul.f32 %v3050_v3, %v4657_v25  ;;  %v1107_v44 = vadd.f32 %v1075_v55, %v588_v11  ;;  %v1627_v26 = vadd.f32 %v1595_v32, %v1108_v18  ;;  %v1045_v56 = vmul.f32 %v4917_v4, %v4576_v10 }
 0x3a4   :  { %3069 = vrcp.f32 %v2017_v24  ;;  %v1548_v8 = vmul.f32 %v3052_v15, %v4634_v58  ;;  %v1046_v59 = vmul.f32 %v4922_v38, %v4576_v10  ;;  %v1581_v3 = vmul.f32 %v5619_v49, %v1549_v28  ;;  %v5621_v15 = vld [vmem:[#allocation73_spill] sm:$0xff] }
 0x3a5   :  { %v3054_v23 = vpop.eup %3053  ;;  %v2098_v46 = vmul.f32 %v5613_v19, %v2066_v0  ;;  %v1626_v24 = vadd.f32 %v1594_v36, %v1107_v44  ;;  %v1093_v40 = vadd.f32 %v1061_v41, %v4942_v52  ;;  %v1094_v51 = vadd.f32 %v1062_v33, %v4947_v16  ;;  %v5626_v16 = vld [vmem:[#allocation162_spill] sm:$0xff] }
 0x3a6   :  { %v3056_v12 = vpop.eup %3055  ;;  %v2065_v27 = vmul.f32 %v3054_v23, %v4657_v25  ;;  %v1580_v47 = vmul.f32 %v5618_v29, %v1548_v8  ;;  %v1077_v17 = vmul.f32 %v5621_v15, %v1045_v56  ;;  %v1078_v62 = vmul.f32 %v5622_v34, %v1046_v59  ;;  %v5628_v8 = vld [vmem:[#allocation163_spill] sm:$0xff] }
 0x3a7   :  { %v3058_v54 = vpop.eup %3057  ;;  %v2130_v50 = vadd.f32 %v2098_v46, %v1611_v20  ;;  %v1565_v11 = vmul.f32 %v3056_v12, %v4634_v58  ;;  %v1613_v32 = vadd.f32 %v1581_v3, %v1094_v51  ;;  %v5625_v12 = vld [vmem:[#allocation155_spill] sm:$0xff]  ;;  %v5629_v20 = vld [vmem:[#allocation164_spill] sm:$0xff] }
 0x3a8   :  { %v3060_v53 = vpop.eup %3059  ;;  %v2097_v37 = vmul.f32 %v5616_v21, %v2065_v27  ;;  %v2082_v45 = vmul.f32 %v3058_v54, %v4657_v25  ;;  %v1612_v14 = vadd.f32 %v1580_v47, %v1093_v40  ;;  %v5627_v27 = vld [vmem:[#allocation156_spill] sm:$0xff]  ;;  %v1109_v33 = vadd.f32 %v1077_v17, %v4970_v1 }
 0x3a9   :  { %v3062_v2 = vpop.eup %3061  ;;  %v1564_v10 = vmul.f32 %v3060_v53, %v4634_v58  ;;  %v5624_v58 = vld [vmem:[#allocation36_spill] sm:$0xff]  ;;  %v1597_v52 = vmul.f32 %v5625_v12, %v1565_v11 }
 0x3aa   :  { %v2129_v5 = vadd.f32 %v2097_v37, %v1610_v57  ;;  %v2081_v7 = vmul.f32 %v3062_v2, %v4657_v25  ;;  %v2114_v63 = vmul.f32 %v5617_v61, %v2082_v45  ;;  %v3064_v48 = vpop.eup %3063  ;;  %v591_v42 = vmul.f32 %v5624_v58, %v559_v43 }
 0x3ab   :  { %v2068_v35 = vmul.f32 %v3064_v48, %v4657_v25  ;;  %v1596_v19 = vmul.f32 %v5627_v27, %v1564_v10 }
 0x3ac   :  { %v2155_v9 = vpack.c.bf16 %v2130_v50, %v2129_v5  ;;  %v2113_v4 = vmul.f32 %v5620_v60, %v2081_v7  ;;  %v2146_v0 = vadd.f32 %v2114_v63, %v1627_v26  ;;  %v1110_v54 = vadd.f32 %v1078_v62, %v591_v42 }
 0x3ad   :  { %v3066_v38 = vpop.eup %3065  ;;  %v2100_v30 = vmul.f32 %v5623_v6, %v2068_v35  ;;  %v1628_v53 = vadd.f32 %v1596_v19, %v1109_v33 }
 0x3ae   :  { %2496 = vmatprep.mubr.bf16.mxu0 %v2155_v9  ;;  %v2145_v39 = vadd.f32 %v2113_v4, %v1626_v24  ;;  %v2067_v23 = vmul.f32 %v3066_v38, %v4657_v25  ;;  %v3068_v55 = vpop.eup %3067  ;;  %v1629_v57 = vadd.f32 %v1597_v52, %v1110_v54 }
 0x3af   :  { %v2084_v46 = vmul.f32 %v3068_v55, %v4657_v25  ;;  %v2132_v31 = vadd.f32 %v2100_v30, %v1613_v32 }
 0x3b0   :  { %v2163_v41 = vpack.c.bf16 %v2146_v0, %v2145_v39  ;;  %v2099_v22 = vmul.f32 %v5626_v16, %v2067_v23 }
 0x3b1   :  { %v3070_v13 = vpop.eup %3069  ;;  %v2116_v43 = vmul.f32 %v5628_v8, %v2084_v46 }
 0x3b2   :  { %2512 = vmatprep.mubr.bf16.mxu1 %v2163_v41  ;;  %v2131_v18 = vadd.f32 %v2099_v22, %v1612_v14  ;;  %v2083_v36 = vmul.f32 %v3070_v13, %v4657_v25 }
 0x3b3   :  { %v2148_v45 = vadd.f32 %v2116_v43, %v1629_v57 }
 0x3b4   :  { %v2156_v28 = vpack.c.bf16 %v2132_v31, %v2131_v18  ;;  %v2115_v21 = vmul.f32 %v5629_v20, %v2083_v36 }
 0x3b6   :  { %2497 = vmatmul.mubr.bf16.gmra.mxu0 %v2156_v28  ;;  %v2147_v37 = vadd.f32 %v2115_v21, %v1628_v53 }
 0x3b8   :  { %v2164_v2 = vpack.c.bf16 %v2148_v45, %v2147_v37 }
 0x3ba   :  { %2513 = vmatmul.mubr.bf16.gmra.mxu1 %v2164_v2 }
 0x416   :  { %v2486_v1 = vpop.f32.mrf.mxu0 }
 0x417   :  { %2393 = vst.msk [vmem:[%s5146_s5 + $0x10] sm:$0xff] %vm2390_vm0, %v2486_v1 }
 0x418   :  { %v2263_v25 = vpop.f32.mrf.mxu0 }
 0x419   :  { %2391 = vst.msk [vmem:[%s5146_s5] sm:$0xff] %vm2390_vm0, %v2263_v25 }
 0x41a   :  { %v2487_v44 = vpop.f32.mrf.mxu0  ;;  %v2502_v26 = vpop.f32.mrf.mxu1 }
 0x41b   :  { %2394 = vst.msk [vmem:[%s5146_s5 + $0x18] sm:$0xff] %vm2390_vm0, %v2487_v44  ;;  %2409 = vst.msk [vmem:[%s5146_s5 + $0x90] sm:$0xff] %vm2390_vm0, %v2502_v26 }
 0x41c   :  { %v2266_v56 = vpop.f32.mrf.mxu0  ;;  %v2327_v59 = vpop.f32.mrf.mxu1 }
 0x41d   :  { %2392 = vst.msk [vmem:[%s5146_s5 + $0x8] sm:$0xff] %vm2390_vm0, %v2266_v56  ;;  %2407 = vst.msk [vmem:[%s5146_s5 + $0x80] sm:$0xff] %vm2390_vm0, %v2327_v59 }
 0x41e   :  { %v2503_v5 = vpop.f32.mrf.mxu1 }
 0x41f   :  { %2410 = vst.msk [vmem:[%s5146_s5 + $0x98] sm:$0xff] %vm2390_vm0, %v2503_v5 }
 0x420   :  { %v2330_v50 = vpop.f32.mrf.mxu1 }
 0x421   :  { %2408 = vst.msk [vmem:[%s5146_s5 + $0x88] sm:$0xff] %vm2390_vm0, %v2330_v50 }
 0x436   :  { %v2490_v7 = vpop.f32.mrf.mxu0 }
 0x437   :  { %2397 = vst.msk [vmem:[%s5146_s5 + $0x30] sm:$0xff] %vm2390_vm0, %v2490_v7 }
 0x438   :  { %v2279_v61 = vpop.f32.mrf.mxu0 }
 0x439   :  { %2395 = vst.msk [vmem:[%s5146_s5 + $0x20] sm:$0xff] %vm2390_vm0, %v2279_v61 }
 0x43a   :  { %v2491_v63 = vpop.f32.mrf.mxu0  ;;  %v2506_v48 = vpop.f32.mrf.mxu1 }
 0x43b   :  { %2398 = vst.msk [vmem:[%s5146_s5 + $0x38] sm:$0xff] %vm2390_vm0, %v2491_v63  ;;  %2413 = vst.msk [vmem:[%s5146_s5 + $0xb0] sm:$0xff] %vm2390_vm0, %v2506_v48 }
 0x43c   :  { %v2282_v24 = vpop.f32.mrf.mxu0  ;;  %v2343_v29 = vpop.f32.mrf.mxu1 }
 0x43d   :  { %2396 = vst.msk [vmem:[%s5146_s5 + $0x28] sm:$0xff] %vm2390_vm0, %v2282_v24  ;;  %2411 = vst.msk [vmem:[%s5146_s5 + $0xa0] sm:$0xff] %vm2390_vm0, %v2343_v29 }
 0x43e   :  { %v2507_v47 = vpop.f32.mrf.mxu1 }
 0x43f   :  { %2414 = vst.msk [vmem:[%s5146_s5 + $0xb8] sm:$0xff] %vm2390_vm0, %v2507_v47 }
 0x440   :  { %v2346_v49 = vpop.f32.mrf.mxu1 }
 0x441   :  { %2412 = vst.msk [vmem:[%s5146_s5 + $0xa8] sm:$0xff] %vm2390_vm0, %v2346_v49 }
 0x456   :  { %v2494_v3 = vpop.f32.mrf.mxu0 }
 0x457   :  { %2401 = vst.msk [vmem:[%s5146_s5 + $0x50] sm:$0xff] %vm2390_vm0, %v2494_v3 }
 0x458   :  { %v2295_v11 = vpop.f32.mrf.mxu0 }
 0x459   :  { %2399 = vst.msk [vmem:[%s5146_s5 + $0x40] sm:$0xff] %vm2390_vm0, %v2295_v11 }
 0x45a   :  { %v2495_v9 = vpop.f32.mrf.mxu0  ;;  %v2510_v60 = vpop.f32.mrf.mxu1 }
 0x45b   :  { %2402 = vst.msk [vmem:[%s5146_s5 + $0x58] sm:$0xff] %vm2390_vm0, %v2495_v9  ;;  %2417 = vst.msk [vmem:[%s5146_s5 + $0xd0] sm:$0xff] %vm2390_vm0, %v2510_v60 }
 0x45c   :  { %v2298_v4 = vpop.f32.mrf.mxu0  ;;  %v2359_v35 = vpop.f32.mrf.mxu1 }
 0x45d   :  { %2400 = vst.msk [vmem:[%s5146_s5 + $0x48] sm:$0xff] %vm2390_vm0, %v2298_v4  ;;  %2415 = vst.msk [vmem:[%s5146_s5 + $0xc0] sm:$0xff] %vm2390_vm0, %v2359_v35 }
 0x45e   :  { %v2511_v10 = vpop.f32.mrf.mxu1 }
 0x45f   :  { %2418 = vst.msk [vmem:[%s5146_s5 + $0xd8] sm:$0xff] %vm2390_vm0, %v2511_v10 }
 0x460   :  { %v2362_v38 = vpop.f32.mrf.mxu1 }
 0x461   :  { %2416 = vst.msk [vmem:[%s5146_s5 + $0xc8] sm:$0xff] %vm2390_vm0, %v2362_v38 }
 0x476   :  { %v2498_v40 = vpop.f32.mrf.mxu0 }
 0x477   :  { %2405 = vst.msk [vmem:[%s5146_s5 + $0x70] sm:$0xff] %vm2390_vm0, %v2498_v40 }
 0x478   :  { %v2311_v51 = vpop.f32.mrf.mxu0 }
 0x479   :  { %2403 = vst.msk [vmem:[%s5146_s5 + $0x60] sm:$0xff] %vm2390_vm0, %v2311_v51 }
 0x47a   :  { %v2499_v15 = vpop.f32.mrf.mxu0  ;;  %v2514_v17 = vpop.f32.mrf.mxu1 }
 0x47b   :  { %2406 = vst.msk [vmem:[%s5146_s5 + $0x78] sm:$0xff] %vm2390_vm0, %v2499_v15  ;;  %2421 = vst.msk [vmem:[%s5146_s5 + $0xf0] sm:$0xff] %vm2390_vm0, %v2514_v17 }
 0x47c   :  { %v2314_v34 = vpop.f32.mrf.mxu0  ;;  %v2375_v62 = vpop.f32.mrf.mxu1 }
 0x47d   :  { %2404 = vst.msk [vmem:[%s5146_s5 + $0x68] sm:$0xff] %vm2390_vm0, %v2314_v34  ;;  %2419 = vst.msk [vmem:[%s5146_s5 + $0xe0] sm:$0xff] %vm2390_vm0, %v2375_v62 }
 0x47e   :  { %v2515_v39 = vpop.f32.mrf.mxu1 }
 0x47f   :  { %2422 = vst.msk [vmem:[%s5146_s5 + $0xf8] sm:$0xff] %vm2390_vm0, %v2515_v39 }
 0x480   :  { %v2378_v0 = vpop.f32.mrf.mxu1 }
 0x481   :  { %2420 = vst.msk [vmem:[%s5146_s5 + $0xe8] sm:$0xff] %vm2390_vm0, %v2378_v0 }
 0x482   :  { %2427 = vsyncpa [#allocation3], 1 }

</bundles_post_ra>
